<compile_context>
chip_gen: v6e
topology: v6e:2x2x1
jax: 0.10.0
libtpu: 0.0.40
codegen_flags: <defaults>
</compile_context>

<pallas_src>
import math

import jax
import jax.numpy as jnp
from jax.experimental import pallas as pl
from jax.experimental.pallas import tpu as pltpu


def _round_up(x, m):
    return ((x + m - 1) // m) * m


def _critic_kernel(s_ref, a_ref,
                   w1s, w1a, w2, b2, w3, b3, w4, b4, w5, b5, w6, b6,
                   out_ref):
    """One batch tile. Activations are [features, batch_tile] (batch on lanes)."""
    f32 = jnp.float32
    bf16 = jnp.bfloat16

    # fc1 with fused concat: W1 @ [s; a] == W1s @ s + W1a_aug @ a_aug, where the
    # augmented action block has a constant-1 row so the fc1 bias rides inside
    # the same K=8, lane-aligned MXU matmul (no separate bias add for fc1).
    h = (jnp.dot(w1s[...], s_ref[...], preferred_element_type=f32)
         + jnp.dot(w1a[...], a_ref[...], preferred_element_type=f32))
    h = jnp.maximum(h, 0.0).astype(bf16)

    def dense_relu(h, w_ref, b_ref):
        # bf16 MXU operands, f32 accumulation; bias + ReLU on the VPU in f32,
        # activation carried in bf16 between layers (halves VMEM pressure).
        y = jnp.dot(w_ref[...], h, preferred_element_type=f32) + b_ref[...]
        return jnp.maximum(y, 0.0).astype(bf16)

    h = dense_relu(h, w2, b2)
    h = dense_relu(h, w3, b3)
    h = dense_relu(h, w4, b4)
    h = dense_relu(h, w5, b5)

    # fc6 (32 -> 1): (1, 32) @ (32, tb) lands lane-major -> unmasked f32 stores.
    q = jnp.dot(w6[...], h, preferred_element_type=f32) + b6[...]
    out_ref[...] = q.astype(out_ref.dtype)


def prepare_critic_params(params, state_dim):
    """One-time conversion from PyTorch-layout params to kernel layout.

    * Weights stay in PyTorch (out_features, in_features) layout, cast to bf16.
    * fc1 weight is split at the state/action boundary (fused concat). The
      action block is padded to a multiple of 8 input columns: the first pad
      column holds the fc1 bias (it multiplies the constant-1 row of the
      augmented action input), the remaining pad columns are zero.
    * fc2..fc6 biases stay f32 as (out, 1) columns (cheap lane-broadcast adds).
    """
    (w1, b1), (w2, b2), (w3, b3), (w4, b4), (w5, b5), (w6, b6) = params
    bf, f32 = jnp.bfloat16, jnp.float32

    a_dim = w1.shape[1] - state_dim
    k_aug = _round_up(a_dim + 1, 8)
    w1a_aug = jnp.concatenate(
        [w1[:, state_dim:].astype(f32),
         b1.reshape(-1, 1).astype(f32),
         jnp.zeros((w1.shape[0], k_aug - a_dim - 1), f32)], axis=1)

    def col(b):
        return b.reshape(-1, 1).astype(f32)

    return [
        w1[:, :state_dim].astype(bf), w1a_aug.astype(bf),
        w2.astype(bf), col(b2),
        w3.astype(bf), col(b3),
        w4.astype(bf), col(b4),
        w5.astype(bf), col(b5),
        w6.astype(bf), col(b6),
    ]


def critic_forward(states, actions, kparams, *, tile_b=1024):
    """Batch-tiled Pallas call: inputs/output tiled on the lane (batch) axis,
    weights VMEM-resident via a constant index_map."""
    batch, s_dim = states.shape
    a_dim = actions.shape[1]
    k_aug = kparams[1].shape[1]          # padded action K (actions + 1s + zeros)
    f32, bf16 = jnp.float32, jnp.bfloat16

    # Lane-major inputs (batch on the 128-lane axis); bf16 halves the input DMA.
    s_t = states.astype(f32).T.astype(bf16)                        # (s_dim, batch)
    a_aug = jnp.concatenate(
        [actions.astype(f32),
         jnp.ones((batch, 1), f32),
         jnp.zeros((batch, k_aug - a_dim - 1), f32)], axis=1)      # (batch, k_aug)
    a_t = a_aug.T.astype(bf16)                                     # (k_aug, batch)

    # Tile selection: big tiles amortize per-grid-step overhead; once the batch
    # is large enough, guarantee >= 2 grid steps so v7x's two TCs both get work.
    tile_b = max(128, _round_up(tile_b, 128))
    if batch < 256:
        tb = batch                                   # one (possibly ragged) tile
    else:
        tb = min(tile_b, _round_up(pl.cdiv(batch, 2), 128))
    grid = (pl.cdiv(batch, tb),)
    n_total = grid[0] * tb

    def batch_tiled(rows):
        return pl.BlockSpec((rows, tb), lambda i: (0, i))

    def resident(shape):
        # Constant index_map -> same block every grid step -> fetched once.
        return pl.BlockSpec(shape, lambda i: (0, 0))

    in_specs = [batch_tiled(s_dim), batch_tiled(k_aug)]
    in_specs += [resident(p.shape) for p in kparams]
    out_spec = pl.BlockSpec((1, tb), lambda i: (0, i))   # lane-dense output row

    # Advisory cost estimate (lets XLA overlap this call with surrounding work).
    dims = [s_dim + k_aug] + [kparams[i].shape[0] for i in (0, 2, 4, 6, 8, 10)]
    flops = 2 * n_total * sum(dims[j] * dims[j + 1] for j in range(len(dims) - 1))
    bytes_accessed = sum(int(p.size) * p.dtype.itemsize for p in kparams)
    bytes_accessed += int(s_t.size) * 2 + int(a_t.size) * 2 + n_total * 4

    out = pl.pallas_call(
        _critic_kernel,
        out_shape=jax.ShapeDtypeStruct((1, n_total), jnp.float32),
        grid=grid,
        in_specs=in_specs,
        out_specs=out_spec,
        compiler_params=pltpu.CompilerParams(
            dimension_semantics=("parallel",),
            vmem_limit_bytes=32 << 20,
        ),
        cost_estimate=pl.CostEstimate(
            flops=flops, transcendentals=0, bytes_accessed=bytes_accessed),
    )(s_t, a_t, *kparams)

    return out[0, :batch].reshape(batch, 1)


def init_critic_params(key, state_size, action_size, agents_num,
                       fc1_units=1024, fc2_units=512, fc3_units=256,
                       fc4_units=128, fc5_units=32):
    """Deterministic parameter init mimicking the PyTorch module.

    Weights are in PyTorch layout (out_features, in_features). hidden_init uses
    weight.size()[0] (== out_features) as "fan_in", so lim = 1/sqrt(out_features)
    for fc1..fc5; fc6 weights in (-3e-3, 3e-3). Biases keep the PyTorch Linear
    default: U(-1/sqrt(in_features), +1/sqrt(in_features)).
    """
    in_dim = state_size * agents_num + action_size * agents_num
    sizes = [in_dim, fc1_units, fc2_units, fc3_units, fc4_units, fc5_units, 1]

    params = []
    for layer_idx in range(6):
        fan_in, fan_out = sizes[layer_idx], sizes[layer_idx + 1]
        key, kw, kb = jax.random.split(key, 3)
        lim_w = (1.0 / math.sqrt(fan_out)) if layer_idx < 5 else 3e-3
        lim_b = 1.0 / math.sqrt(fan_in)
        w = jax.random.uniform(kw, (fan_out, fan_in), jnp.float32,
                               minval=-lim_w, maxval=lim_w)
        b = jax.random.uniform(kb, (fan_out,), jnp.float32,
                               minval=-lim_b, maxval=lim_b)
        params.append((w, b))
    return params


if __name__ == "__main__":
    # Small shapes consistent with the module's forward signature.
    state_size = 24
    action_size = 2
    agents_num = 2
    batch = 8

    key = jax.random.PRNGKey(0)
    key, ks, ka = jax.random.split(key, 3)
    states = jax.random.normal(ks, (batch, state_size * agents_num), jnp.float32)
    actions = jax.random.normal(ka, (batch, action_size * agents_num), jnp.float32)

    params = init_critic_params(key, state_size, action_size, agents_num)
    kparams = prepare_critic_params(params, state_size * agents_num)

    q_values = critic_forward(states, actions, kparams)
    q_values = jax.block_until_ready(q_values)

    # Reference check in plain f32 JAX (kernel uses bf16 matmul operands with
    # f32 accumulation, so allow a modest tolerance).
    x = jnp.concatenate([states, actions], axis=1)
    for i, (w, b) in enumerate(params):
        x = x @ w.T + b
        if i < 5:
            x = jnp.maximum(x, 0.0)

    assert q_values.shape == (batch, 1), q_values.shape
    max_diff = jnp.max(jnp.abs(q_values - x))
    assert jnp.allclose(q_values, x, atol=1e-2, rtol=1e-2), (
        f"max abs diff: {max_diff}")

    print("KERNEL_OK")
</pallas_src>

<mosaic_0001>
module attributes {stable_mosaic.version = 11 : i64} {
  func.func @_critic_kernel(%arg0: i32, %arg1: memref<48x8xbf16, #tpu.memory_space<vmem>>, %arg2: memref<8x8xbf16, #tpu.memory_space<vmem>>, %arg3: memref<1024x48xbf16, #tpu.memory_space<vmem>>, %arg4: memref<1024x8xbf16, #tpu.memory_space<vmem>>, %arg5: memref<512x1024xbf16, #tpu.memory_space<vmem>>, %arg6: memref<512x1xf32, #tpu.memory_space<vmem>>, %arg7: memref<256x512xbf16, #tpu.memory_space<vmem>>, %arg8: memref<256x1xf32, #tpu.memory_space<vmem>>, %arg9: memref<128x256xbf16, #tpu.memory_space<vmem>>, %arg10: memref<128x1xf32, #tpu.memory_space<vmem>>, %arg11: memref<32x128xbf16, #tpu.memory_space<vmem>>, %arg12: memref<32x1xf32, #tpu.memory_space<vmem>>, %arg13: memref<1x32xbf16, #tpu.memory_space<vmem>>, %arg14: memref<1x1xf32, #tpu.memory_space<vmem>>, %arg15: memref<1x8xf32, #tpu.memory_space<vmem>>) attributes {dimension_semantics = [#tpu.dimension_semantics<parallel>], iteration_bounds = array<i64: 1>, scalar_prefetch = 0 : i64, scratch_operands = 0 : i64, tpu.core_type = #tpu.core_type<tc>, window_params = [{transform_indices = @transform_0, window_bounds = array<i64: 48, 8>}, {transform_indices = @transform_1, window_bounds = array<i64: 8, 8>}, {pipeline_mode = #tpu.pipeline_mode<synchronous>, transform_indices = @transform_2, window_bounds = array<i64: 1024, 48>}, {pipeline_mode = #tpu.pipeline_mode<synchronous>, transform_indices = @transform_3, window_bounds = array<i64: 1024, 8>}, {pipeline_mode = #tpu.pipeline_mode<synchronous>, transform_indices = @transform_4, window_bounds = array<i64: 512, 1024>}, {pipeline_mode = #tpu.pipeline_mode<synchronous>, transform_indices = @transform_5, window_bounds = array<i64: 512, 1>}, {pipeline_mode = #tpu.pipeline_mode<synchronous>, transform_indices = @transform_6, window_bounds = array<i64: 256, 512>}, {pipeline_mode = #tpu.pipeline_mode<synchronous>, transform_indices = @transform_7, window_bounds = array<i64: 256, 1>}, {pipeline_mode = #tpu.pipeline_mode<synchronous>, transform_indices = @transform_8, window_bounds = array<i64: 128, 256>}, {pipeline_mode = #tpu.pipeline_mode<synchronous>, transform_indices = @transform_9, window_bounds = array<i64: 128, 1>}, {pipeline_mode = #tpu.pipeline_mode<synchronous>, transform_indices = @transform_10, window_bounds = array<i64: 32, 128>}, {pipeline_mode = #tpu.pipeline_mode<synchronous>, transform_indices = @transform_11, window_bounds = array<i64: 32, 1>}, {pipeline_mode = #tpu.pipeline_mode<synchronous>, transform_indices = @transform_12, window_bounds = array<i64: 1, 32>}, {pipeline_mode = #tpu.pipeline_mode<synchronous>, transform_indices = @transform_13, window_bounds = array<i64: 1, 1>}, {transform_indices = @transform_14, window_bounds = array<i64: 1, 8>}]} {
    %c0 = arith.constant 0 : index
    %c0_0 = arith.constant 0 : index
    %0 = vector.load %arg3[%c0, %c0_0] : memref<1024x48xbf16, #tpu.memory_space<vmem>>, vector<1024x48xbf16>
    %c0_1 = arith.constant 0 : index
    %c0_2 = arith.constant 0 : index
    %1 = vector.load %arg1[%c0_1, %c0_2] : memref<48x8xbf16, #tpu.memory_space<vmem>>, vector<48x8xbf16>
    %cst = arith.constant dense<0.000000e+00> : vector<1024x8xf32>
    %2 = tpu.matmul %0, %1, %cst {dimension_numbers = #tpu.dot_dimension_numbers<[1], [0], [0], [1], [0, 0, 1, 1], [], []>} : vector<1024x48xbf16>, vector<48x8xbf16>, vector<1024x8xf32> -> vector<1024x8xf32>
    %c0_3 = arith.constant 0 : index
    %c0_4 = arith.constant 0 : index
    %3 = vector.load %arg4[%c0_3, %c0_4] : memref<1024x8xbf16, #tpu.memory_space<vmem>>, vector<1024x8xbf16>
    %c0_5 = arith.constant 0 : index
    %c0_6 = arith.constant 0 : index
    %4 = vector.load %arg2[%c0_5, %c0_6] : memref<8x8xbf16, #tpu.memory_space<vmem>>, vector<8x8xbf16>
    %cst_7 = arith.constant dense<0.000000e+00> : vector<1024x8xf32>
    %5 = tpu.matmul %3, %4, %cst_7 {dimension_numbers = #tpu.dot_dimension_numbers<[1], [0], [0], [1], [0, 0, 1, 1], [], []>} : vector<1024x8xbf16>, vector<8x8xbf16>, vector<1024x8xf32> -> vector<1024x8xf32>
    %6 = arith.addf %2, %5 : vector<1024x8xf32>
    %cst_8 = arith.constant 0.000000e+00 : f32
    %7 = vector.broadcast %cst_8 : f32 to vector<1024x8xf32>
    %8 = arith.maximumf %6, %7 : vector<1024x8xf32>
    %9 = arith.truncf %8 : vector<1024x8xf32> to vector<1024x8xbf16>
    %c0_9 = arith.constant 0 : index
    %c0_10 = arith.constant 0 : index
    %10 = vector.load %arg5[%c0_9, %c0_10] : memref<512x1024xbf16, #tpu.memory_space<vmem>>, vector<512x1024xbf16>
    %cst_11 = arith.constant dense<0.000000e+00> : vector<512x8xf32>
    %11 = tpu.matmul %10, %9, %cst_11 {dimension_numbers = #tpu.dot_dimension_numbers<[1], [0], [0], [1], [0, 0, 1, 1], [], []>} : vector<512x1024xbf16>, vector<1024x8xbf16>, vector<512x8xf32> -> vector<512x8xf32>
    %c0_12 = arith.constant 0 : index
    %c0_13 = arith.constant 0 : index
    %12 = vector.load %arg6[%c0_12, %c0_13] : memref<512x1xf32, #tpu.memory_space<vmem>>, vector<512x1xf32>
    %13 = vector.broadcast %12 : vector<512x1xf32> to vector<512x8xf32>
    %14 = arith.addf %11, %13 : vector<512x8xf32>
    %cst_14 = arith.constant 0.000000e+00 : f32
    %15 = vector.broadcast %cst_14 : f32 to vector<512x8xf32>
    %16 = arith.maximumf %14, %15 : vector<512x8xf32>
    %17 = arith.truncf %16 : vector<512x8xf32> to vector<512x8xbf16>
    %c0_15 = arith.constant 0 : index
    %c0_16 = arith.constant 0 : index
    %18 = vector.load %arg7[%c0_15, %c0_16] : memref<256x512xbf16, #tpu.memory_space<vmem>>, vector<256x512xbf16>
    %cst_17 = arith.constant dense<0.000000e+00> : vector<256x8xf32>
    %19 = tpu.matmul %18, %17, %cst_17 {dimension_numbers = #tpu.dot_dimension_numbers<[1], [0], [0], [1], [0, 0, 1, 1], [], []>} : vector<256x512xbf16>, vector<512x8xbf16>, vector<256x8xf32> -> vector<256x8xf32>
    %c0_18 = arith.constant 0 : index
    %c0_19 = arith.constant 0 : index
    %20 = vector.load %arg8[%c0_18, %c0_19] : memref<256x1xf32, #tpu.memory_space<vmem>>, vector<256x1xf32>
    %21 = vector.broadcast %20 : vector<256x1xf32> to vector<256x8xf32>
    %22 = arith.addf %19, %21 : vector<256x8xf32>
    %cst_20 = arith.constant 0.000000e+00 : f32
    %23 = vector.broadcast %cst_20 : f32 to vector<256x8xf32>
    %24 = arith.maximumf %22, %23 : vector<256x8xf32>
    %25 = arith.truncf %24 : vector<256x8xf32> to vector<256x8xbf16>
    %c0_21 = arith.constant 0 : index
    %c0_22 = arith.constant 0 : index
    %26 = vector.load %arg9[%c0_21, %c0_22] : memref<128x256xbf16, #tpu.memory_space<vmem>>, vector<128x256xbf16>
    %cst_23 = arith.constant dense<0.000000e+00> : vector<128x8xf32>
    %27 = tpu.matmul %26, %25, %cst_23 {dimension_numbers = #tpu.dot_dimension_numbers<[1], [0], [0], [1], [0, 0, 1, 1], [], []>} : vector<128x256xbf16>, vector<256x8xbf16>, vector<128x8xf32> -> vector<128x8xf32>
    %c0_24 = arith.constant 0 : index
    %c0_25 = arith.constant 0 : index
    %28 = vector.load %arg10[%c0_24, %c0_25] : memref<128x1xf32, #tpu.memory_space<vmem>>, vector<128x1xf32>
    %29 = vector.broadcast %28 : vector<128x1xf32> to vector<128x8xf32>
    %30 = arith.addf %27, %29 : vector<128x8xf32>
    %cst_26 = arith.constant 0.000000e+00 : f32
    %31 = vector.broadcast %cst_26 : f32 to vector<128x8xf32>
    %32 = arith.maximumf %30, %31 : vector<128x8xf32>
    %33 = arith.truncf %32 : vector<128x8xf32> to vector<128x8xbf16>
    %c0_27 = arith.constant 0 : index
    %c0_28 = arith.constant 0 : index
    %34 = vector.load %arg11[%c0_27, %c0_28] : memref<32x128xbf16, #tpu.memory_space<vmem>>, vector<32x128xbf16>
    %cst_29 = arith.constant dense<0.000000e+00> : vector<32x8xf32>
    %35 = tpu.matmul %34, %33, %cst_29 {dimension_numbers = #tpu.dot_dimension_numbers<[1], [0], [0], [1], [0, 0, 1, 1], [], []>} : vector<32x128xbf16>, vector<128x8xbf16>, vector<32x8xf32> -> vector<32x8xf32>
    %c0_30 = arith.constant 0 : index
    %c0_31 = arith.constant 0 : index
    %36 = vector.load %arg12[%c0_30, %c0_31] : memref<32x1xf32, #tpu.memory_space<vmem>>, vector<32x1xf32>
    %37 = vector.broadcast %36 : vector<32x1xf32> to vector<32x8xf32>
    %38 = arith.addf %35, %37 : vector<32x8xf32>
    %cst_32 = arith.constant 0.000000e+00 : f32
    %39 = vector.broadcast %cst_32 : f32 to vector<32x8xf32>
    %40 = arith.maximumf %38, %39 : vector<32x8xf32>
    %41 = arith.truncf %40 : vector<32x8xf32> to vector<32x8xbf16>
    %c0_33 = arith.constant 0 : index
    %c0_34 = arith.constant 0 : index
    %42 = vector.load %arg13[%c0_33, %c0_34] : memref<1x32xbf16, #tpu.memory_space<vmem>>, vector<1x32xbf16>
    %cst_35 = arith.constant dense<0.000000e+00> : vector<1x8xf32>
    %43 = tpu.matmul %42, %41, %cst_35 {dimension_numbers = #tpu.dot_dimension_numbers<[1], [0], [0], [1], [0, 0, 1, 1], [], []>} : vector<1x32xbf16>, vector<32x8xbf16>, vector<1x8xf32> -> vector<1x8xf32>
    %c0_36 = arith.constant 0 : index
    %c0_37 = arith.constant 0 : index
    %44 = vector.load %arg14[%c0_36, %c0_37] : memref<1x1xf32, #tpu.memory_space<vmem>>, vector<1x1xf32>
    %45 = vector.broadcast %44 : vector<1x1xf32> to vector<1x8xf32>
    %46 = arith.addf %43, %45 : vector<1x8xf32>
    %c0_38 = arith.constant 0 : index
    %c0_39 = arith.constant 0 : index
    %47 = vector.load %arg15[%c0_38, %c0_39] : memref<1x8xf32, #tpu.memory_space<vmem>>, vector<1x8xf32>
    tpu.vector_store %arg15[%c0_38, %c0_39], %46 {strides = array<i32>} : memref<1x8xf32, #tpu.memory_space<vmem>>, vector<1x8xf32>,
    return
  }
  func.func @transform_0(%arg0: i32) -> (i32, i32) {
    %c0_i32 = arith.constant 0 : i32
    %c0_i32_0 = arith.constant 0 : i32
    return %c0_i32, %arg0 : i32, i32
  }
  func.func @transform_1(%arg0: i32) -> (i32, i32) {
    %c0_i32 = arith.constant 0 : i32
    %c0_i32_0 = arith.constant 0 : i32
    return %c0_i32, %arg0 : i32, i32
  }
  func.func @transform_2(%arg0: i32) -> (i32, i32) {
    %c0_i32 = arith.constant 0 : i32
    %c0_i32_0 = arith.constant 0 : i32
    %c0_i32_1 = arith.constant 0 : i32
    return %c0_i32, %c0_i32_0 : i32, i32
  }
  func.func @transform_3(%arg0: i32) -> (i32, i32) {
    %c0_i32 = arith.constant 0 : i32
    %c0_i32_0 = arith.constant 0 : i32
    %c0_i32_1 = arith.constant 0 : i32
    return %c0_i32, %c0_i32_0 : i32, i32
  }
  func.func @transform_4(%arg0: i32) -> (i32, i32) {
    %c0_i32 = arith.constant 0 : i32
    %c0_i32_0 = arith.constant 0 : i32
    %c0_i32_1 = arith.constant 0 : i32
    return %c0_i32, %c0_i32_0 : i32, i32
  }
  func.func @transform_5(%arg0: i32) -> (i32, i32) {
    %c0_i32 = arith.constant 0 : i32
    %c0_i32_0 = arith.constant 0 : i32
    %c0_i32_1 = arith.constant 0 : i32
    return %c0_i32, %c0_i32_0 : i32, i32
  }
  func.func @transform_6(%arg0: i32) -> (i32, i32) {
    %c0_i32 = arith.constant 0 : i32
    %c0_i32_0 = arith.constant 0 : i32
    %c0_i32_1 = arith.constant 0 : i32
    return %c0_i32, %c0_i32_0 : i32, i32
  }
  func.func @transform_7(%arg0: i32) -> (i32, i32) {
    %c0_i32 = arith.constant 0 : i32
    %c0_i32_0 = arith.constant 0 : i32
    %c0_i32_1 = arith.constant 0 : i32
    return %c0_i32, %c0_i32_0 : i32, i32
  }
  func.func @transform_8(%arg0: i32) -> (i32, i32) {
    %c0_i32 = arith.constant 0 : i32
    %c0_i32_0 = arith.constant 0 : i32
    %c0_i32_1 = arith.constant 0 : i32
    return %c0_i32, %c0_i32_0 : i32, i32
  }
  func.func @transform_9(%arg0: i32) -> (i32, i32) {
    %c0_i32 = arith.constant 0 : i32
    %c0_i32_0 = arith.constant 0 : i32
    %c0_i32_1 = arith.constant 0 : i32
    return %c0_i32, %c0_i32_0 : i32, i32
  }
  func.func @transform_10(%arg0: i32) -> (i32, i32) {
    %c0_i32 = arith.constant 0 : i32
    %c0_i32_0 = arith.constant 0 : i32
    %c0_i32_1 = arith.constant 0 : i32
    return %c0_i32, %c0_i32_0 : i32, i32
  }
  func.func @transform_11(%arg0: i32) -> (i32, i32) {
    %c0_i32 = arith.constant 0 : i32
    %c0_i32_0 = arith.constant 0 : i32
    %c0_i32_1 = arith.constant 0 : i32
    return %c0_i32, %c0_i32_0 : i32, i32
  }
  func.func @transform_12(%arg0: i32) -> (i32, i32) {
    %c0_i32 = arith.constant 0 : i32
    %c0_i32_0 = arith.constant 0 : i32
    %c0_i32_1 = arith.constant 0 : i32
    return %c0_i32, %c0_i32_0 : i32, i32
  }
  func.func @transform_13(%arg0: i32) -> (i32, i32) {
    %c0_i32 = arith.constant 0 : i32
    %c0_i32_0 = arith.constant 0 : i32
    %c0_i32_1 = arith.constant 0 : i32
    return %c0_i32, %c0_i32_0 : i32, i32
  }
  func.func @transform_14(%arg0: i32) -> (i32, i32) {
    %c0_i32 = arith.constant 0 : i32
    %c0_i32_0 = arith.constant 0 : i32
    return %c0_i32, %arg0 : i32, i32
  }
}

</mosaic_0001>

<bundles_post_ra>
// kernel: tpu_custom_call.1
= control target key start
LH: loop header
LB: loop body
LE: loop exit
PB: predicated region body
PF: predicated region fallthrough
CT: control target
= control target key end

     0   :  { %s12478_s0 = inlined_call_operand.vmem [shape: bf16[48,8], index: 0, kind: input, shape index: {}]   ;;  %s12479_s1 = inlined_call_operand.vmem [shape: bf16[8,8], index: 1, kind: input, shape index: {}]   ;;  %s12480_s2 = inlined_call_operand.vmem [shape: bf16[1024,48], index: 2, kind: input, shape index: {}]   ;;  %s12481_s3 = inlined_call_operand.vmem [shape: bf16[1024,8], index: 3, kind: input, shape index: {}]   ;;  %s12482_s4 = inlined_call_operand.vmem [shape: bf16[512,1024], index: 4, kind: input, shape index: {}]   ;;  %s12483_s5 = inlined_call_operand.vmem [shape: f32[512,1], index: 5, kind: input, shape index: {}]   ;;  %s12484_s6 = inlined_call_operand.hbm [shape: bf16[256,512], index: 6, kind: input, shape index: {}]   ;;  %s12485_s7 = inlined_call_operand.vmem [shape: f32[256,1], index: 7, kind: input, shape index: {}]   ;;  %s12486_s8 = inlined_call_operand.vmem [shape: bf16[128,256], index: 8, kind: input, shape index: {}]   ;;  %s12487_s9 = inlined_call_operand.vmem [shape: f32[128,1], index: 9, kind: input, shape index: {}]   ;;  %s12488_s10 = inlined_call_operand.vmem [shape: bf16[32,128], index: 10, kind: input, shape index: {}]   ;;  %s12489_s11 = inlined_call_operand.vmem [shape: f32[32,1], index: 11, kind: input, shape index: {}]   ;;  %s12490_s12 = inlined_call_operand.vmem [shape: bf16[1,32], index: 12, kind: input, shape index: {}]   ;;  %s12491_s13 = inlined_call_operand.<no memory space> [shape: f32[1,1], index: 13, kind: input, shape index: {}]   ;;  %s12492_s14 = inlined_call_operand.hbm [shape: f32[1,8], index: 14, kind: output, shape index: {}]  }
   0x1   :  { %v19_v0 = vstv %s12491_s13 }
   0x2   :  { %20 = vst [vmem:[#allocation2] sm:$0x1] %v19_v0 }
   0x3   :  { %21 = vsyncpa [#allocation4], 0 }
   0x4   :  { %22 = vsyncpa [#allocation5], 0  ;;  %s8889_s15 = smov [#allocation3]  }
   0x5   :  { %s40_s16 = sshll.u32 %s8889_s15, 4  ;;  %s41_s16 = int_to_ptr.vmem [resolvable:$true] %s40_s16 }
   0x6   :  { %s8853_s17 = scalar_lea.vmem %s41_s16, 8192  ;;  %p8858_p1 = scmp.lt.s32.totalorder %s41_s16, %s41_s16 }
   0x7   :  { %p8854_p0 = scmp.ne.s32.totalorder %s41_s16, %s8853_s17  ;;  %p8859_p2 = scmp.lt.s32.totalorder %s8853_s17, %s8853_s17 }
   0x9   :  { %p8860_p3 = por %p8859_p2, %p8858_p1 }
   0xb   :  { %p8861_p4 = pnand %p8860_p3, %p8854_p0 }
   0xd   :  { %8864 = shalt.err (!%p8861_p4)
}
   0xe   :  { %s8890_s18 = smov 256   ;;  %s8891_s19 = smov 16  }
   0xf   :  { %46 = dma.hbm_to_vmem [thread:$0]  %s12484_s6, 8192, %s41_s16, [#allocation4], %s8890_s18, %s8890_s18, %s8891_s19  }
  0x10   :  { %8885 = dma.done.wait [#allocation4], 8192  }
  0x11   :  { %8886 = vsyncadd [#allocation4], 4294959104  ;;  %vm841_vm0 = vcmask 1043456   ;;  %vm648_vm1 = vcmask 64512   ;;  %v327_v1 = vld [vmem:[%s12479_s1] sm:$0xf] }
  0x12   :  { %8582 = vmatprep.subr.msk.bf16.mxu1 %vm841_vm0, %v327_v1  ;;  %v843_v2 = vsel %vm841_vm0, %v327_v1, 0  ;;  %v8592_v3 = vld [vmem:[%s12481_s3 + $0x1d0] sm:$0xff]   ;;  %8581 = vmatprep.subr.msk.bf16.mxu0 %vm841_vm0, %v327_v1  ;;  %v8593_v4 = vld [vmem:[%s12481_s3 + $0x1d8] sm:$0xff]   ;;  %v8594_v5 = vld [vmem:[%s12481_s3 + $0x1e0] sm:$0xff]   ;;  %vm1728_vm2 = vcmask 392192   ;;  %vm8894_vm3 = vmmov 0  }
  0x13   :  { %8580 = vmatpush3.bf16.msra.mxu1 %v843_v2  ;;  %8288 = vmatpush3.bf16.msra.mxu0 %v843_v2  ;;  %v8596_v6 = vld [vmem:[%s12478_s0 + $0x10] sm:$0xff]   ;;  %v8595_v7 = vld [vmem:[%s12481_s3 + $0x1e8] sm:$0xff]   ;;  %v8600_v10 = vld [vmem:[%s12481_s3] sm:$0xff]   ;;  %vm7195_vm4 = vcmask 261120   ;;  %s8895_s17 = smov [#allocation6]   ;;  %vm7239_vm5 = vcmask 57344  }
  0x14   :  { %8405 = vmatprep.mubr.msk.bf16.mxu1 %vm648_vm1, %v8592_v3  ;;  %8417 = vmatprep.subr.bf16.mxu1 %v8596_v6  ;;  %v8597_v8 = vld [vmem:[%s12481_s3 + $0x1f0] sm:$0xff]   ;;  %v8599_v9 = vld [vmem:[%s12478_s0 + $0x8] sm:$0xff]   ;;  %v8602_v12 = vld [vmem:[%s12478_s0] sm:$0xff]   ;;  %s7247_s18 = sshll.u32 %s8895_s17, 4  ;;  %s7248_s18 = int_to_ptr.vmem [resolvable:$true] %s7247_s18 }
  0x15   :  { %v8601_v11 = vld [vmem:[%s12481_s3 + $0x8] sm:$0xff]   ;;  %8289 = vmatprep.mubr.msk.bf16.mxu0 %vm648_vm1, %v8600_v10  ;;  %v8605_v13 = vld [vmem:[%s12481_s3 + $0x10] sm:$0xff]   ;;  %v8598_v14 = vld [vmem:[%s12481_s3 + $0x1f8] sm:$0xff]   ;;  %s8865_s19 = scalar_lea.vmem %s7248_s18, 16  ;;  %s8869_s20 = scalar_lea.vmem %s7248_s18, 32 }
  0x16   :  { %8406 = vmatmul.mubr.msk.bf16.vlgmr.msra.gmra.mxu1 %vm648_vm1, %v8593_v4  ;;  %8290 = vmatmul.mubr.msk.bf16.vlgmr.msra.gmra.mxu0 %vm648_vm1, %v8601_v11  ;;  %v8606_v15 = vld [vmem:[%s12481_s3 + $0x18] sm:$0xff]   ;;  %v8603_v16 = vld [vmem:[%s12480_s2] sm:$0xff]   ;;  %v8604_v18 = vld [vmem:[%s12480_s2 + $0x8] sm:$0xff]   ;;  %p8866_p5 = scmp.ne.s32.totalorder %s7248_s18, %s8865_s19  ;;  %p8870_p6 = scmp.lt.s32.totalorder %s7248_s18, %s7248_s18 }
  0x17   :  { %8409 = vmatprep.mubr.msk.bf16.mxu1 %vm648_vm1, %v8594_v5  ;;  %8418 = vmatpush3.bf16.msra.mxu1 %v8596_v6  ;;  %v8609_v17 = vld [vmem:[%s12481_s3 + $0x20] sm:$0xff]   ;;  %v8610_v19 = vld [vmem:[%s12481_s3 + $0x28] sm:$0xff]   ;;  %v8613_v20 = vld [vmem:[%s12481_s3 + $0x30] sm:$0xff]   ;;  %p8871_p7 = scmp.lt.s32.totalorder %s8869_s20, %s8865_s19 }
  0x18   :  { %8419 = vmatprep.subr.bf16.mxu1 %v8599_v9  ;;  %8293 = vmatprep.mubr.msk.bf16.mxu0 %vm648_vm1, %v8605_v13  ;;  %v8607_v21 = vld [vmem:[%s12480_s2 + $0x10] sm:$0xff]   ;;  %v8608_v22 = vld [vmem:[%s12480_s2 + $0x18] sm:$0xff]   ;;  %v8617_v24 = vld [vmem:[%s12481_s3 + $0x40] sm:$0xff]  }
  0x19   :  { %v8614_v23 = vld [vmem:[%s12481_s3 + $0x38] sm:$0xff]   ;;  %v8611_v25 = vld [vmem:[%s12480_s2 + $0x20] sm:$0xff]   ;;  %v8612_v26 = vld [vmem:[%s12480_s2 + $0x28] sm:$0xff]   ;;  %p8872_p8 = por %p8871_p7, %p8870_p6 }
  0x1a   :  { %v8618_v27 = vld [vmem:[%s12481_s3 + $0x48] sm:$0xff]   ;;  %v8621_v28 = vld [vmem:[%s12481_s3 + $0x50] sm:$0xff]   ;;  %v8616_v30 = vld [vmem:[%s12480_s2 + $0x38] sm:$0xff]  }
  0x1b   :  { %8420 = vmatpush3.bf16.msra.mxu1 %v8599_v9  ;;  %v8615_v29 = vld [vmem:[%s12480_s2 + $0x30] sm:$0xff]   ;;  %v8622_v31 = vld [vmem:[%s12481_s3 + $0x58] sm:$0xff]   ;;  %v8625_v32 = vld [vmem:[%s12481_s3 + $0x60] sm:$0xff]   ;;  %v12493_v9 = vmov 0   ;;  %p8873_p9 = pnand %p8872_p8, %p8866_p5 }
  0x1c   :  { %8421 = vmatprep.subr.bf16.mxu1 %v8602_v12  ;;  %v8619_v33 = vld [vmem:[%s12480_s2 + $0x40] sm:$0xff]   ;;  %v8620_v34 = vld [vmem:[%s12480_s2 + $0x48] sm:$0xff]   ;;  %v8629_v36 = vld [vmem:[%s12481_s3 + $0x70] sm:$0xff]   ;;  %4578 = vmatprep.subr.bf16.mxu0 %v12493_v9 }
  0x1d   :  { %v8626_v35 = vld [vmem:[%s12481_s3 + $0x68] sm:$0xff]   ;;  %v8623_v37 = vld [vmem:[%s12480_s2 + $0x50] sm:$0xff]   ;;  %v8624_v38 = vld [vmem:[%s12480_s2 + $0x58] sm:$0xff]   ;;  %8591 = vset.pattern.permute.xlu1 %v12493_v9  ;;  %8590 = vset.pattern.permute.xlu0 %v12493_v9 }
  0x1e   :  { %8410 = vmatmul.mubr.msk.bf16.gmra.mxu1 %vm648_vm1, %v8595_v7  ;;  %8294 = vmatmul.mubr.msk.bf16.gmra.mxu0 %vm648_vm1, %v8606_v15  ;;  %v8630_v39 = vld [vmem:[%s12481_s3 + $0x78] sm:$0xff]   ;;  %v8633_v40 = vld [vmem:[%s12481_s3 + $0x80] sm:$0xff]   ;;  %v8628_v42 = vld [vmem:[%s12480_s2 + $0x68] sm:$0xff]  }
  0x1f   :  { %8413 = vmatprep.mubr.msk.bf16.mxu1 %vm648_vm1, %v8597_v8  ;;  %8422 = vmatpush3.bf16.msra.mxu1 %v8602_v12  ;;  %v8627_v41 = vld [vmem:[%s12480_s2 + $0x60] sm:$0xff]   ;;  %v8634_v43 = vld [vmem:[%s12481_s3 + $0x88] sm:$0xff]   ;;  %v8637_v44 = vld [vmem:[%s12481_s3 + $0x90] sm:$0xff]  }
  0x20   :  { %8297 = vmatprep.mubr.msk.bf16.mxu0 %vm648_vm1, %v8609_v17  ;;  %v8631_v45 = vld [vmem:[%s12480_s2 + $0x70] sm:$0xff]   ;;  %v8632_v46 = vld [vmem:[%s12480_s2 + $0x78] sm:$0xff]   ;;  %v8641_v48 = vld [vmem:[%s12481_s3 + $0xa0] sm:$0xff]   ;;  %4867 = vmatprep.subr.bf16.mxu1 %v12493_v9 }
  0x21   :  { %v8638_v47 = vld [vmem:[%s12481_s3 + $0x98] sm:$0xff]   ;;  %v8635_v49 = vld [vmem:[%s12480_s2 + $0x80] sm:$0xff]   ;;  %v8636_v50 = vld [vmem:[%s12480_s2 + $0x88] sm:$0xff]  }
  0x22   :  { %v8642_v51 = vld [vmem:[%s12481_s3 + $0xa8] sm:$0xff]   ;;  %v8645_v52 = vld [vmem:[%s12481_s3 + $0xb0] sm:$0xff]   ;;  %v8640_v54 = vld [vmem:[%s12480_s2 + $0x98] sm:$0xff]  }
  0x23   :  { %v8639_v53 = vld [vmem:[%s12480_s2 + $0x90] sm:$0xff]   ;;  %v8646_v55 = vld [vmem:[%s12481_s3 + $0xb8] sm:$0xff]   ;;  %v8649_v56 = vld [vmem:[%s12481_s3 + $0xc0] sm:$0xff]  }
  0x24   :  { %v8643_v57 = vld [vmem:[%s12480_s2 + $0xa0] sm:$0xff]   ;;  %v8644_v58 = vld [vmem:[%s12480_s2 + $0xa8] sm:$0xff]   ;;  %v8653_v60 = vld [vmem:[%s12481_s3 + $0xd0] sm:$0xff]  }
  0x25   :  { %v8650_v59 = vld [vmem:[%s12481_s3 + $0xc8] sm:$0xff]   ;;  %v8647_v61 = vld [vmem:[%s12480_s2 + $0xb0] sm:$0xff]   ;;  %v8648_v62 = vld [vmem:[%s12480_s2 + $0xb8] sm:$0xff]  }
  0x26   :  { %8414 = vmatmul.mubr.msk.bf16.gmra.mxu1 %vm648_vm1, %v8598_v14  ;;  %8298 = vmatmul.mubr.msk.bf16.gmra.mxu0 %vm648_vm1, %v8610_v19  ;;  %v8654_v63 = vld [vmem:[%s12481_s3 + $0xd8] sm:$0xff]   ;;  %v8657_v0 = vld [vmem:[%s12481_s3 + $0xe0] sm:$0xff]   ;;  %v8652_v2 = vld [vmem:[%s12480_s2 + $0xc8] sm:$0xff]  }
  0x27   :  { %8423 = vmatprep.mubr.msk.bf16.mxu1 %vm1728_vm2, %v8603_v16  ;;  %8301 = vmatprep.mubr.msk.bf16.mxu0 %vm648_vm1, %v8613_v20  ;;  %v8651_v1 = vld [vmem:[%s12480_s2 + $0xc0] sm:$0xff]   ;;  %v8658_v3 = vld [vmem:[%s12481_s3 + $0xe8] sm:$0xff]   ;;  %v8661_v4 = vld [vmem:[%s12481_s3 + $0xf0] sm:$0xff]  }
  0x28   :  { %v8655_v5 = vld [vmem:[%s12480_s2 + $0xd0] sm:$0xff]   ;;  %v8662_v6 = vld [vmem:[%s12481_s3 + $0xf8] sm:$0xff]   ;;  %v8665_v8 = vld [vmem:[%s12481_s3 + $0x100] sm:$0xff]  }
  0x29   :  { %v8656_v7 = vld [vmem:[%s12480_s2 + $0xd8] sm:$0xff]   ;;  %v8659_v10 = vld [vmem:[%s12480_s2 + $0xe0] sm:$0xff]   ;;  %v8667_v11 = vld [vmem:[%s12481_s3 + $0x108] sm:$0xff]  }
  0x2a   :  { %v8660_v12 = vld [vmem:[%s12480_s2 + $0xe8] sm:$0xff]   ;;  %v8669_v13 = vld [vmem:[%s12481_s3 + $0x110] sm:$0xff]   ;;  %v8671_v15 = vld [vmem:[%s12481_s3 + $0x118] sm:$0xff]  }
  0x2b   :  { %v8663_v14 = vld [vmem:[%s12480_s2 + $0xf0] sm:$0xff]   ;;  %v8664_v16 = vld [vmem:[%s12480_s2 + $0xf8] sm:$0xff]   ;;  %v8673_v17 = vld [vmem:[%s12481_s3 + $0x120] sm:$0xff]  }
  0x2c   :  { %v8675_v19 = vld [vmem:[%s12481_s3 + $0x128] sm:$0xff]  }
  0x2d   :  { %v8668_v20 = vld [vmem:[%s12480_s2 + $0x108] sm:$0xff]  }
  0x2e   :  { %8424 = vmatmul.mubr.msk.bf16.vlgmr.msra.gmra.mxu1 %vm1728_vm2, %v8604_v18  ;;  %8302 = vmatmul.mubr.msk.bf16.gmra.mxu0 %vm648_vm1, %v8614_v23  ;;  %v8666_v18 = vld [vmem:[%s12480_s2 + $0x100] sm:$0xff]   ;;  %v8679_v23 = vld [vmem:[%s12481_s3 + $0x138] sm:$0xff]  }
  0x2f   :  { %8427 = vmatprep.mubr.msk.bf16.mxu1 %vm1728_vm2, %v8607_v21  ;;  %8305 = vmatprep.mubr.msk.bf16.mxu0 %vm648_vm1, %v8617_v24  ;;  %v8677_v21 = vld [vmem:[%s12481_s3 + $0x130] sm:$0xff]   ;;  %v8672_v24 = vld [vmem:[%s12480_s2 + $0x118] sm:$0xff]  }
  0x36   :  { %8428 = vmatmul.mubr.msk.bf16.gmra.mxu1 %vm1728_vm2, %v8608_v22  ;;  %8306 = vmatmul.mubr.msk.bf16.gmra.mxu0 %vm648_vm1, %v8618_v27  ;;  %v8670_v22 = vld [vmem:[%s12480_s2 + $0x110] sm:$0xff]   ;;  %v8683_v27 = vld [vmem:[%s12481_s3 + $0x148] sm:$0xff]  }
  0x37   :  { %8431 = vmatprep.mubr.msk.bf16.mxu1 %vm1728_vm2, %v8611_v25  ;;  %8309 = vmatprep.mubr.msk.bf16.mxu0 %vm648_vm1, %v8621_v28  ;;  %v8681_v25 = vld [vmem:[%s12481_s3 + $0x140] sm:$0xff]   ;;  %v8676_v28 = vld [vmem:[%s12480_s2 + $0x128] sm:$0xff]  }
  0x3e   :  { %8432 = vmatmul.mubr.msk.bf16.gmra.mxu1 %vm1728_vm2, %v8612_v26  ;;  %8310 = vmatmul.mubr.msk.bf16.gmra.mxu0 %vm648_vm1, %v8622_v31  ;;  %v8674_v26 = vld [vmem:[%s12480_s2 + $0x120] sm:$0xff]   ;;  %v8687_v31 = vld [vmem:[%s12481_s3 + $0x158] sm:$0xff]  }
  0x3f   :  { %8435 = vmatprep.mubr.msk.bf16.mxu1 %vm1728_vm2, %v8615_v29  ;;  %8313 = vmatprep.mubr.msk.bf16.mxu0 %vm648_vm1, %v8625_v32  ;;  %v8685_v29 = vld [vmem:[%s12481_s3 + $0x150] sm:$0xff]   ;;  %v8680_v32 = vld [vmem:[%s12480_s2 + $0x138] sm:$0xff]  }
  0x46   :  { %8436 = vmatmul.mubr.msk.bf16.gmra.mxu1 %vm1728_vm2, %v8616_v30  ;;  %8314 = vmatmul.mubr.msk.bf16.gmra.mxu0 %vm648_vm1, %v8626_v35  ;;  %v8678_v30 = vld [vmem:[%s12480_s2 + $0x130] sm:$0xff]   ;;  %v8691_v35 = vld [vmem:[%s12481_s3 + $0x168] sm:$0xff]  }
  0x47   :  { %8439 = vmatprep.mubr.msk.bf16.mxu1 %vm1728_vm2, %v8619_v33  ;;  %8317 = vmatprep.mubr.msk.bf16.mxu0 %vm648_vm1, %v8629_v36  ;;  %v8689_v33 = vld [vmem:[%s12481_s3 + $0x160] sm:$0xff]   ;;  %v8684_v36 = vld [vmem:[%s12480_s2 + $0x148] sm:$0xff]  }
  0x4e   :  { %8440 = vmatmul.mubr.msk.bf16.gmra.mxu1 %vm1728_vm2, %v8620_v34  ;;  %8318 = vmatmul.mubr.msk.bf16.gmra.mxu0 %vm648_vm1, %v8630_v39  ;;  %v8682_v34 = vld [vmem:[%s12480_s2 + $0x140] sm:$0xff]  }
  0x4f   :  { %8443 = vmatprep.mubr.msk.bf16.mxu1 %vm1728_vm2, %v8623_v37  ;;  %8321 = vmatprep.mubr.msk.bf16.mxu0 %vm648_vm1, %v8633_v40  ;;  %v8693_v37 = vld [vmem:[%s12481_s3 + $0x170] sm:$0xff]   ;;  %v9376_v39 = vld [vmem:[%s12482_s4] sm:$0xff] }
  0x50   :  { %v9381_v40 = vld [vmem:[%s12482_s4 + $0x20] sm:$0xff] }
  0x56   :  { %8444 = vmatmul.mubr.msk.bf16.gmra.mxu1 %vm1728_vm2, %v8624_v38  ;;  %8322 = vmatmul.mubr.msk.bf16.gmra.mxu0 %vm648_vm1, %v8634_v43  ;;  %v8686_v38 = vld [vmem:[%s12480_s2 + $0x150] sm:$0xff]   ;;  %v8688_v43 = vld [vmem:[%s12480_s2 + $0x158] sm:$0xff]  }
  0x57   :  { %8447 = vmatprep.mubr.msk.bf16.mxu1 %vm1728_vm2, %v8627_v41  ;;  %8325 = vmatprep.mubr.msk.bf16.mxu0 %vm648_vm1, %v8637_v44  ;;  %v8697_v44 = vld [vmem:[%s12481_s3 + $0x180] sm:$0xff]  }
  0x5e   :  { %8448 = vmatmul.mubr.msk.bf16.gmra.mxu1 %vm1728_vm2, %v8628_v42  ;;  %8326 = vmatmul.mubr.msk.bf16.gmra.mxu0 %vm648_vm1, %v8638_v47  ;;  %v8695_v42 = vld [vmem:[%s12481_s3 + $0x178] sm:$0xff]  }
  0x5f   :  { %8451 = vmatprep.mubr.msk.bf16.mxu1 %vm1728_vm2, %v8631_v45  ;;  %8329 = vmatprep.mubr.msk.bf16.mxu0 %vm648_vm1, %v8641_v48  ;;  %v8690_v45 = vld [vmem:[%s12480_s2 + $0x160] sm:$0xff]   ;;  %v8699_v48 = vld [vmem:[%s12481_s3 + $0x188] sm:$0xff]  }
  0x66   :  { %8452 = vmatmul.mubr.msk.bf16.gmra.mxu1 %vm1728_vm2, %v8632_v46  ;;  %8330 = vmatmul.mubr.msk.bf16.gmra.mxu0 %vm648_vm1, %v8642_v51  ;;  %v8701_v51 = vld [vmem:[%s12481_s3 + $0x190] sm:$0xff]  }
  0x67   :  { %8455 = vmatprep.mubr.msk.bf16.mxu1 %vm1728_vm2, %v8635_v49  ;;  %8333 = vmatprep.mubr.msk.bf16.mxu0 %vm648_vm1, %v8645_v52  ;;  %v8694_v52 = vld [vmem:[%s12480_s2 + $0x170] sm:$0xff]  }
  0x6e   :  { %8456 = vmatmul.mubr.msk.bf16.gmra.mxu1 %vm1728_vm2, %v8636_v50  ;;  %8334 = vmatmul.mubr.msk.bf16.gmra.mxu0 %vm648_vm1, %v8646_v55  ;;  %v8692_v50 = vld [vmem:[%s12480_s2 + $0x168] sm:$0xff]  }
  0x6f   :  { %8459 = vmatprep.mubr.msk.bf16.mxu1 %vm1728_vm2, %v8639_v53  ;;  %8337 = vmatprep.mubr.msk.bf16.mxu0 %vm648_vm1, %v8649_v56  ;;  %v2944_v56 = vld [vmem:[%s12483_s5 + $0xf0] sm:$0xff] }
  0x70   :  { %3130 = vperm.xlu0 %8590, %v2944_v56  }
  0x76   :  { %8460 = vmatmul.mubr.msk.bf16.gmra.mxu1 %vm1728_vm2, %v8640_v54  ;;  %8338 = vmatmul.mubr.msk.bf16.gmra.mxu0 %vm648_vm1, %v8650_v59 }
  0x77   :  { %8463 = vmatprep.mubr.msk.bf16.mxu1 %vm1728_vm2, %v8643_v57  ;;  %8341 = vmatprep.mubr.msk.bf16.mxu0 %vm648_vm1, %v8653_v60  ;;  %v2928_v57 = vld [vmem:[%s12483_s5 + $0x70] sm:$0xff]  ;;  %v8696_v60 = vld [vmem:[%s12480_s2 + $0x178] sm:$0xff]  }
  0x78   :  { %3050 = vperm.xlu1 %8591, %v2928_v57   ;;  %v8708_v57 = vld [vmem:[%s12480_s2 + $0x1a8] sm:$0xff]  }
  0x7e   :  { %8464 = vmatmul.mubr.msk.bf16.gmra.mxu1 %vm1728_vm2, %v8644_v58  ;;  %8342 = vmatmul.mubr.msk.bf16.gmra.mxu0 %vm648_vm1, %v8654_v63 }
  0x7f   :  { %8467 = vmatprep.mubr.msk.bf16.mxu1 %vm1728_vm2, %v8647_v61  ;;  %8345 = vmatprep.mubr.msk.bf16.mxu0 %vm648_vm1, %v8657_v0  ;;  %v8705_v0 = vld [vmem:[%s12481_s3 + $0x1a0] sm:$0xff]  }
  0x86   :  { %8468 = vmatmul.mubr.msk.bf16.gmra.mxu1 %vm1728_vm2, %v8648_v62  ;;  %8346 = vmatmul.mubr.msk.bf16.gmra.mxu0 %vm648_vm1, %v8658_v3  ;;  %v8703_v62 = vld [vmem:[%s12481_s3 + $0x198] sm:$0xff]   ;;  %v8698_v3 = vld [vmem:[%s12480_s2 + $0x180] sm:$0xff]  }
  0x87   :  { %8471 = vmatprep.mubr.msk.bf16.mxu1 %vm1728_vm2, %v8651_v1  ;;  %8349 = vmatprep.mubr.msk.bf16.mxu0 %vm648_vm1, %v8661_v4  ;;  %v2945_v1 = vld [vmem:[%s12483_s5 + $0xf8] sm:$0xff] }
  0x88   :  { %3135 = vperm.xlu0 %8590, %v2945_v1   ;;  %v8710_v1 = vld [vmem:[%s12480_s2 + $0x1b0] sm:$0xff]  }
  0x8e   :  { %8472 = vmatmul.mubr.msk.bf16.gmra.mxu1 %vm1728_vm2, %v8652_v2  ;;  %8350 = vmatmul.mubr.msk.bf16.gmra.mxu0 %vm648_vm1, %v8662_v6  ;;  %v2929_v2 = vld [vmem:[%s12483_s5 + $0x78] sm:$0xff] }
  0x8f   :  { %8475 = vmatprep.mubr.msk.bf16.mxu1 %vm1728_vm2, %v8655_v5  ;;  %8353 = vmatprep.mubr.msk.bf16.mxu0 %vm648_vm1, %v8665_v8  ;;  %v2976_v8 = vld [vmem:[%s12483_s5 + $0x1f0] sm:$0xff] }
  0x90   :  { %3055 = vperm.xlu1 %8591, %v2929_v2   ;;  %3290 = vperm.xlu0 %8590, %v2976_v8  }
  0x96   :  { %8476 = vmatmul.mubr.msk.bf16.gmra.mxu1 %vm1728_vm2, %v8656_v7  ;;  %8354 = vmatmul.mubr.msk.bf16.gmra.mxu0 %vm648_vm1, %v8667_v11 }
  0x97   :  { %8479 = vmatprep.mubr.msk.bf16.mxu1 %vm1728_vm2, %v8659_v10  ;;  %8357 = vmatprep.mubr.msk.bf16.mxu0 %vm648_vm1, %v8669_v13  ;;  %v2977_v10 = vld [vmem:[%s12483_s5 + $0x1f8] sm:$0xff]  ;;  %v8700_v13 = vld [vmem:[%s12480_s2 + $0x188] sm:$0xff]  }
  0x98   :  { %3295 = vperm.xlu1 %8591, %v2977_v10  }
  0x9e   :  { %8480 = vmatmul.mubr.msk.bf16.gmra.mxu1 %vm1728_vm2, %v8660_v12  ;;  %8358 = vmatmul.mubr.msk.bf16.gmra.mxu0 %vm648_vm1, %v8671_v15  ;;  %v8707_v15 = vld [vmem:[%s12481_s3 + $0x1a8] sm:$0xff]  }
  0x9f   :  { %8483 = vmatprep.mubr.msk.bf16.mxu1 %vm1728_vm2, %v8663_v14  ;;  %8361 = vmatprep.mubr.msk.bf16.mxu0 %vm648_vm1, %v8673_v17  ;;  %v8709_v17 = vld [vmem:[%s12481_s3 + $0x1b0] sm:$0xff]  }
  0xa6   :  { %8484 = vmatmul.mubr.msk.bf16.gmra.mxu1 %vm1728_vm2, %v8664_v16  ;;  %8362 = vmatmul.mubr.msk.bf16.gmra.mxu0 %vm648_vm1, %v8675_v19  ;;  %v2961_v19 = vld [vmem:[%s12483_s5 + $0x178] sm:$0xff] }
  0xa7   :  { %8487 = vmatprep.mubr.msk.bf16.mxu1 %vm1728_vm2, %v8666_v18  ;;  %8365 = vmatprep.mubr.msk.bf16.mxu0 %vm648_vm1, %v8677_v21  ;;  %v2960_v18 = vld [vmem:[%s12483_s5 + $0x170] sm:$0xff] }
  0xa8   :  { %3210 = vperm.xlu0 %8590, %v2960_v18   ;;  %3215 = vperm.xlu1 %8591, %v2961_v19  }
  0xae   :  { %8488 = vmatmul.mubr.msk.bf16.gmra.mxu1 %vm1728_vm2, %v8668_v20  ;;  %8366 = vmatmul.mubr.msk.bf16.gmra.mxu0 %vm648_vm1, %v8679_v23  ;;  %v8702_v20 = vld [vmem:[%s12480_s2 + $0x190] sm:$0xff]  }
  0xaf   :  { %8491 = vmatprep.mubr.msk.bf16.mxu1 %vm1728_vm2, %v8670_v22  ;;  %8369 = vmatprep.mubr.msk.bf16.mxu0 %vm648_vm1, %v8681_v25  ;;  %v2942_v25 = vld [vmem:[%s12483_s5 + $0xe0] sm:$0xff] }
  0xb0   :  { %3120 = vperm.xlu0 %8590, %v2942_v25   ;;  %v8712_v25 = vld [vmem:[%s12480_s2 + $0x1b8] sm:$0xff]  }
  0xb6   :  { %8492 = vmatmul.mubr.msk.bf16.gmra.mxu1 %vm1728_vm2, %v8672_v24  ;;  %8370 = vmatmul.mubr.msk.bf16.gmra.mxu0 %vm648_vm1, %v8683_v27 }
  0xb7   :  { %8495 = vmatprep.mubr.msk.bf16.mxu1 %vm1728_vm2, %v8674_v26  ;;  %8373 = vmatprep.mubr.msk.bf16.mxu0 %vm648_vm1, %v8685_v29  ;;  %v2943_v26 = vld [vmem:[%s12483_s5 + $0xe8] sm:$0xff]  ;;  %v8704_v29 = vld [vmem:[%s12480_s2 + $0x198] sm:$0xff]  }
  0xb8   :  { %3125 = vperm.xlu1 %8591, %v2943_v26   ;;  %v2925_v26 = vld [vmem:[%s12483_s5 + $0x58] sm:$0xff] }
  0xbe   :  { %8496 = vmatmul.mubr.msk.bf16.gmra.mxu1 %vm1728_vm2, %v8676_v28  ;;  %8374 = vmatmul.mubr.msk.bf16.gmra.mxu0 %vm648_vm1, %v8687_v31  ;;  %v8711_v31 = vld [vmem:[%s12481_s3 + $0x1b8] sm:$0xff]  }
  0xbf   :  { %8499 = vmatprep.mubr.msk.bf16.mxu1 %vm1728_vm2, %v8678_v30  ;;  %8377 = vmatprep.mubr.msk.bf16.mxu0 %vm648_vm1, %v8689_v33  ;;  %v8721_v33 = vld [vmem:[%s12481_s3 + $0x1c0] sm:$0xff]  }
  0xc6   :  { %8500 = vmatmul.mubr.msk.bf16.gmra.mxu1 %vm1728_vm2, %v8680_v32  ;;  %8378 = vmatmul.mubr.msk.bf16.gmra.mxu0 %vm648_vm1, %v8691_v35  ;;  %v2926_v35 = vld [vmem:[%s12483_s5 + $0x60] sm:$0xff] }
  0xc7   :  { %8503 = vmatprep.mubr.msk.bf16.mxu1 %vm1728_vm2, %v8682_v34  ;;  %8381 = vmatprep.mubr.msk.bf16.mxu0 %vm648_vm1, %v8693_v37  ;;  %v2927_v34 = vld [vmem:[%s12483_s5 + $0x68] sm:$0xff] }
  0xc8   :  { %3040 = vperm.xlu0 %8590, %v2926_v35   ;;  %3045 = vperm.xlu1 %8591, %v2927_v34  }
  0xce   :  { %8504 = vmatmul.mubr.msk.bf16.gmra.mxu1 %vm1728_vm2, %v8684_v36  ;;  %8382 = vmatmul.mubr.msk.bf16.gmra.mxu0 %vm648_vm1, %v8695_v42  ;;  %v8706_v36 = vld [vmem:[%s12480_s2 + $0x1a0] sm:$0xff]  }
  0xcf   :  { %8507 = vmatprep.mubr.msk.bf16.mxu1 %vm1728_vm2, %v8686_v38  ;;  %8385 = vmatprep.mubr.msk.bf16.mxu0 %vm648_vm1, %v8697_v44  ;;  %v2975_v44 = vld [vmem:[%s12483_s5 + $0x1e8] sm:$0xff] }
  0xd0   :  { %3285 = vperm.xlu1 %8591, %v2975_v44   ;;  %v2973_v44 = vld [vmem:[%s12483_s5 + $0x1d8] sm:$0xff] }
  0xd6   :  { %v9402_v46 = vpop.f32.mrf.mxu1  ;;  %8508 = vmatmul.mubr.msk.bf16.gmra.mxu1 %vm1728_vm2, %v8688_v43  ;;  %v9425_v54 = vpop.f32.mrf.mxu0  ;;  %8386 = vmatmul.mubr.msk.bf16.gmra.mxu0 %vm648_vm1, %v8699_v48 }
  0xd7   :  { %12495 = vst [vmem:[#allocation9_spill] sm:$0xff] %v9402_v46  ;;  %8511 = vmatprep.mubr.msk.bf16.mxu1 %vm1728_vm2, %v8690_v45  ;;  %8389 = vmatprep.mubr.msk.bf16.mxu0 %vm648_vm1, %v8701_v51  ;;  %v2974_v45 = vld [vmem:[%s12483_s5 + $0x1e0] sm:$0xff] }
  0xd8   :  { %v9407_v47 = vpop.f32.mrf.mxu1  ;;  %v9439_v58 = vpop.f32.mrf.mxu0  ;;  %3280 = vperm.xlu0 %8590, %v2974_v45   ;;  %v2972_v45 = vld [vmem:[%s12483_s5 + $0x1d0] sm:$0xff] }
  0xd9   :  { %12496 = vst [vmem:[#allocation10_spill] sm:$0xff] %v9407_v47 }
  0xda   :  { %v9412_v49 = vpop.f32.mrf.mxu1  ;;  %v9446_v61 = vpop.f32.mrf.mxu0 }
  0xdb   :  { %12497 = vst [vmem:[#allocation11_spill] sm:$0xff] %v9412_v49 }
  0xdc   :  { %v9423_v53 = vpop.f32.mrf.mxu1  ;;  %v9465_v4 = vpop.f32.mrf.mxu0 }
  0xdd   :  { %12498 = vst [vmem:[#allocation12_spill] sm:$0xff] %v9423_v53 }
  0xde   :  { %v9428_v55 = vpop.f32.mrf.mxu1  ;;  %8512 = vmatmul.mubr.msk.bf16.gmra.mxu1 %vm1728_vm2, %v8692_v50  ;;  %v9469_v6 = vpop.f32.mrf.mxu0  ;;  %8390 = vmatmul.mubr.msk.bf16.gmra.mxu0 %vm648_vm1, %v8703_v62  ;;  %v2959_v62 = vld [vmem:[%s12483_s5 + $0x168] sm:$0xff] }
  0xdf   :  { %12499 = vst [vmem:[#allocation13_spill] sm:$0xff] %v9428_v55  ;;  %8515 = vmatprep.mubr.msk.bf16.mxu1 %vm1728_vm2, %v8694_v52  ;;  %8393 = vmatprep.mubr.msk.bf16.mxu0 %vm648_vm1, %v8705_v0  ;;  %v8722_v52 = vld [vmem:[%s12481_s3 + $0x1c8] sm:$0xff]   ;;  %v2958_v0 = vld [vmem:[%s12483_s5 + $0x160] sm:$0xff] }
  0xe0   :  { %v9441_v59 = vpop.f32.mrf.mxu1  ;;  %v9483_v11 = vpop.f32.mrf.mxu0  ;;  %3200 = vperm.xlu0 %8590, %v2958_v0   ;;  %3205 = vperm.xlu1 %8591, %v2959_v62  }
  0xe1   :  { %12500 = vst [vmem:[#allocation14_spill] sm:$0xff] %v9441_v59 }
  0xe2   :  { %v9451_v63 = vpop.f32.mrf.mxu1  ;;  %v9490_v14 = vpop.f32.mrf.mxu0 }
  0xe4   :  { %v9467_v5 = vpop.f32.mrf.mxu1  ;;  %v9509_v21 = vpop.f32.mrf.mxu0 }
  0xe5   :  { %12501 = vst [vmem:[#allocation15_spill] sm:$0xff] %v9467_v5 }
  0xe6   :  { %v9472_v7 = vpop.f32.mrf.mxu1  ;;  %8516 = vmatmul.mubr.msk.bf16.gmra.mxu1 %vm1728_vm2, %v8696_v60  ;;  %v9513_v23 = vpop.f32.mrf.mxu0  ;;  %8394 = vmatmul.mubr.msk.bf16.gmra.mxu0 %vm648_vm1, %v8707_v15  ;;  %v7516_v60 = vcombine.high %v9376_v39, %v9381_v40  ;;  %v2940_v15 = vld [vmem:[%s12483_s5 + $0xd0] sm:$0xff] }
  0xe7   :  { %8519 = vmatprep.mubr.msk.bf16.mxu1 %vm1728_vm2, %v8698_v3  ;;  %8397 = vmatprep.mubr.msk.bf16.mxu0 %vm648_vm1, %v8709_v17 }
  0xe8   :  { %v9485_v12 = vpop.f32.mrf.mxu1  ;;  %v9527_v27 = vpop.f32.mrf.mxu0  ;;  %3110 = vperm.xlu0 %8590, %v2940_v15   ;;  %v2956_v15 = vld [vmem:[%s12483_s5 + $0x150] sm:$0xff] }
  0xea   :  { %v9495_v16 = vpop.f32.mrf.mxu1  ;;  %v9534_v30 = vpop.f32.mrf.mxu0 }
  0xec   :  { %v9511_v22 = vpop.f32.mrf.mxu1  ;;  %v9553_v37 = vpop.f32.mrf.mxu0 }
  0xee   :  { %v9516_v24 = vpop.f32.mrf.mxu1  ;;  %8520 = vmatmul.mubr.msk.bf16.gmra.mxu1 %vm1728_vm2, %v8700_v13  ;;  %v8303_v42 = vpop.f32.mrf.mxu0  ;;  %8398 = vmatmul.mubr.msk.bf16.gmra.mxu0 %vm648_vm1, %v8711_v31  ;;  %v2941_v13 = vld [vmem:[%s12483_s5 + $0xd8] sm:$0xff]  ;;  %v8713_v31 = vld [vmem:[%s12480_s2 + $0x1c0] sm:$0xff]  }
  0xef   :  { %8523 = vmatprep.mubr.msk.bf16.mxu1 %vm1728_vm2, %v8702_v20  ;;  %8401 = vmatprep.mubr.msk.bf16.mxu0 %vm648_vm1, %v8721_v33 }
  0xf0   :  { %v9529_v28 = vpop.f32.mrf.mxu1  ;;  %v927_v48 = vpop.f32.mrf.mxu0  ;;  %3115 = vperm.xlu1 %8591, %v2941_v13   ;;  %v2957_v13 = vld [vmem:[%s12483_s5 + $0x158] sm:$0xff] }
  0xf2   :  { %v9539_v32 = vpop.f32.mrf.mxu1  ;;  %v8304_v51 = vpop.f32.mrf.mxu0 }
  0xf4   :  { %v9555_v38 = vpop.f32.mrf.mxu1  ;;  %v930_v2 = vpop.f32.mrf.mxu0  ;;  %3035 = vperm.xlu1 %8591, %v2925_v26  }
  0xf6   :  { %v9558_v43 = vpop.f32.mrf.mxu1  ;;  %8524 = vmatmul.mubr.msk.bf16.gmra.mxu1 %vm1728_vm2, %v8704_v29  ;;  %v9592_v8 = vpop.f32.mrf.mxu0  ;;  %8402 = vmatmul.mubr.msk.bf16.gmra.mxu0 %vm648_vm1, %v8722_v52  ;;  %v2924_v29 = vld [vmem:[%s12483_s5 + $0x50] sm:$0xff] }
  0xf7   :  { %8527 = vmatprep.mubr.msk.bf16.mxu1 %vm1728_vm2, %v8706_v36  ;;  %4610 = vmatprep.mubr.bf16.mxu0 %v7516_v60 }
  0xf8   :  { %v9569_v50 = vpop.f32.mrf.mxu1  ;;  %v9603_v17 = vpop.f32.mrf.mxu0  ;;  %3030 = vperm.xlu0 %8590, %v2924_v29   ;;  %3275 = vperm.xlu1 %8591, %v2973_v44  }
  0xfa   :  { %v9574_v56 = vpop.f32.mrf.mxu1  ;;  %v9607_v19 = vpop.f32.mrf.mxu0 }
  0xfc   :  { %v9590_v3 = vpop.f32.mrf.mxu1  ;;  %v9621_v33 = vpop.f32.mrf.mxu0  ;;  %3270 = vperm.xlu0 %8590, %v2972_v45   ;;  %3195 = vperm.xlu1 %8591, %v2957_v13   ;;  %v2939_v13 = vld [vmem:[%s12483_s5 + $0xc8] sm:$0xff] }
  0xfe   :  { %v8433_v10 = vpop.f32.mrf.mxu1  ;;  %8528 = vmatmul.mubr.msk.bf16.gmra.mxu1 %vm1728_vm2, %v8708_v57  ;;  %v9623_v35 = vpop.f32.mrf.mxu0 }
  0xff   :  { %8531 = vmatprep.mubr.msk.bf16.mxu1 %vm1728_vm2, %v8710_v1  ;;  %v8714_v1 = vld [vmem:[%s12480_s2 + $0x1c8] sm:$0xff]  }
 0x100   :  { %v9605_v18 = vpop.f32.mrf.mxu1  ;;  %v9633_v52 = vpop.f32.mrf.mxu0  ;;  %3190 = vperm.xlu0 %8590, %v2956_v15   ;;  %3105 = vperm.xlu1 %8591, %v2939_v13  }
 0x102   :  { %v8434_v20 = vpop.f32.mrf.mxu1  ;;  %v9635_v62 = vpop.f32.mrf.mxu0 }
 0x104   :  { %v1990_v34 = vpop.f32.mrf.mxu1  ;;  %v9649_v26 = vpop.f32.mrf.mxu0 }
 0x106   :  { %v8437_v36 = vpop.f32.mrf.mxu1  ;;  %8532 = vmatmul.mubr.msk.bf16.gmra.mxu1 %vm1728_vm2, %v8712_v25  ;;  %v9656_v9 = vpop.f32.mrf.mxu0 }
 0x107   :  { %8535 = vmatprep.mubr.msk.bf16.mxu1 %vm1728_vm2, %v8713_v31  ;;  %v2012_v60 = vadd.f32 %v8437_v36, %v8303_v42  ;;  %v8715_v42 = vld [vmem:[%s12480_s2 + $0x1d0] sm:$0xff]   ;;  %v9654_v31 = vld [vmem:[%s12482_s4 + $0x8] sm:$0xff] }
 0x108   :  { %v2003_v57 = vpop.f32.mrf.mxu1 }
 0x109   :  { %v2480_v36 = vmax.f32 %v2012_v60, 0.0  ;;  %v2004_v44 = vadd.f32 %v2003_v57, %v927_v48  ;;  %v2938_v48 = vld [vmem:[%s12483_s5 + $0xc0] sm:$0xff]  ;;  %v1999_v57 = vadd.f32 %v8434_v20, %v9534_v30  ;;  %v2923_v30 = vld [vmem:[%s12483_s5 + $0x48] sm:$0xff]  ;;  %v1991_v20 = vadd.f32 %v1990_v34, %v9553_v37 }
 0x10a   :  { %v8438_v0 = vpop.f32.mrf.mxu1  ;;  %3100 = vperm.xlu0 %8590, %v2938_v48   ;;  %3025 = vperm.xlu1 %8591, %v2923_v30   ;;  %v1988_v48 = vadd.f32 %v9605_v18, %v9527_v27  ;;  %v2970_v37 = vld [vmem:[%s12483_s5 + $0x1c0] sm:$0xff]  ;;  %v1983_v27 = vadd.f32 %v9574_v56, %v9490_v14  ;;  %v8718_v14 = vld [vmem:[%s12480_s2 + $0x1e8] sm:$0xff]  }
 0x10b   :  { %v2015_v25 = vadd.f32 %v8438_v0, %v8304_v51  ;;  %v9661_v51 = vld [vmem:[%s12482_s4 + $0x28] sm:$0xff]  ;;  %v2478_v47 = vmax.f32 %v2004_v44, 0.0  ;;  %v2475_v34 = vmax.f32 %v1991_v20, 0.0 }
 0x10c   :  { %v2006_v29 = vpop.f32.mrf.mxu1  ;;  %v2474_v30 = vmax.f32 %v1988_v48, 0.0  ;;  %v2955_v56 = vld [vmem:[%s12483_s5 + $0x148] sm:$0xff] }
 0x10d   :  { %v2481_v45 = vmax.f32 %v2015_v25, 0.0  ;;  %v2007_v41 = vadd.f32 %v2006_v29, %v930_v2  ;;  %v9676_v25 = vpop.f32.mrf.mxu0  ;;  %v1996_v29 = vadd.f32 %v8433_v10, %v9513_v23  ;;  %v12502_v2 = vmov 0   ;;  %v2922_v23 = vld [vmem:[%s12483_s5 + $0x40] sm:$0xff] }
 0x10e   :  { %v9663_v0 = vpop.f32.mrf.mxu1  ;;  %8536 = vmatmul.mubr.msk.bf16.gmra.mxu1 %vm1728_vm2, %v8714_v1  ;;  %v2477_v10 = vmax.f32 %v1999_v57, 0.0  ;;  %3020 = vperm.xlu0 %8590, %v2922_v23   ;;  %v2598_v20 = vpack.c.bf16 %v2475_v34, %v2474_v30 }
 0x10f   :  { %v2601_v60 = vpack.c.bf16 %v2481_v45, %v2480_v36  ;;  %v2479_v15 = vmax.f32 %v2007_v41, 0.0  ;;  %8539 = vmatprep.mubr.msk.bf16.mxu1 %vm1728_vm2, %v8715_v42  ;;  %v9681_v53 = vpop.f32.mrf.mxu0  ;;  %v8716_v41 = vld [vmem:[%s12480_s2 + $0x1d8] sm:$0xff]   ;;  %v8717_v36 = vld [vmem:[%s12480_s2 + $0x1e0] sm:$0xff]   ;;  %v2476_v13 = vmax.f32 %v1996_v29, 0.0 }
 0x110   :  { %v9678_v1 = vpop.f32.mrf.mxu1 }
 0x111   :  { %4579 = vmatpush1.bf16.msra.mxu0 %v2601_v60  ;;  %v2600_v42 = vpack.c.bf16 %v2479_v15, %v2478_v47  ;;  %v9699_v44 = vpop.f32.mrf.mxu0  ;;  %v2971_v47 = vld [vmem:[%s12483_s5 + $0x1c8] sm:$0xff]  ;;  %v2599_v18 = vpack.c.bf16 %v2477_v10, %v2476_v13  ;;  %v1975_v10 = vadd.f32 %v9590_v3, %v9509_v21  ;;  %v2937_v21 = vld [vmem:[%s12483_s5 + $0xb8] sm:$0xff]  ;;  %v2936_v3 = vld [vmem:[%s12483_s5 + $0xb0] sm:$0xff] }
 0x112   :  { %v9683_v46 = vpop.f32.mrf.mxu1  ;;  %4580 = vmatprep.subr.bf16.mxu0 %v12502_v2  ;;  %3260 = vperm.xlu0 %8590, %v2970_v37   ;;  %v1972_v37 = vadd.f32 %v9569_v50, %v9483_v11  ;;  %v1967_v11 = vadd.f32 %v9539_v32, %v9446_v61  ;;  %v8720_v61 = vld [vmem:[%s12480_s2 + $0x1f8] sm:$0xff]  }
 0x113   :  { %v9705_v60 = vpop.f32.mrf.mxu0  ;;  %3265 = vperm.xlu1 %8591, %v2971_v47   ;;  %v2471_v34 = vmax.f32 %v1975_v10, 0.0  ;;  %v2921_v32 = vld [vmem:[%s12483_s5 + $0x38] sm:$0xff] }
 0x114   :  { %v9701_v45 = vpop.f32.mrf.mxu1 }
 0x115   :  { %4581 = vmatpush1.bf16.msra.mxu0 %v2600_v42  ;;  %v9720_v15 = vpop.f32.mrf.mxu0 }
 0x116   :  { %v9707_v57 = vpop.f32.mrf.mxu1  ;;  %8540 = vmatmul.mubr.msk.bf16.gmra.mxu1 %vm1728_vm2, %v8716_v41  ;;  %4582 = vmatprep.subr.bf16.mxu0 %v12502_v2  ;;  %v1980_v41 = vadd.f32 %v9558_v43, %v9469_v6  ;;  %v2954_v6 = vld [vmem:[%s12483_s5 + $0x140] sm:$0xff]  ;;  %v2473_v43 = vmax.f32 %v1983_v27, 0.0 }
 0x117   :  { %8543 = vmatprep.mubr.msk.bf16.mxu1 %vm1728_vm2, %v8717_v36  ;;  %v9726_v23 = vpop.f32.mrf.mxu0  ;;  %v8719_v36 = vld [vmem:[%s12480_s2 + $0x1f0] sm:$0xff]   ;;  %3180 = vperm.xlu0 %8590, %v2954_v6  }
 0x118   :  { %v9722_v29 = vpop.f32.mrf.mxu1  ;;  %3185 = vperm.xlu1 %8591, %v2955_v56   ;;  %v2472_v47 = vmax.f32 %v1980_v41, 0.0  ;;  %v2470_v56 = vmax.f32 %v1972_v37, 0.0 }
 0x119   :  { %4583 = vmatpush1.bf16.msra.mxu0 %v2599_v18  ;;  %v9745_v13 = vpop.f32.mrf.mxu0 }
 0x11a   :  { %v9728_v42 = vpop.f32.mrf.mxu1  ;;  %4584 = vmatprep.subr.bf16.mxu0 %v12502_v2  ;;  %v2597_v50 = vpack.c.bf16 %v2473_v43, %v2472_v47  ;;  %v2920_v43 = vld [vmem:[%s12483_s5 + $0x30] sm:$0xff]  ;;  %v2596_v10 = vpack.c.bf16 %v2471_v34, %v2470_v56  ;;  %v7518_v47 = vcombine.high %v9654_v31, %v9661_v51 }
 0x11b   :  { %v9751_v27 = vpop.f32.mrf.mxu0  ;;  %3090 = vperm.xlu0 %8590, %v2936_v3   ;;  %v1956_v3 = vadd.f32 %v9529_v28, %v9439_v58 }
 0x11c   :  { %v9747_v48 = vpop.f32.mrf.mxu1  ;;  %3095 = vperm.xlu1 %8591, %v2937_v21  }
 0x11d   :  { %4585 = vmatpush1.bf16.msra.mxu0 %v2598_v20  ;;  %v9766_v41 = vpop.f32.mrf.mxu0  ;;  %v2466_v28 = vmax.f32 %v1956_v3, 0.0 }
 0x11e   :  { %v9753_v18 = vpop.f32.mrf.mxu1  ;;  %8544 = vmatmul.mubr.msk.bf16.gmra.mxu1 %vm1728_vm2, %v8718_v14  ;;  %4586 = vmatprep.subr.bf16.mxu0 %v12502_v2  ;;  %v1964_v14 = vadd.f32 %v9516_v24, %v9425_v54  ;;  %v2469_v54 = vmax.f32 %v1967_v11, 0.0  ;;  %v1959_v24 = vadd.f32 %v9555_v38, %v9465_v4  ;;  %v2969_v4 = vld [vmem:[%s12483_s5 + $0x1b8] sm:$0xff]  ;;  %v2968_v38 = vld [vmem:[%s12483_s5 + $0x1b0] sm:$0xff] }
 0x11f   :  { %8547 = vmatprep.mubr.msk.bf16.mxu1 %vm1728_vm2, %v8719_v36  ;;  %v9772_v6 = vpop.f32.mrf.mxu0  ;;  %3010 = vperm.xlu0 %8590, %v2920_v43  }
 0x120   :  { %v9768_v30 = vpop.f32.mrf.mxu1  ;;  %3015 = vperm.xlu1 %8591, %v2921_v32   ;;  %v2468_v21 = vmax.f32 %v1964_v14, 0.0  ;;  %v2467_v14 = vmax.f32 %v1959_v24, 0.0  ;;  %v2952_v24 = vld [vmem:[%s12483_s5 + $0x130] sm:$0xff] }
 0x121   :  { %4587 = vmatpush1.bf16.msra.mxu0 %v2597_v50  ;;  %v9786_v36 = vpop.f32.mrf.mxu0 }
 0x122   :  { %v8450_v20 = vpop.f32.mrf.mxu1  ;;  %4588 = vmatprep.subr.bf16.mxu0 %v12502_v2  ;;  %v2595_v34 = vpack.c.bf16 %v2469_v54, %v2468_v21  ;;  %v2953_v54 = vld [vmem:[%s12483_s5 + $0x138] sm:$0xff] }
 0x123   :  { %v9792_v50 = vpop.f32.mrf.mxu0  ;;  %3250 = vperm.xlu0 %8590, %v2968_v38  }
 0x124   :  { %v2054_v37 = vpop.f32.mrf.mxu1  ;;  %3255 = vperm.xlu1 %8591, %v2969_v4  }
 0x125   :  { %4589 = vmatpush1.bf16.msra.mxu0 %v2596_v10  ;;  %v9802_v56 = vpop.f32.mrf.mxu0  ;;  %v2594_v10 = vpack.c.bf16 %v2467_v14, %v2466_v28  ;;  %v2934_v14 = vld [vmem:[%s12483_s5 + $0xa0] sm:$0xff] }
 0x126   :  { %v8453_v11 = vpop.f32.mrf.mxu1  ;;  %8548 = vmatmul.mubr.msk.bf16.gmra.mxu1 %vm1728_vm2, %v8720_v61  ;;  %4590 = vmatprep.subr.bf16.mxu0 %v12502_v2 }
 0x127   :  { %4899 = vmatprep.mubr.bf16.mxu1 %v7518_v47  ;;  %v2076_v61 = vadd.f32 %v8453_v11, %v9705_v60  ;;  %v9805_v32 = vpop.f32.mrf.mxu0  ;;  %3170 = vperm.xlu0 %8590, %v2952_v24  }
 0x128   :  { %v2067_v58 = vpop.f32.mrf.mxu1  ;;  %3175 = vperm.xlu1 %8591, %v2953_v54  }
 0x129   :  { %4591 = vmatpush1.bf16.msra.mxu0 %v2595_v34  ;;  %v9815_v21 = vpop.f32.mrf.mxu0  ;;  %v2496_v3 = vmax.f32 %v2076_v61, 0.0  ;;  %v2068_v11 = vadd.f32 %v2067_v58, %v9720_v15  ;;  %v2063_v15 = vadd.f32 %v8450_v20, %v9681_v53  ;;  %v2919_v53 = vld [vmem:[%s12483_s5 + $0x28] sm:$0xff]  ;;  %v2918_v20 = vld [vmem:[%s12483_s5 + $0x20] sm:$0xff] }
 0x12a   :  { %v8454_v43 = vpop.f32.mrf.mxu1  ;;  %4592 = vmatprep.subr.bf16.mxu0 %v12502_v2 }
 0x12b   :  { %v2079_v47 = vadd.f32 %v8454_v43, %v9726_v23  ;;  %v9819_v34 = vpop.f32.mrf.mxu0  ;;  %v2935_v23 = vld [vmem:[%s12483_s5 + $0xa8] sm:$0xff]  ;;  %3080 = vperm.xlu0 %8590, %v2934_v14   ;;  %v2060_v43 = vadd.f32 %v9753_v18, %v9656_v9  ;;  %v2494_v54 = vmax.f32 %v2068_v11, 0.0  ;;  %v2047_v14 = vadd.f32 %v9728_v42, %v9635_v62  ;;  %v2950_v42 = vld [vmem:[%s12483_s5 + $0x120] sm:$0xff] }
 0x12c   :  { %v2070_v60 = vpop.f32.mrf.mxu1  ;;  %3085 = vperm.xlu1 %8591, %v2935_v23   ;;  %v2951_v62 = vld [vmem:[%s12483_s5 + $0x128] sm:$0xff] }
 0x12d   :  { %v2497_v4 = vmax.f32 %v2079_v47, 0.0  ;;  %v2071_v38 = vadd.f32 %v2070_v60, %v9745_v13  ;;  %4593 = vmatpush1.bf16.msra.mxu0 %v2594_v10  ;;  %v9831_v13 = vpop.f32.mrf.mxu0  ;;  %v2493_v47 = vmax.f32 %v2063_v15, 0.0  ;;  %v2055_v60 = vadd.f32 %v2054_v37, %v9699_v44  ;;  %v2967_v44 = vld [vmem:[%s12483_s5 + $0x1a8] sm:$0xff]  ;;  %v2966_v37 = vld [vmem:[%s12483_s5 + $0x1a0] sm:$0xff] }
 0x12e   :  { %v9821_v49 = vpop.f32.mrf.mxu1  ;;  %4594 = vmatprep.subr.bf16.mxu0 %v12502_v2  ;;  %v2492_v11 = vmax.f32 %v2060_v43, 0.0 }
 0x12f   :  { %v2609_v58 = vpack.c.bf16 %v2497_v4, %v2496_v3  ;;  %v2495_v28 = vmax.f32 %v2071_v38, 0.0  ;;  %v9837_v24 = vpop.f32.mrf.mxu0  ;;  %3000 = vperm.xlu0 %8590, %v2918_v20   ;;  %v2052_v4 = vadd.f32 %v9768_v30, %v9676_v25  ;;  %v2491_v25 = vmax.f32 %v2055_v60, 0.0 }
 0x130   :  { %v9833_v61 = vpop.f32.mrf.mxu1  ;;  %3005 = vperm.xlu1 %8591, %v2919_v53   ;;  %v2607_v15 = vpack.c.bf16 %v2493_v47, %v2492_v11  ;;  %v2489_v20 = vmax.f32 %v2047_v14, 0.0  ;;  %v2036_v11 = vadd.f32 %v9722_v29, %v9633_v52 }
 0x131   :  { %4595 = vmatpush2.bf16.msra.mxu0 %v2609_v58  ;;  %v2608_v9 = vpack.c.bf16 %v2495_v28, %v2494_v54  ;;  %v9849_v18 = vpop.f32.mrf.mxu0  ;;  %v2044_v28 = vadd.f32 %v9707_v57, %v9623_v35  ;;  %v2490_v43 = vmax.f32 %v2052_v4, 0.0  ;;  %v2039_v35 = vadd.f32 %v9747_v48, %v9649_v26  ;;  %v2933_v26 = vld [vmem:[%s12483_s5 + $0x98] sm:$0xff]  ;;  %v2932_v48 = vld [vmem:[%s12483_s5 + $0x90] sm:$0xff] }
 0x132   :  { %v9839_v10 = vpop.f32.mrf.mxu1  ;;  %4596 = vmatprep.subr.bf16.mxu0 %v12502_v2 }
 0x133   :  { %v9855_v38 = vpop.f32.mrf.mxu0  ;;  %3240 = vperm.xlu0 %8590, %v2966_v37   ;;  %v2606_v57 = vpack.c.bf16 %v2491_v25, %v2490_v43  ;;  %v2031_v37 = vadd.f32 %v9683_v46, %v9607_v19  ;;  %v2487_v52 = vmax.f32 %v2039_v35, 0.0  ;;  %v2028_v25 = vadd.f32 %v9663_v0, %v9592_v8  ;;  %v2917_v46 = vld [vmem:[%s12483_s5 + $0x18] sm:$0xff]  ;;  %v2916_v19 = vld [vmem:[%s12483_s5 + $0x10] sm:$0xff] }
 0x134   :  { %v9851_v3 = vpop.f32.mrf.mxu1  ;;  %3245 = vperm.xlu1 %8591, %v2967_v44  }
 0x135   :  { %4597 = vmatpush2.bf16.msra.mxu0 %v2608_v9  ;;  %v9868_v30 = vpop.f32.mrf.mxu0  ;;  %v2488_v9 = vmax.f32 %v2044_v28, 0.0  ;;  %v2486_v28 = vmax.f32 %v2036_v11, 0.0 }
 0x136   :  { %v9857_v23 = vpop.f32.mrf.mxu1  ;;  %4598 = vmatprep.subr.bf16.mxu0 %v12502_v2 }
 0x137   :  { %v9874_v54 = vpop.f32.mrf.mxu0  ;;  %3160 = vperm.xlu0 %8590, %v2950_v42   ;;  %v2605_v14 = vpack.c.bf16 %v2489_v20, %v2488_v9  ;;  %v2485_v42 = vmax.f32 %v2031_v37, 0.0  ;;  %v2023_v20 = vadd.f32 %v9701_v45, %v9621_v33  ;;  %v2604_v8 = vpack.c.bf16 %v2487_v52, %v2486_v28  ;;  %v2965_v33 = vld [vmem:[%s12483_s5 + $0x198] sm:$0xff]  ;;  %v2964_v45 = vld [vmem:[%s12483_s5 + $0x190] sm:$0xff]  ;;  %v2666_v28 = vld [vmem:[%s12482_s4 + $0x40] sm:$0xff] }
 0x138   :  { %v9870_v58 = vpop.f32.mrf.mxu1  ;;  %3165 = vperm.xlu1 %8591, %v2951_v62   ;;  %v2020_v9 = vadd.f32 %v9678_v1, %v9603_v17 }
 0x139   :  { %4599 = vmatpush2.bf16.msra.mxu0 %v2607_v15  ;;  %v9887_v47 = vpop.f32.mrf.mxu0  ;;  %v2483_v37 = vmax.f32 %v2023_v20, 0.0 }
 0x13a   :  { %v9876_v53 = vpop.f32.mrf.mxu1  ;;  %4600 = vmatprep.subr.bf16.mxu0 %v12502_v2  ;;  %v2482_v1 = vmax.f32 %v2020_v9, 0.0 }
 0x13b   :  { %v9893_v4 = vpop.f32.mrf.mxu0  ;;  %3070 = vperm.xlu0 %8590, %v2932_v48  }
 0x13c   :  { %v9889_v60 = vpop.f32.mrf.mxu1  ;;  %3075 = vperm.xlu1 %8591, %v2933_v26   ;;  %v2602_v20 = vpack.c.bf16 %v2483_v37, %v2482_v1  ;;  %v2930_v37 = vld [vmem:[%s12483_s5 + $0x80] sm:$0xff] }
 0x13d   :  { %4601 = vmatpush2.bf16.msra.mxu0 %v2606_v57  ;;  %v9906_v29 = vpop.f32.mrf.mxu0  ;;  %v2484_v57 = vmax.f32 %v2028_v25, 0.0 }
 0x13e   :  { %v9895_v44 = vpop.f32.mrf.mxu1  ;;  %4602 = vmatprep.subr.bf16.mxu0 %v12502_v2 }
 0x13f   :  { %v9912_v43 = vpop.f32.mrf.mxu0  ;;  %2990 = vperm.xlu0 %8590, %v2916_v19   ;;  %v2603_v48 = vpack.c.bf16 %v2485_v42, %v2484_v57  ;;  %v2949_v42 = vld [vmem:[%s12483_s5 + $0x118] sm:$0xff] }
 0x140   :  { %v9908_v15 = vpop.f32.mrf.mxu1  ;;  %2995 = vperm.xlu1 %8591, %v2917_v46   ;;  %v2670_v46 = vld [vmem:[%s12482_s4 + $0x60] sm:$0xff] }
 0x141   :  { %4603 = vmatpush2.bf16.msra.mxu0 %v2605_v14  ;;  %v9923_v0 = vpop.f32.mrf.mxu0 }
 0x142   :  { %v8466_v62 = vpop.f32.mrf.mxu1  ;;  %4604 = vmatprep.subr.bf16.mxu0 %v12502_v2 }
 0x143   :  { %v9929_v11 = vpop.f32.mrf.mxu0  ;;  %3230 = vperm.xlu0 %8590, %v2964_v45  }
 0x144   :  { %v9925_v35 = vpop.f32.mrf.mxu1  ;;  %3235 = vperm.xlu1 %8591, %v2965_v33  }
 0x145   :  { %4605 = vmatpush2.bf16.msra.mxu0 %v2604_v8  ;;  %v9938_v14 = vpop.f32.mrf.mxu0 }
 0x146   :  { %v8469_v26 = vpop.f32.mrf.mxu1  ;;  %4606 = vmatprep.subr.bf16.mxu0 %v12502_v2 }
 0x147   :  { %v2140_v52 = vadd.f32 %v8469_v26, %v9855_v38  ;;  %v9941_v25 = vpop.f32.mrf.mxu0  ;;  %v2948_v38 = vld [vmem:[%s12483_s5 + $0x110] sm:$0xff]  ;;  %v7524_v26 = vcombine.high %v2666_v28, %v2670_v46 }
 0x148   :  { %v2131_v17 = vpop.f32.mrf.mxu1  ;;  %3150 = vperm.xlu0 %8590, %v2948_v38   ;;  %3155 = vperm.xlu1 %8591, %v2949_v42   ;;  %v2124_v42 = vadd.f32 %v9895_v44, %v9819_v34  ;;  %v2914_v34 = vld [vmem:[%s12483_s5] sm:$0xff] }
 0x149   :  { %4607 = vmatpush2.bf16.msra.mxu0 %v2603_v48  ;;  %v9957_v57 = vpop.f32.mrf.mxu0  ;;  %v2512_v33 = vmax.f32 %v2140_v52, 0.0  ;;  %v2132_v45 = vadd.f32 %v2131_v17, %v9868_v30  ;;  %v2127_v30 = vadd.f32 %v8466_v62, %v9837_v24  ;;  %v2119_v62 = vadd.f32 %v9925_v35, %v9849_v18 }
 0x14a   :  { %v8470_v19 = vpop.f32.mrf.mxu1  ;;  %4608 = vmatprep.subr.bf16.mxu0 %v12502_v2  ;;  %v2111_v18 = vadd.f32 %v9876_v53, %v9805_v32  ;;  %v2682_v32 = vld [vmem:[%s12482_s4 + $0xc0] sm:$0xff] }
 0x14b   :  { %v2143_v8 = vadd.f32 %v8470_v19, %v9874_v54  ;;  %v9961_v5 = vpop.f32.mrf.mxu0  ;;  %v2931_v54 = vld [vmem:[%s12483_s5 + $0x88] sm:$0xff]  ;;  %v12503_v19 = vcombine.low %v9376_v39, %v9381_v40  ;;  %v2510_v38 = vmax.f32 %v2132_v45, 0.0  ;;  %v2678_v39 = vld [vmem:[%s12482_s4 + $0xa0] sm:$0xff]  ;;  %v2509_v44 = vmax.f32 %v2127_v30, 0.0 }
 0x14c   :  { %v2134_v9 = vpop.f32.mrf.mxu1  ;;  %3060 = vperm.xlu0 %8590, %v2930_v37   ;;  %3065 = vperm.xlu1 %8591, %v2931_v54   ;;  %v2915_v40 = vld [vmem:[%s12483_s5 + $0x8] sm:$0xff]  ;;  %v2508_v45 = vmax.f32 %v2124_v42, 0.0  ;;  %v2686_v53 = vld [vmem:[%s12482_s4 + $0xe0] sm:$0xff]  ;;  %v2505_v42 = vmax.f32 %v2111_v18, 0.0 }
 0x14d   :  { %v2513_v48 = vmax.f32 %v2143_v8, 0.0  ;;  %v2135_v59 = vadd.f32 %v2134_v9, %v9887_v47  ;;  %4609 = vmatpush2.bf16.msra.mxu0 %v2602_v20  ;;  %v9973_v47 = vpop.f32.mrf.mxu0 }
 0x14e   :  { %v9963_v55 = vpop.f32.mrf.mxu1  ;;  %5156 = vmatprep.subr.bf16.mxu0 %v12502_v2  ;;  %v2615_v35 = vpack.c.bf16 %v2509_v44, %v2508_v45 }
 0x14f   :  { %v2617_v17 = vpack.c.bf16 %v2513_v48, %v2512_v33  ;;  %v2511_v1 = vmax.f32 %v2135_v59, 0.0  ;;  %v9982_v20 = vpop.f32.mrf.mxu0  ;;  %v2674_v59 = vld [vmem:[%s12482_s4 + $0x80] sm:$0xff]  ;;  %v7523_v33 = vcombine.low %v2666_v28, %v2670_v46  ;;  %v2116_v48 = vadd.f32 %v9908_v15, %v9831_v13 }
 0x150   :  { %v9975_v52 = vpop.f32.mrf.mxu1  ;;  %4611 = vmatmul.mubr.bf16.vlgmr.msra.gmra.mxu0 %v12503_v19  ;;  %2980 = vperm.xlu0 %8590, %v2914_v34   ;;  %v7532_v54 = vcombine.high %v2674_v59, %v2678_v39  ;;  %v2108_v13 = vadd.f32 %v9857_v23, %v9792_v50  ;;  %v2103_v50 = vadd.f32 %v9889_v60, %v9815_v21 }
 0x151   :  { %4868 = vmatpush1.bf16.msra.mxu1 %v2617_v17  ;;  %4618 = vmatprep.mubr.bf16.mxu0 %v7524_v26  ;;  %v2616_v8 = vpack.c.bf16 %v2511_v1, %v2510_v38  ;;  %v10001_v9 = vpop.f32.mrf.mxu0  ;;  %v2507_v17 = vmax.f32 %v2119_v62, 0.0  ;;  %v2506_v15 = vmax.f32 %v2116_v48, 0.0  ;;  %v7531_v34 = vcombine.low %v2674_v59, %v2678_v39 }
 0x152   :  { %v9987_v24 = vpop.f32.mrf.mxu1  ;;  %4869 = vmatprep.subr.bf16.mxu1 %v12502_v2  ;;  %2985 = vperm.xlu1 %8591, %v2915_v40   ;;  %v2504_v44 = vmax.f32 %v2108_v13, 0.0  ;;  %v2100_v62 = vadd.f32 %v9870_v58, %v9802_v56  ;;  %v2095_v21 = vadd.f32 %v9839_v10, %v9772_v6  ;;  %v2503_v48 = vmax.f32 %v2103_v50, 0.0  ;;  %v2690_v6 = vld [vmem:[%s12482_s4 + $0x100] sm:$0xff] }
 0x153   :  { %v10007_v37 = vpop.f32.mrf.mxu0  ;;  %v2614_v23 = vpack.c.bf16 %v2507_v17, %v2506_v15  ;;  %v2092_v56 = vadd.f32 %v9821_v49, %v9751_v27  ;;  %v2694_v10 = vld [vmem:[%s12482_s4 + $0x120] sm:$0xff]  ;;  %v2087_v49 = vadd.f32 %v9851_v3, %v9786_v36  ;;  %v7539_v15 = vcombine.low %v2682_v32, %v2686_v53 }
 0x154   :  { %v10003_v26 = vpop.f32.mrf.mxu1  ;;  %v2613_v60 = vpack.c.bf16 %v2505_v42, %v2504_v44  ;;  %v2502_v58 = vmax.f32 %v2100_v62, 0.0  ;;  %v2084_v50 = vadd.f32 %v9833_v61, %v9766_v41  ;;  %v2698_v41 = vld [vmem:[%s12482_s4 + $0x140] sm:$0xff] }
 0x155   :  { %4870 = vmatpush1.bf16.msra.mxu1 %v2616_v8  ;;  %v10014_v1 = vpop.f32.mrf.mxu0  ;;  %v7540_v8 = vcombine.high %v2682_v32, %v2686_v53  ;;  %v2500_v42 = vmax.f32 %v2092_v56, 0.0  ;;  %v2702_v61 = vld [vmem:[%s12482_s4 + $0x160] sm:$0xff] }
 0x156   :  { %v10009_v30 = vpop.f32.mrf.mxu1  ;;  %4871 = vmatprep.subr.bf16.mxu1 %v12502_v2  ;;  %v2612_v27 = vpack.c.bf16 %v2503_v48, %v2502_v58  ;;  %v2498_v3 = vmax.f32 %v2084_v50, 0.0 }
 0x157   :  { %v8352_v46 = vpop.f32.mrf.mxu0 }
 0x158   :  { %v10016_v28 = vpop.f32.mrf.mxu1  ;;  %4619 = vmatmul.mubr.bf16.gmra.mxu0 %v7523_v33 }
 0x159   :  { %4872 = vmatpush1.bf16.msra.mxu1 %v2615_v35  ;;  %4626 = vmatprep.mubr.bf16.mxu0 %v7532_v54  ;;  %v1122_v38 = vpop.f32.mrf.mxu0  ;;  %v2501_v35 = vmax.f32 %v2095_v21, 0.0 }
 0x15a   :  { %v10020_v19 = vpop.f32.mrf.mxu1  ;;  %4873 = vmatprep.subr.bf16.mxu1 %v12502_v2 }
 0x15b   :  { %v10035_v33 = vpop.f32.mrf.mxu0  ;;  %v2611_v62 = vpack.c.bf16 %v2501_v35, %v2500_v42  ;;  %v7547_v35 = vcombine.low %v2690_v6, %v2694_v10 }
 0x15c   :  { %v10031_v40 = vpop.f32.mrf.mxu1 }
 0x15d   :  { %4874 = vmatpush1.bf16.msra.mxu1 %v2614_v23  ;;  %v10042_v54 = vpop.f32.mrf.mxu0  ;;  %v7548_v23 = vcombine.high %v2690_v6, %v2694_v10 }
 0x15e   :  { %v10037_v45 = vpop.f32.mrf.mxu1  ;;  %4875 = vmatprep.subr.bf16.mxu1 %v12502_v2 }
 0x15f   :  { %v10048_v39 = vpop.f32.mrf.mxu0 }
 0x160   :  { %v10044_v59 = vpop.f32.mrf.mxu1  ;;  %4627 = vmatmul.mubr.bf16.gmra.mxu0 %v7531_v34 }
 0x161   :  { %4876 = vmatpush1.bf16.msra.mxu1 %v2613_v60  ;;  %4634 = vmatprep.mubr.bf16.mxu0 %v7540_v8  ;;  %v10059_v17 = vpop.f32.mrf.mxu0  ;;  %v2499_v8 = vmax.f32 %v2087_v49, 0.0  ;;  %v7556_v49 = vcombine.high %v2698_v41, %v2702_v61 }
 0x162   :  { %v8482_v18 = vpop.f32.mrf.mxu1  ;;  %4877 = vmatprep.subr.bf16.mxu1 %v12502_v2 }
 0x163   :  { %v10063_v34 = vpop.f32.mrf.mxu0  ;;  %v2610_v48 = vpack.c.bf16 %v2499_v8, %v2498_v3 }
 0x164   :  { %v2182_v13 = vpop.f32.mrf.mxu1 }
 0x165   :  { %4878 = vmatpush1.bf16.msra.mxu1 %v2612_v27  ;;  %v10066_v21 = vpop.f32.mrf.mxu0 }
 0x166   :  { %v8485_v44 = vpop.f32.mrf.mxu1  ;;  %4879 = vmatprep.subr.bf16.mxu1 %v12502_v2 }
 0x167   :  { %v2204_v32 = vadd.f32 %v8485_v44, %v10007_v37  ;;  %v10075_v53 = vpop.f32.mrf.mxu0 }
 0x168   :  { %v2195_v36 = vpop.f32.mrf.mxu1  ;;  %4635 = vmatmul.mubr.bf16.gmra.mxu0 %v7539_v15 }
 0x169   :  { %4880 = vmatpush1.bf16.msra.mxu1 %v2611_v62  ;;  %4642 = vmatprep.mubr.bf16.mxu0 %v7548_v23  ;;  %v10078_v58 = vpop.f32.mrf.mxu0  ;;  %v2528_v27 = vmax.f32 %v2204_v32, 0.0  ;;  %v2196_v15 = vadd.f32 %v2195_v36, %v10014_v1  ;;  %v2191_v62 = vadd.f32 %v8482_v18, %v9982_v20  ;;  %v2188_v1 = vadd.f32 %v10037_v45, %v9961_v5  ;;  %v2706_v20 = vld [vmem:[%s12482_s4 + $0x180] sm:$0xff] }
 0x16a   :  { %v8486_v60 = vpop.f32.mrf.mxu1  ;;  %4881 = vmatprep.subr.bf16.mxu1 %v12502_v2  ;;  %v2710_v18 = vld [vmem:[%s12482_s4 + $0x1a0] sm:$0xff]  ;;  %v2183_v5 = vadd.f32 %v2182_v13, %v10001_v9  ;;  %v2175_v9 = vadd.f32 %v10020_v19, %v9941_v25 }
 0x16b   :  { %v2207_v56 = vadd.f32 %v8486_v60, %v8352_v46  ;;  %v10081_v23 = vpop.f32.mrf.mxu0  ;;  %v2525_v32 = vmax.f32 %v2191_v62, 0.0  ;;  %v2714_v25 = vld [vmem:[%s12482_s4 + $0x1c0] sm:$0xff] }
 0x16c   :  { %v2198_v37 = vpop.f32.mrf.mxu1  ;;  %v2718_v19 = vld [vmem:[%s12482_s4 + $0x1e0] sm:$0xff] }
 0x16d   :  { %v2529_v42 = vmax.f32 %v2207_v56, 0.0  ;;  %v2199_v50 = vadd.f32 %v2198_v37, %v1122_v38  ;;  %4882 = vmatpush1.bf16.msra.mxu1 %v2610_v48  ;;  %v10087_v3 = vpop.f32.mrf.mxu0  ;;  %v2526_v38 = vmax.f32 %v2196_v15, 0.0  ;;  %v7555_v56 = vcombine.low %v2698_v41, %v2702_v61 }
 0x16e   :  { %v10083_v44 = vpop.f32.mrf.mxu1  ;;  %4883 = vmatprep.subr.bf16.mxu1 %v12502_v2  ;;  %v2524_v37 = vmax.f32 %v2188_v1, 0.0 }
 0x16f   :  { %v2625_v46 = vpack.c.bf16 %v2529_v42, %v2528_v27  ;;  %v2527_v8 = vmax.f32 %v2199_v50, 0.0  ;;  %v10093_v10 = vpop.f32.mrf.mxu0  ;;  %v2523_v42 = vmax.f32 %v2183_v5, 0.0  ;;  %v2164_v5 = vadd.f32 %v10016_v28, %v9938_v14 }
 0x170   :  { %v10089_v6 = vpop.f32.mrf.mxu1  ;;  %4643 = vmatmul.mubr.bf16.gmra.mxu0 %v7547_v35  ;;  %v2180_v35 = vadd.f32 %v10044_v59, %v9973_v47  ;;  %v2623_v13 = vpack.c.bf16 %v2525_v32, %v2524_v37  ;;  %v2172_v47 = vadd.f32 %v10009_v30, %v9929_v11  ;;  %v2167_v11 = vadd.f32 %v10031_v40, %v9957_v57 }
 0x171   :  { %4884 = vmatpush2.bf16.msra.mxu1 %v2625_v46  ;;  %4650 = vmatprep.mubr.bf16.mxu0 %v7556_v49  ;;  %v2624_v45 = vpack.c.bf16 %v2527_v8, %v2526_v38  ;;  %v10105_v60 = vpop.f32.mrf.mxu0  ;;  %v7564_v49 = vcombine.high %v2706_v20, %v2710_v18  ;;  %v2521_v46 = vmax.f32 %v2175_v9, 0.0  ;;  %v7563_v38 = vcombine.low %v2706_v20, %v2710_v18 }
 0x172   :  { %v10095_v36 = vpop.f32.mrf.mxu1  ;;  %4885 = vmatprep.subr.bf16.mxu1 %v12502_v2  ;;  %v2522_v59 = vmax.f32 %v2180_v35, 0.0  ;;  %v2520_v32 = vmax.f32 %v2172_v47, 0.0  ;;  %v2159_v57 = vadd.f32 %v9987_v24, %v9912_v43  ;;  %v2519_v35 = vmax.f32 %v2167_v11, 0.0  ;;  %v2722_v43 = vld [vmem:[%s12482_s4 + $0x200] sm:$0xff] }
 0x173   :  { %v8367_v27 = vpop.f32.mrf.mxu0  ;;  %v2156_v14 = vadd.f32 %v9963_v55, %v9893_v4  ;;  %v2518_v28 = vmax.f32 %v2164_v5, 0.0  ;;  %v2726_v24 = vld [vmem:[%s12482_s4 + $0x220] sm:$0xff]  ;;  %v2151_v55 = vadd.f32 %v10003_v26, %v9923_v0  ;;  %v2148_v11 = vadd.f32 %v9975_v52, %v9906_v29 }
 0x174   :  { %v10107_v48 = vpop.f32.mrf.mxu1  ;;  %v2622_v30 = vpack.c.bf16 %v2523_v42, %v2522_v59  ;;  %v2621_v40 = vpack.c.bf16 %v2521_v46, %v2520_v32  ;;  %v7571_v59 = vcombine.low %v2714_v25, %v2718_v19  ;;  %v10175_v29 = vld [vmem:[%s12482_s4 + $0x240] sm:$0xff] }
 0x175   :  { %4886 = vmatpush2.bf16.msra.mxu1 %v2624_v45  ;;  %v10116_v50 = vpop.f32.mrf.mxu0  ;;  %v7572_v45 = vcombine.high %v2714_v25, %v2718_v19  ;;  %v2620_v4 = vpack.c.bf16 %v2519_v35, %v2518_v28  ;;  %v2516_v46 = vmax.f32 %v2156_v14, 0.0  ;;  %v2734_v52 = vld [vmem:[%s12482_s4 + $0x260] sm:$0xff]  ;;  %v2667_v35 = vld [vmem:[%s12482_s4 + $0x48] sm:$0xff] }
 0x176   :  { %v10111_v15 = vpop.f32.mrf.mxu1  ;;  %4887 = vmatprep.subr.bf16.mxu1 %v12502_v2  ;;  %v2671_v14 = vld [vmem:[%s12482_s4 + $0x68] sm:$0xff] }
 0x177   :  { %v10122_v41 = vpop.f32.mrf.mxu0 }
 0x178   :  { %v10118_v62 = vpop.f32.mrf.mxu1  ;;  %4651 = vmatmul.mubr.bf16.gmra.mxu0 %v7555_v56 }
 0x179   :  { %4888 = vmatpush2.bf16.msra.mxu1 %v2623_v13  ;;  %4658 = vmatprep.mubr.bf16.mxu0 %v7564_v49  ;;  %v10135_v8 = vpop.f32.mrf.mxu0  ;;  %v2517_v13 = vmax.f32 %v2159_v57, 0.0 }
 0x17a   :  { %v10124_v61 = vpop.f32.mrf.mxu1  ;;  %4889 = vmatprep.subr.bf16.mxu1 %v12502_v2 }
 0x17b   :  { %v10141_v56 = vpop.f32.mrf.mxu0  ;;  %v2619_v5 = vpack.c.bf16 %v2517_v13, %v2516_v46  ;;  %v7579_v46 = vcombine.low %v2722_v43, %v2726_v24 }
 0x17c   :  { %v10137_v1 = vpop.f32.mrf.mxu1 }
 0x17d   :  { %4890 = vmatpush2.bf16.msra.mxu1 %v2622_v30  ;;  %v10146_v49 = vpop.f32.mrf.mxu0  ;;  %v7580_v30 = vcombine.high %v2722_v43, %v2726_v24 }
 0x17e   :  { %v8497_v37 = vpop.f32.mrf.mxu1  ;;  %4891 = vmatprep.subr.bf16.mxu1 %v12502_v2 }
 0x17f   :  { %v10152_v20 = vpop.f32.mrf.mxu0 }
 0x180   :  { %v10148_v9 = vpop.f32.mrf.mxu1  ;;  %4659 = vmatmul.mubr.bf16.gmra.mxu0 %v7563_v38 }
 0x181   :  { %4892 = vmatpush2.bf16.msra.mxu1 %v2621_v40  ;;  %4666 = vmatprep.mubr.bf16.mxu0 %v7572_v45  ;;  %v10163_v42 = vpop.f32.mrf.mxu0  ;;  %v2515_v45 = vmax.f32 %v2151_v55, 0.0  ;;  %v2514_v40 = vmax.f32 %v2148_v11, 0.0  ;;  %v2252_v11 = vadd.f32 %v8497_v37, %v10081_v23  ;;  %v12504_v23 = vcombine.low %v9654_v31, %v9661_v51  ;;  %v2742_v31 = vld [vmem:[%s12482_s4 + $0x2a0] sm:$0xff]  ;;  %v2675_v51 = vld [vmem:[%s12482_s4 + $0x88] sm:$0xff] }
 0x182   :  { %v8498_v18 = vpop.f32.mrf.mxu1  ;;  %4893 = vmatprep.subr.bf16.mxu1 %v12502_v2 }
 0x183   :  { %v10167_v38 = vpop.f32.mrf.mxu0  ;;  %v2618_v28 = vpack.c.bf16 %v2515_v45, %v2514_v40  ;;  %v2255_v45 = vadd.f32 %v8498_v18, %v10093_v10  ;;  %v10212_v10 = vld [vmem:[%s12482_s4 + $0x280] sm:$0xff]  ;;  %v2244_v18 = vadd.f32 %v10148_v9, %v10087_v3  ;;  %v7587_v9 = vcombine.low %v10175_v29, %v2734_v52 }
 0x184   :  { %v2246_v47 = vpop.f32.mrf.mxu1 }
 0x185   :  { %4894 = vmatpush2.bf16.msra.mxu1 %v2620_v4  ;;  %v10170_v0 = vpop.f32.mrf.mxu0 }
 0x186   :  { %v8501_v32 = vpop.f32.mrf.mxu1  ;;  %4895 = vmatprep.subr.bf16.mxu1 %v12502_v2 }
 0x187   :  { %v2268_v57 = vadd.f32 %v8501_v32, %v8367_v27  ;;  %v10180_v25 = vpop.f32.mrf.mxu0 }
 0x188   :  { %v2259_v26 = vpop.f32.mrf.mxu1  ;;  %4667 = vmatmul.mubr.bf16.gmra.mxu0 %v7571_v59 }
 0x189   :  { %4896 = vmatpush2.bf16.msra.mxu1 %v2619_v5  ;;  %4674 = vmatprep.mubr.bf16.mxu0 %v7580_v30  ;;  %v2260_v27 = vadd.f32 %v2259_v26, %v10116_v50  ;;  %v2544_v13 = vmax.f32 %v2268_v57, 0.0  ;;  %v10191_v4 = vpop.f32.mrf.mxu0  ;;  %v7588_v50 = vcombine.high %v10175_v29, %v2734_v52  ;;  %v7526_v5 = vcombine.high %v2667_v35, %v2671_v14 }
 0x18a   :  { %v8502_v19 = vpop.f32.mrf.mxu1  ;;  %4897 = vmatprep.subr.bf16.mxu1 %v12502_v2 }
 0x18b   :  { %v2271_v55 = vadd.f32 %v8502_v19, %v10122_v41  ;;  %v10196_v26 = vpop.f32.mrf.mxu0  ;;  %v2542_v57 = vmax.f32 %v2260_v27, 0.0  ;;  %v2541_v27 = vmax.f32 %v2255_v45, 0.0 }
 0x18c   :  { %v2262_v59 = vpop.f32.mrf.mxu1 }
 0x18d   :  { %v2545_v30 = vmax.f32 %v2271_v55, 0.0  ;;  %v2263_v32 = vadd.f32 %v2262_v59, %v10135_v8  ;;  %4898 = vmatpush2.bf16.msra.mxu1 %v2618_v28  ;;  %v10202_v24 = vpop.f32.mrf.mxu0  ;;  %v2540_v8 = vmax.f32 %v2252_v11, 0.0  ;;  %v2247_v28 = vadd.f32 %v2246_v47, %v10105_v60  ;;  %v2679_v59 = vld [vmem:[%s12482_s4 + $0xa8] sm:$0xff] }
 0x18e   :  { %v10199_v40 = vpop.f32.mrf.mxu1  ;;  %5445 = vmatprep.subr.bf16.mxu1 %v12502_v2  ;;  %v7525_v47 = vcombine.low %v2667_v35, %v2671_v14  ;;  %v7534_v11 = vcombine.high %v2675_v51, %v2679_v59  ;;  %v2231_v35 = vadd.f32 %v10137_v1, %v10078_v58  ;;  %v10275_v58 = vpop.permute.xlu0 %3130  ;;  %v7595_v1 = vcombine.low %v10212_v10, %v2742_v31 }
 0x18f   :  { %v2633_v41 = vpack.c.bf16 %v2545_v30, %v2544_v13  ;;  %v2543_v43 = vmax.f32 %v2263_v32, 0.0  ;;  %v10214_v37 = vpop.f32.mrf.mxu0  ;;  %v2239_v32 = vadd.f32 %v10124_v61, %v10075_v53  ;;  %v2631_v45 = vpack.c.bf16 %v2541_v27, %v2540_v8  ;;  %v10253_v53 = vld [vmem:[%s12482_s4 + $0x2c0] sm:$0xff]  ;;  %v2687_v27 = vld [vmem:[%s12482_s4 + $0xe8] sm:$0xff]  ;;  %12505 = vst [vmem:[#allocation16_spill] sm:$0xff] %v10275_v58 }
 0x190   :  { %v10204_v19 = vpop.f32.mrf.mxu1  ;;  %4675 = vmatmul.mubr.bf16.gmra.mxu0 %v7579_v46  ;;  %4900 = vmatmul.mubr.bf16.vlgmr.msra.gmra.mxu1 %v12504_v23  ;;  %v2236_v46 = vadd.f32 %v10111_v15, %v10063_v34  ;;  %v2228_v61 = vadd.f32 %v10118_v62, %v10066_v21  ;;  %v2750_v8 = vld [vmem:[%s12482_s4 + $0x2e0] sm:$0xff] }
 0x191   :  { %4682 = vmatprep.mubr.bf16.mxu0 %v7588_v50  ;;  %4907 = vmatprep.mubr.bf16.mxu1 %v7526_v5  ;;  %v2632_v13 = vpack.c.bf16 %v2543_v43, %v2542_v57  ;;  %v10230_v3 = vpop.f32.mrf.mxu0  ;;  %v7596_v50 = vcombine.high %v10212_v10, %v2742_v31  ;;  %v2538_v5 = vmax.f32 %v2244_v18, 0.0  ;;  %v2539_v57 = vmax.f32 %v2247_v28, 0.0  ;;  %v2683_v18 = vld [vmem:[%s12482_s4 + $0xc8] sm:$0xff] }
 0x192   :  { %v10219_v55 = vpop.f32.mrf.mxu1  ;;  %5157 = vmatpush1.bf16.msra.mxu0 %v2633_v41  ;;  %v2536_v34 = vmax.f32 %v2236_v46, 0.0  ;;  %v2537_v52 = vmax.f32 %v2239_v32, 0.0  ;;  %v7533_v28 = vcombine.low %v2675_v51, %v2679_v59  ;;  %v10303_v31 = vpop.permute.xlu0 %3135  ;;  %v2212_v51 = vadd.f32 %v10089_v6, %v10042_v54 }
 0x193   :  { %5158 = vmatprep.subr.bf16.mxu0 %v12502_v2  ;;  %v10239_v30 = vpop.f32.mrf.mxu0  ;;  %v2630_v14 = vpack.c.bf16 %v2539_v57, %v2538_v5  ;;  %v2535_v5 = vmax.f32 %v2231_v35, 0.0  ;;  %12506 = vst [vmem:[#allocation17_spill] sm:$0xff] %v10303_v31  ;;  %v2758_v35 = vld [vmem:[%s12482_s4 + $0x320] sm:$0xff]  ;;  %v7603_v6 = vcombine.low %v10253_v53, %v2750_v8 }
 0x194   :  { %v10233_v60 = vpop.f32.mrf.mxu1  ;;  %v2629_v32 = vpack.c.bf16 %v2537_v52, %v2536_v34  ;;  %v2215_v34 = vadd.f32 %v10107_v48, %v10059_v17  ;;  %v7541_v48 = vcombine.low %v2683_v18, %v2687_v27 }
 0x195   :  { %v10245_v43 = vpop.f32.mrf.mxu0 }
 0x196   :  { %v10243_v41 = vpop.f32.mrf.mxu1  ;;  %5159 = vmatpush1.bf16.msra.mxu0 %v2632_v13  ;;  %v2220_v13 = vadd.f32 %v10083_v44, %v10035_v33  ;;  %v10294_v33 = vpop.permute.xlu1 %3050 }
 0x197   :  { %5160 = vmatprep.subr.bf16.mxu0 %v12502_v2  ;;  %v10255_v15 = vpop.f32.mrf.mxu0 }
 0x198   :  { %v10248_v29 = vpop.f32.mrf.mxu1  ;;  %4683 = vmatmul.mubr.bf16.gmra.mxu0 %v7587_v9  ;;  %4908 = vmatmul.mubr.bf16.gmra.mxu1 %v7525_v47  ;;  %v7604_v9 = vcombine.high %v10253_v53, %v2750_v8  ;;  %v7542_v47 = vcombine.high %v2683_v18, %v2687_v27  ;;  %v2532_v44 = vmax.f32 %v2220_v13, 0.0  ;;  %v10331_v53 = vpop.permute.xlu0 %3290  ;;  %v10336_v18 = vld [vmem:[%s12482_s4 + $0x340] sm:$0xff] }
 0x199   :  { %4690 = vmatprep.mubr.bf16.mxu0 %v7596_v50  ;;  %4915 = vmatprep.mubr.bf16.mxu1 %v7534_v11  ;;  %v10272_v21 = vpop.f32.mrf.mxu0  ;;  %v2223_v50 = vadd.f32 %v10095_v36, %v10048_v39  ;;  %v2534_v11 = vmax.f32 %v2228_v61, 0.0  ;;  %v10299_v39 = vld [vmem:[%s12482_s4 + $0x300] sm:$0xff]  ;;  %12508 = vst [vmem:[#allocation19_spill] sm:$0xff] %v10331_v53 }
 0x19a   :  { %v10261_v23 = vpop.f32.mrf.mxu1  ;;  %5161 = vmatpush1.bf16.msra.mxu0 %v2631_v45  ;;  %v10325_v31 = vpop.permute.xlu1 %3055 }
 0x19b   :  { %5162 = vmatprep.subr.bf16.mxu0 %v12502_v2  ;;  %v10283_v46 = vpop.f32.mrf.mxu0  ;;  %v2533_v59 = vmax.f32 %v2223_v50, 0.0  ;;  %v2628_v61 = vpack.c.bf16 %v2535_v5, %v2534_v11  ;;  %v2531_v11 = vmax.f32 %v2215_v34, 0.0  ;;  %12507 = vst [vmem:[#allocation18_spill] sm:$0xff] %v10325_v31  ;;  %v2699_v34 = vld [vmem:[%s12482_s4 + $0x148] sm:$0xff] }
 0x19c   :  { %v10277_v62 = vpop.f32.mrf.mxu1 }
 0x19d   :  { %v10289_v57 = vpop.f32.mrf.mxu0  ;;  %v2627_v50 = vpack.c.bf16 %v2533_v59, %v2532_v44 }
 0x19e   :  { %v10287_v45 = vpop.f32.mrf.mxu1  ;;  %5163 = vmatpush1.bf16.msra.mxu0 %v2630_v14  ;;  %v2691_v14 = vld [vmem:[%s12482_s4 + $0x108] sm:$0xff]  ;;  %v10362_v53 = vpop.permute.xlu1 %3295 }
 0x19f   :  { %5164 = vmatprep.subr.bf16.mxu0 %v12502_v2  ;;  %v10301_v36 = vpop.f32.mrf.mxu0  ;;  %12509 = vst [vmem:[#allocation20_spill] sm:$0xff] %v10362_v53 }
 0x1a0   :  { %v10292_v10 = vpop.f32.mrf.mxu1  ;;  %4691 = vmatmul.mubr.bf16.gmra.mxu0 %v7595_v1  ;;  %4916 = vmatmul.mubr.bf16.gmra.mxu1 %v7533_v28  ;;  %v2695_v1 = vld [vmem:[%s12482_s4 + $0x128] sm:$0xff]  ;;  %v7612_v28 = vcombine.high %v10299_v39, %v2758_v35 }
 0x1a1   :  { %4698 = vmatprep.mubr.bf16.mxu0 %v7604_v9  ;;  %4923 = vmatprep.mubr.bf16.mxu1 %v7542_v47  ;;  %v10318_v54 = vpop.f32.mrf.mxu0  ;;  %v7550_v13 = vcombine.high %v2691_v14, %v2695_v1  ;;  %v2530_v47 = vmax.f32 %v2212_v51, 0.0 }
 0x1a2   :  { %v8514_v52 = vpop.f32.mrf.mxu1  ;;  %5165 = vmatpush1.bf16.msra.mxu0 %v2629_v32 }
 0x1a3   :  { %5166 = vmatprep.subr.bf16.mxu0 %v12502_v2  ;;  %v10323_v9 = vpop.f32.mrf.mxu0  ;;  %v2626_v44 = vpack.c.bf16 %v2531_v11, %v2530_v47  ;;  %v7549_v47 = vcombine.low %v2691_v14, %v2695_v1 }
 0x1a4   :  { %v2310_v17 = vpop.f32.mrf.mxu1 }
 0x1a5   :  { %v10328_v58 = vpop.f32.mrf.mxu0 }
 0x1a6   :  { %v8517_v5 = vpop.f32.mrf.mxu1  ;;  %5167 = vmatpush1.bf16.msra.mxu0 %v2628_v61  ;;  %v2703_v61 = vld [vmem:[%s12482_s4 + $0x168] sm:$0xff] }
 0x1a7   :  { %v2332_v32 = vadd.f32 %v8517_v5, %v10239_v30  ;;  %5168 = vmatprep.subr.bf16.mxu0 %v12502_v2  ;;  %v10341_v30 = vld [vmem:[%s12482_s4 + $0x360] sm:$0xff]  ;;  %v10343_v27 = vpop.f32.mrf.mxu0  ;;  %v2316_v5 = vadd.f32 %v10287_v45, %v10196_v26  ;;  %v2308_v45 = vadd.f32 %v10292_v10, %v10202_v24  ;;  %v10394_v24 = vpop.permute.xlu1 %3215 }
 0x1a8   :  { %v2323_v8 = vpop.f32.mrf.mxu1  ;;  %4699 = vmatmul.mubr.bf16.gmra.mxu0 %v7603_v6  ;;  %4924 = vmatmul.mubr.bf16.gmra.mxu1 %v7541_v48  ;;  %12511 = vst [vmem:[#allocation22_spill] sm:$0xff] %v10394_v24 }
 0x1a9   :  { %4706 = vmatprep.mubr.bf16.mxu0 %v7612_v28  ;;  %4931 = vmatprep.mubr.bf16.mxu1 %v7550_v13  ;;  %v2324_v51 = vadd.f32 %v2323_v8, %v10245_v43  ;;  %v2560_v6 = vmax.f32 %v2332_v32, 0.0  ;;  %v7611_v13 = vcombine.low %v10299_v39, %v2758_v35  ;;  %v7620_v43 = vcombine.high %v10336_v18, %v10341_v30  ;;  %v10357_v11 = vpop.f32.mrf.mxu0 }
 0x1aa   :  { %v8518_v59 = vpop.f32.mrf.mxu1  ;;  %5169 = vmatpush1.bf16.msra.mxu0 %v2627_v50  ;;  %v7558_v32 = vcombine.high %v2699_v34, %v2703_v61 }
 0x1ab   :  { %v2335_v48 = vadd.f32 %v8518_v59, %v10255_v15  ;;  %5170 = vmatprep.subr.bf16.mxu0 %v12502_v2  ;;  %v10364_v15 = vpop.permute.xlu0 %3210  ;;  %v2319_v59 = vadd.f32 %v8514_v52, %v10214_v37  ;;  %v2558_v39 = vmax.f32 %v2324_v51, 0.0  ;;  %v10372_v26 = vpop.f32.mrf.mxu0  ;;  %v10377_v37 = vld [vmem:[%s12482_s4 + $0x380] sm:$0xff] }
 0x1ac   :  { %v2326_v28 = vpop.f32.mrf.mxu1  ;;  %12510 = vst [vmem:[#allocation21_spill] sm:$0xff] %v10364_v15  ;;  %v2851_v15 = vld [vmem:[%s12482_s4 + $0x608] sm:$0xff] }
 0x1ad   :  { %v2561_v8 = vmax.f32 %v2335_v48, 0.0  ;;  %v2327_v50 = vadd.f32 %v2326_v28, %v10272_v21  ;;  %v2556_v21 = vmax.f32 %v2316_v5, 0.0  ;;  %v2557_v52 = vmax.f32 %v2319_v59, 0.0  ;;  %v2774_v48 = vld [vmem:[%s12482_s4 + $0x3a0] sm:$0xff]  ;;  %v2707_v28 = vld [vmem:[%s12482_s4 + $0x188] sm:$0xff] }
 0x1ae   :  { %v10367_v35 = vpop.f32.mrf.mxu1  ;;  %5171 = vmatpush1.bf16.msra.mxu0 %v2626_v44  ;;  %v2311_v44 = vadd.f32 %v2310_v17, %v10230_v3  ;;  %v7619_v17 = vcombine.low %v10336_v18, %v10341_v30  ;;  %v2300_v5 = vadd.f32 %v10243_v41, %v10167_v38  ;;  %v2554_v59 = vmax.f32 %v2308_v45, 0.0  ;;  %v10421_v41 = vpop.permute.xlu1 %3125 }
 0x1af   :  { %v2641_v14 = vpack.c.bf16 %v2561_v8, %v2560_v6  ;;  %v2559_v1 = vmax.f32 %v2327_v50, 0.0  ;;  %5172 = vmatprep.subr.bf16.mxu0 %v12502_v2  ;;  %v10396_v3 = vpop.permute.xlu0 %3120  ;;  %v7628_v8 = vcombine.high %v10377_v37, %v2774_v48  ;;  %12512 = vst [vmem:[#allocation23_spill] sm:$0xff] %v10421_v41 }
 0x1b0   :  { %v10370_v31 = vpop.f32.mrf.mxu1  ;;  %4707 = vmatmul.mubr.bf16.gmra.mxu0 %v7611_v13  ;;  %4932 = vmatmul.mubr.bf16.gmra.mxu1 %v7549_v47  ;;  %v2711_v13 = vld [vmem:[%s12482_s4 + $0x1a8] sm:$0xff]  ;;  %v7557_v47 = vcombine.low %v2699_v34, %v2703_v61  ;;  %v2552_v38 = vmax.f32 %v2300_v5, 0.0  ;;  %v2292_v34 = vadd.f32 %v10248_v29, %v10170_v0 }
 0x1b1   :  { %4714 = vmatprep.mubr.bf16.mxu0 %v7620_v43  ;;  %4939 = vmatprep.mubr.bf16.mxu1 %v7558_v32  ;;  %v2640_v51 = vpack.c.bf16 %v2559_v1, %v2558_v39  ;;  %v10402_v43 = vpop.f32.mrf.mxu0  ;;  %v7566_v50 = vcombine.high %v2707_v28, %v2711_v13  ;;  %v2303_v32 = vadd.f32 %v10261_v23, %v10180_v25  ;;  %v10419_v25 = vld [vmem:[%s12482_s4 + $0x3c0] sm:$0xff] }
 0x1b2   :  { %v10382_v6 = vpop.f32.mrf.mxu1  ;;  %5173 = vmatpush2.bf16.msra.mxu0 %v2641_v14  ;;  %v2639_v39 = vpack.c.bf16 %v2557_v52, %v2556_v21  ;;  %v2555_v14 = vmax.f32 %v2311_v44, 0.0  ;;  %v2295_v21 = vadd.f32 %v10277_v62, %v10191_v4  ;;  %v2782_v44 = vld [vmem:[%s12482_s4 + $0x3e0] sm:$0xff]  ;;  %v7627_v4 = vcombine.low %v10377_v37, %v2774_v48  ;;  %v10452_v37 = vpop.permute.xlu1 %3045 }
 0x1b3   :  { %5174 = vmatprep.subr.bf16.mxu0 %v12502_v2  ;;  %v10414_v30 = vpop.f32.mrf.mxu0  ;;  %v10423_v23 = vpop.permute.xlu0 %3040  ;;  %v2553_v61 = vmax.f32 %v2303_v32, 0.0  ;;  %v7565_v29 = vcombine.low %v2707_v28, %v2711_v13  ;;  %v7636_v5 = vcombine.high %v10419_v25, %v2782_v44  ;;  %v2550_v32 = vmax.f32 %v2292_v34, 0.0 }
 0x1b4   :  { %v10398_v10 = vpop.f32.mrf.mxu1  ;;  %v2638_v45 = vpack.c.bf16 %v2555_v14, %v2554_v59 }
 0x1b5   :  { %v10444_v62 = vpop.f32.mrf.mxu0  ;;  %v2637_v59 = vpack.c.bf16 %v2553_v61, %v2552_v38  ;;  %v2279_v38 = vadd.f32 %v10233_v60, %v10163_v42  ;;  %v7635_v42 = vcombine.low %v10419_v25, %v2782_v44 }
 0x1b6   :  { %v10409_v1 = vpop.f32.mrf.mxu1  ;;  %5175 = vmatpush2.bf16.msra.mxu0 %v2640_v51  ;;  %v2715_v51 = vld [vmem:[%s12482_s4 + $0x1c8] sm:$0xff] }
 0x1b7   :  { %5176 = vmatprep.subr.bf16.mxu0 %v12502_v2  ;;  %v10454_v48 = vpop.permute.xlu0 %3280 }
 0x1b8   :  { %v10412_v18 = vpop.f32.mrf.mxu1  ;;  %4715 = vmatmul.mubr.bf16.gmra.mxu0 %v7619_v17  ;;  %4940 = vmatmul.mubr.bf16.gmra.mxu1 %v7557_v47  ;;  %v2719_v17 = vld [vmem:[%s12482_s4 + $0x1e8] sm:$0xff]  ;;  %v2284_v47 = vadd.f32 %v10199_v40, %v10141_v56  ;;  %12513 = vst [vmem:[#allocation24_spill] sm:$0xff] %v10454_v48  ;;  %v8399_v56 = vpop.f32.mrf.mxu0 }
 0x1b9   :  { %4722 = vmatprep.mubr.bf16.mxu0 %v7628_v8  ;;  %4947 = vmatprep.mubr.bf16.mxu1 %v7566_v50  ;;  %v7574_v8 = vcombine.high %v2715_v51, %v2719_v17  ;;  %v2287_v50 = vadd.f32 %v10219_v55, %v10152_v20  ;;  %v10461_v20 = vld [vmem:[%s12482_s4 + $0x400] sm:$0xff]  ;;  %v2276_v55 = vadd.f32 %v10204_v19, %v10146_v49 }
 0x1ba   :  { %v10429_v52 = vpop.f32.mrf.mxu1  ;;  %5177 = vmatpush2.bf16.msra.mxu0 %v2639_v39  ;;  %v2551_v39 = vmax.f32 %v2295_v21, 0.0  ;;  %v2548_v40 = vmax.f32 %v2284_v47, 0.0  ;;  %v2790_v21 = vld [vmem:[%s12482_s4 + $0x420] sm:$0xff]  ;;  %v7573_v19 = vcombine.low %v2715_v51, %v2719_v17  ;;  %v1311_v60 = vpop.f32.mrf.mxu0 }
 0x1bb   :  { %5178 = vmatprep.subr.bf16.mxu0 %v12502_v2  ;;  %v2549_v13 = vmax.f32 %v2287_v50, 0.0  ;;  %v10481_v53 = vpop.permute.xlu0 %3200  ;;  %v10487_v51 = vld [vmem:[%s12482_s4 + $0x440] sm:$0xff] }
 0x1bc   :  { %v10441_v0 = vpop.f32.mrf.mxu1  ;;  %v2636_v34 = vpack.c.bf16 %v2551_v39, %v2550_v32  ;;  %v2547_v32 = vmax.f32 %v2279_v38, 0.0  ;;  %12515 = vst [vmem:[#allocation26_spill] sm:$0xff] %v10481_v53  ;;  %v8400_v25 = vpop.f32.mrf.mxu0  ;;  %v10492_v17 = vld [vmem:[%s12482_s4 + $0x460] sm:$0xff] }
 0x1bd   :  { %v2635_v50 = vpack.c.bf16 %v2549_v13, %v2548_v40 }
 0x1be   :  { %v8529_v14 = vpop.f32.mrf.mxu1  ;;  %5179 = vmatpush2.bf16.msra.mxu0 %v2638_v45  ;;  %v2723_v45 = vld [vmem:[%s12482_s4 + $0x208] sm:$0xff] }
 0x1bf   :  { %5180 = vmatprep.subr.bf16.mxu0 %v12502_v2 }
 0x1c0   :  { %v10456_v28 = vpop.f32.mrf.mxu1  ;;  %4723 = vmatmul.mubr.bf16.gmra.mxu0 %v7627_v4  ;;  %4948 = vmatmul.mubr.bf16.gmra.mxu1 %v7565_v29  ;;  %v2727_v4 = vld [vmem:[%s12482_s4 + $0x228] sm:$0xff]  ;;  %v7644_v29 = vcombine.high %v10461_v20, %v2790_v21 }
 0x1c1   :  { %4730 = vmatprep.mubr.bf16.mxu0 %v7636_v5  ;;  %4955 = vmatprep.mubr.bf16.mxu1 %v7574_v8  ;;  %v7582_v47 = vcombine.high %v2723_v45, %v2727_v4  ;;  %v10479_v5 = vpop.permute.xlu1 %3285  ;;  %v2546_v8 = vmax.f32 %v2276_v55, 0.0  ;;  %v1314_v55 = vpop.f32.mrf.mxu0 }
 0x1c2   :  { %v8530_v61 = vpop.f32.mrf.mxu1  ;;  %5181 = vmatpush2.bf16.msra.mxu0 %v2637_v59  ;;  %12514 = vst [vmem:[#allocation25_spill] sm:$0xff] %v10479_v5 }
 0x1c3   :  { %5182 = vmatprep.subr.bf16.mxu0 %v12502_v2 }
 0x1c4   :  { %v2374_v49 = vpop.f32.mrf.mxu1 }
 0x1c6   :  { %v8533_v39 = vpop.f32.mrf.mxu1  ;;  %5183 = vmatpush2.bf16.msra.mxu0 %v2636_v34  ;;  %v2735_v34 = vld [vmem:[%s12482_s4 + $0x268] sm:$0xff] }
 0x1c7   :  { %v2396_v59 = vadd.f32 %v8533_v39, %v8399_v56  ;;  %5184 = vmatprep.subr.bf16.mxu0 %v12502_v2  ;;  %v2634_v56 = vpack.c.bf16 %v2547_v32, %v2546_v8  ;;  %v7652_v8 = vcombine.high %v10487_v51, %v10492_v17  ;;  %v2383_v32 = vadd.f32 %v8530_v61, %v10414_v30 }
 0x1c8   :  { %v2387_v48 = vpop.f32.mrf.mxu1  ;;  %4731 = vmatmul.mubr.bf16.gmra.mxu0 %v7635_v42  ;;  %4956 = vmatmul.mubr.bf16.gmra.mxu1 %v7573_v19  ;;  %v10502_v42 = vpop.permute.xlu1 %3205  ;;  %v2380_v19 = vadd.f32 %v8529_v14, %v10372_v26  ;;  %v2963_v26 = vld [vmem:[%s12483_s5 + $0x188] sm:$0xff]  ;;  %v2962_v14 = vld [vmem:[%s12483_s5 + $0x180] sm:$0xff] }
 0x1c9   :  { %v2388_v44 = vadd.f32 %v2387_v48, %v1311_v60  ;;  %4738 = vmatprep.mubr.bf16.mxu0 %v7644_v29  ;;  %4963 = vmatprep.mubr.bf16.mxu1 %v7582_v47  ;;  %v2576_v13 = vmax.f32 %v2396_v59, 0.0  ;;  %v10497_v48 = vld [vmem:[%s12482_s4 + $0x248] sm:$0xff]  ;;  %12516 = vst [vmem:[#allocation27_spill] sm:$0xff] %v10502_v42  ;;  %v7643_v29 = vcombine.low %v10461_v20, %v2790_v21 }
 0x1ca   :  { %v8534_v40 = vpop.f32.mrf.mxu1  ;;  %5185 = vmatpush2.bf16.msra.mxu0 %v2635_v50  ;;  %v7581_v47 = vcombine.low %v2723_v45, %v2727_v4  ;;  %v10509_v50 = vpop.permute.xlu0 %3110  ;;  %v7590_v5 = vcombine.high %v10497_v48, %v2735_v34  ;;  %3225 = vperm.xlu1 %8591, %v2963_v26   ;;  %v2572_v30 = vmax.f32 %v2380_v19, 0.0  ;;  %v2372_v45 = vadd.f32 %v10456_v28, %v10402_v43  ;;  %v2946_v28 = vld [vmem:[%s12483_s5 + $0x100] sm:$0xff] }
 0x1cb   :  { %v2399_v38 = vadd.f32 %v8534_v40, %v8400_v25  ;;  %5186 = vmatprep.subr.bf16.mxu0 %v12502_v2  ;;  %v2574_v39 = vmax.f32 %v2388_v44, 0.0  ;;  %3220 = vperm.xlu0 %8590, %v2962_v14   ;;  %v2573_v4 = vmax.f32 %v2383_v32, 0.0  ;;  %v2375_v44 = vadd.f32 %v2374_v49, %v10444_v62  ;;  %v2947_v62 = vld [vmem:[%s12483_s5 + $0x108] sm:$0xff] }
 0x1cc   :  { %v2390_v60 = vpop.f32.mrf.mxu1  ;;  %v2739_v49 = vld [vmem:[%s12482_s4 + $0x288] sm:$0xff] }
 0x1cd   :  { %v2577_v59 = vmax.f32 %v2399_v38, 0.0  ;;  %v2391_v25 = vadd.f32 %v2390_v60, %v1314_v55  ;;  %v2802_v55 = vld [vmem:[%s12482_s4 + $0x480] sm:$0xff]  ;;  %v10532_v38 = vpop.permute.xlu1 %3115  ;;  %v2743_v60 = vld [vmem:[%s12482_s4 + $0x2a8] sm:$0xff]  ;;  %v2571_v26 = vmax.f32 %v2375_v44, 0.0 }
 0x1ce   :  { %v10512_v40 = vpop.f32.mrf.mxu1  ;;  %5187 = vmatpush2.bf16.msra.mxu0 %v2634_v56  ;;  %v10537_v43 = vpop.permute.xlu0 %3030  ;;  %3145 = vperm.xlu1 %8591, %v2947_v62   ;;  %v7597_v44 = vcombine.low %v2739_v49, %v2743_v60  ;;  %v2351_v62 = vadd.f32 %v10382_v6, %v10301_v36  ;;  %v2340_v36 = vadd.f32 %v10370_v31, %v10289_v57  ;;  %v2755_v57 = vld [vmem:[%s12482_s4 + $0x308] sm:$0xff] }
 0x1cf   :  { %v2649_v20 = vpack.c.bf16 %v2577_v59, %v2576_v13  ;;  %v2575_v21 = vmax.f32 %v2391_v25, 0.0  ;;  %v2806_v13 = vld [vmem:[%s12482_s4 + $0x4a0] sm:$0xff]  ;;  %3140 = vperm.xlu0 %8590, %v2946_v28   ;;  %v2570_v59 = vmax.f32 %v2372_v45, 0.0  ;;  %v2647_v25 = vpack.c.bf16 %v2573_v4, %v2572_v30  ;;  %v2759_v31 = vld [vmem:[%s12482_s4 + $0x328] sm:$0xff] }
 0x1d0   :  { %v10521_v61 = vpop.f32.mrf.mxu1  ;;  %4739 = vmatmul.mubr.bf16.gmra.mxu0 %v7643_v29  ;;  %4964 = vmatmul.mubr.bf16.gmra.mxu1 %v7581_v47  ;;  %v7651_v47 = vcombine.low %v10487_v51, %v10492_v17  ;;  %v7660_v32 = vcombine.high %v2802_v55, %v2806_v13  ;;  %v2359_v17 = vadd.f32 %v10441_v0, %v10357_v11  ;;  %v2814_v30 = vld [vmem:[%s12482_s4 + $0x4e0] sm:$0xff]  ;;  %v2751_v11 = vld [vmem:[%s12482_s4 + $0x2e8] sm:$0xff]  ;;  %v2565_v6 = vmax.f32 %v2351_v62, 0.0 }
 0x1d1   :  { %v2648_v56 = vpack.c.bf16 %v2575_v21, %v2574_v39  ;;  %5446 = vmatpush1.bf16.msra.mxu1 %v2649_v20  ;;  %4746 = vmatprep.mubr.bf16.mxu0 %v7652_v8  ;;  %v7589_v8 = vcombine.low %v10497_v48, %v2735_v34  ;;  %v2367_v39 = vadd.f32 %v10429_v52, %v10343_v27  ;;  %v2810_v34 = vld [vmem:[%s12482_s4 + $0x4c0] sm:$0xff] }
 0x1d2   :  { %v10534_v19 = vpop.f32.mrf.mxu1  ;;  %5447 = vmatprep.subr.bf16.mxu1 %v12502_v2  ;;  %4971 = vmatprep.mubr.bf16.mxu1 %v7590_v5  ;;  %v2364_v5 = vadd.f32 %v10409_v1, %v10323_v9  ;;  %v7598_v9 = vcombine.high %v2739_v49, %v2743_v60  ;;  %v10563_v1 = vpop.permute.xlu1 %3035  ;;  %v2356_v27 = vadd.f32 %v10412_v18, %v10328_v58  ;;  %v2747_v58 = vld [vmem:[%s12482_s4 + $0x2c8] sm:$0xff] }
 0x1d3   :  { %v10567_v51 = vpop.permute.xlu0 %3270  ;;  %v2569_v52 = vmax.f32 %v2367_v39, 0.0  ;;  %v2646_v48 = vpack.c.bf16 %v2571_v26, %v2570_v59  ;;  %v2348_v18 = vadd.f32 %v10367_v35, %v10283_v46  ;;  %v7659_v4 = vcombine.low %v2802_v55, %v2806_v13  ;;  %v2818_v59 = vld [vmem:[%s12482_s4 + $0x500] sm:$0xff] }
 0x1d4   :  { %v10553_v29 = vpop.f32.mrf.mxu1  ;;  %v2568_v20 = vmax.f32 %v2364_v5, 0.0  ;;  %12517 = vst [vmem:[#allocation28_spill] sm:$0xff] %v10567_v51  ;;  %v2566_v28 = vmax.f32 %v2356_v27, 0.0  ;;  %v7606_v39 = vcombine.high %v2747_v58, %v2751_v11  ;;  %v2343_v13 = vadd.f32 %v10398_v10, %v10318_v54  ;;  %v2898_v51 = vld [vmem:[%s12482_s4 + $0x780] sm:$0xff] }
 0x1d5   :  { %5448 = vmatpush1.bf16.msra.mxu1 %v2648_v56  ;;  %v7668_v56 = vcombine.high %v2810_v34, %v2814_v30  ;;  %v2564_v35 = vmax.f32 %v2348_v18, 0.0  ;;  %v7667_v26 = vcombine.low %v2810_v34, %v2814_v30  ;;  %v2562_v27 = vmax.f32 %v2340_v36, 0.0  ;;  %v2826_v34 = vld [vmem:[%s12482_s4 + $0x540] sm:$0xff] }
 0x1d6   :  { %v10560_v14 = vpop.f32.mrf.mxu1  ;;  %5449 = vmatprep.subr.bf16.mxu1 %v12502_v2  ;;  %v2645_v5 = vpack.c.bf16 %v2569_v52, %v2568_v20  ;;  %v2830_v30 = vld [vmem:[%s12482_s4 + $0x560] sm:$0xff]  ;;  %v7613_v36 = vcombine.low %v2755_v57, %v2759_v31 }
 0x1d7   :  { %v10599_v46 = vpop.permute.xlu0 %3190  ;;  %v2643_v52 = vpack.c.bf16 %v2565_v6, %v2564_v35  ;;  %v7684_v6 = vcombine.high %v2826_v34, %v2830_v30 }
 0x1d8   :  { %v10565_v21 = vpop.f32.mrf.mxu1  ;;  %4747 = vmatmul.mubr.bf16.gmra.mxu0 %v7651_v47  ;;  %4972 = vmatmul.mubr.bf16.gmra.mxu1 %v7589_v8  ;;  %v2567_v47 = vmax.f32 %v2359_v17, 0.0  ;;  %v10594_v8 = vpop.permute.xlu1 %3275  ;;  %12519 = vst [vmem:[#allocation30_spill] sm:$0xff] %v10599_v46  ;;  %v2563_v17 = vmax.f32 %v2343_v13, 0.0  ;;  %v2859_v46 = vld [vmem:[%s12482_s4 + $0x648] sm:$0xff] }
 0x1d9   :  { %5450 = vmatpush1.bf16.msra.mxu1 %v2647_v25  ;;  %4754 = vmatprep.mubr.bf16.mxu0 %v7660_v32  ;;  %12518 = vst [vmem:[#allocation29_spill] sm:$0xff] %v10594_v8  ;;  %v2822_v25 = vld [vmem:[%s12482_s4 + $0x520] sm:$0xff] }
 0x1da   :  { %v10579_v45 = vpop.f32.mrf.mxu1  ;;  %5451 = vmatprep.subr.bf16.mxu1 %v12502_v2  ;;  %4979 = vmatprep.mubr.bf16.mxu1 %v7598_v9  ;;  %v2644_v49 = vpack.c.bf16 %v2567_v47, %v2566_v28  ;;  %v7605_v9 = vcombine.low %v2747_v58, %v2751_v11  ;;  %v2767_v47 = vld [vmem:[%s12482_s4 + $0x368] sm:$0xff]  ;;  %v7675_v35 = vcombine.low %v2818_v59, %v2822_v25 }
 0x1db   :  { %v10622_v20 = vpop.permute.xlu0 %3100 }
 0x1dc   :  { %v10590_v0 = vpop.f32.mrf.mxu1  ;;  %v10620_v54 = vpop.permute.xlu1 %3195 }
 0x1dd   :  { %5452 = vmatpush1.bf16.msra.mxu1 %v2646_v48  ;;  %12520 = vst [vmem:[#allocation31_spill] sm:$0xff] %v10620_v54  ;;  %v7676_v48 = vcombine.high %v2818_v59, %v2822_v25  ;;  %v12522_v25 = vld [vmem:[#allocation13_spill] sm:$0xff] }
 0x1de   :  { %v10596_v32 = vpop.f32.mrf.mxu1  ;;  %5453 = vmatprep.subr.bf16.mxu1 %v12502_v2 }
 0x1df   :  { %v10635_v28 = vpop.permute.xlu0 %3020 }
 0x1e0   :  { %v10601_v55 = vpop.f32.mrf.mxu1  ;;  %4755 = vmatmul.mubr.bf16.gmra.mxu0 %v7659_v4  ;;  %4980 = vmatmul.mubr.bf16.gmra.mxu1 %v7597_v44  ;;  %v7614_v4 = vcombine.high %v2755_v57, %v2759_v31  ;;  %v10632_v58 = vpop.permute.xlu1 %3105  ;;  %v12523_v31 = vld [vmem:[#allocation15_spill] sm:$0xff] }
 0x1e1   :  { %5454 = vmatpush1.bf16.msra.mxu1 %v2645_v5  ;;  %4762 = vmatprep.mubr.bf16.mxu0 %v7668_v56  ;;  %v2642_v56 = vpack.c.bf16 %v2563_v17, %v2562_v27  ;;  %v2763_v5 = vld [vmem:[%s12482_s4 + $0x348] sm:$0xff] }
 0x1e2   :  { %v8546_v60 = vpop.f32.mrf.mxu1  ;;  %5455 = vmatprep.subr.bf16.mxu1 %v12502_v2  ;;  %4987 = vmatprep.mubr.bf16.mxu1 %v7606_v39 }
 0x1e3   :  { %v2447_v27 = vadd.f32 %v8546_v60, %v9451_v63  ;;  %v10650_v59 = vpop.permute.xlu0 %3260  ;;  %v2834_v63 = vld [vmem:[%s12482_s4 + $0x580] sm:$0xff] }
 0x1e4   :  { %v2438_v10 = vpop.f32.mrf.mxu1  ;;  %12521 = vst [vmem:[#allocation32_spill] sm:$0xff] %v10650_v59 }
 0x1e5   :  { %5456 = vmatpush1.bf16.msra.mxu1 %v2644_v49  ;;  %v2589_v60 = vmax.f32 %v2447_v27, 0.0 }
 0x1e6   :  { %v8549_v18 = vpop.f32.mrf.mxu1  ;;  %5457 = vmatprep.subr.bf16.mxu1 %v12502_v2 }
 0x1e7   :  { %v2460_v62 = vadd.f32 %v8549_v18, %v9472_v7  ;;  %v2439_v18 = vadd.f32 %v2438_v10, %v12523_v31 }
 0x1e8   :  { %v2451_v44 = vpop.f32.mrf.mxu1  ;;  %4763 = vmatmul.mubr.bf16.gmra.mxu0 %v7667_v26  ;;  %4988 = vmatmul.mubr.bf16.gmra.mxu1 %v7605_v9 }
 0x1e9   :  { %5458 = vmatpush1.bf16.msra.mxu1 %v2643_v52  ;;  %4770 = vmatprep.mubr.bf16.mxu0 %v7676_v48  ;;  %v2592_v13 = vmax.f32 %v2460_v62, 0.0  ;;  %v2452_v49 = vadd.f32 %v2451_v44, %v9485_v12  ;;  %v10648_v48 = vpop.permute.xlu1 %3025  ;;  %v2444_v12 = vadd.f32 %v10596_v32, %v12522_v25  ;;  %v2771_v32 = vld [vmem:[%s12482_s4 + $0x388] sm:$0xff]  ;;  %v7621_v62 = vcombine.low %v2763_v5, %v2767_v47 }
 0x1ea   :  { %v8550_v11 = vpop.f32.mrf.mxu1  ;;  %5459 = vmatprep.subr.bf16.mxu1 %v12502_v2  ;;  %4995 = vmatprep.mubr.bf16.mxu1 %v7614_v4  ;;  %v2775_v44 = vld [vmem:[%s12482_s4 + $0x3a8] sm:$0xff] }
 0x1eb   :  { %v2463_v7 = vadd.f32 %v8550_v11, %v9495_v16  ;;  %v7622_v16 = vcombine.high %v2763_v5, %v2767_v47  ;;  %v2590_v57 = vmax.f32 %v2452_v49, 0.0  ;;  %v2588_v11 = vmax.f32 %v2444_v12, 0.0  ;;  %v12527_v49 = vld [vmem:[#allocation11_spill] sm:$0xff]  ;;  %v2779_v25 = vld [vmem:[%s12482_s4 + $0x3c8] sm:$0xff] }
 0x1ec   :  { %v2454_v39 = vpop.f32.mrf.mxu1  ;;  %v7630_v10 = vcombine.high %v2771_v32, %v2775_v44  ;;  %v2783_v12 = vld [vmem:[%s12482_s4 + $0x3e8] sm:$0xff]  ;;  %v7629_v31 = vcombine.low %v2771_v32, %v2775_v44 }
 0x1ed   :  { %v2593_v26 = vmax.f32 %v2463_v7, 0.0  ;;  %v2455_v9 = vadd.f32 %v2454_v39, %v9511_v22  ;;  %5460 = vmatpush1.bf16.msra.mxu1 %v2642_v56  ;;  %v2838_v22 = vld [vmem:[%s12482_s4 + $0x5a0] sm:$0xff]  ;;  %v7683_v56 = vcombine.low %v2826_v34, %v2830_v30  ;;  %v12524_v7 = vld [vmem:[#allocation14_spill] sm:$0xff]  ;;  %v2587_v34 = vmax.f32 %v2439_v18, 0.0 }
 0x1ee   :  { %5461 = vmatprep.subr.bf16.mxu1 %v12502_v2  ;;  %v2436_v39 = vadd.f32 %v10601_v55, %v12524_v7  ;;  %v12528_v30 = vld [vmem:[#allocation9_spill] sm:$0xff]  ;;  %v7638_v7 = vcombine.high %v2779_v25, %v2783_v12 }
 0x1ef   :  { %v2657_v52 = vpack.c.bf16 %v2593_v26, %v2592_v13  ;;  %v2591_v17 = vmax.f32 %v2455_v9, 0.0  ;;  %v10673_v13 = vpop.permute.xlu0 %3180  ;;  %v2431_v26 = vadd.f32 %v10579_v45, %v12527_v49  ;;  %v2655_v9 = vpack.c.bf16 %v2589_v60, %v2588_v11  ;;  %v2846_v45 = vld [vmem:[%s12482_s4 + $0x5e0] sm:$0xff] }
 0x1f0   :  { %4771 = vmatmul.mubr.bf16.gmra.mxu0 %v7675_v35  ;;  %4996 = vmatmul.mubr.bf16.gmra.mxu1 %v7613_v36  ;;  %v7692_v35 = vcombine.high %v2834_v63, %v2838_v22  ;;  %v8403_v36 = vpop.f32.mrf.mxu0  ;;  %12526 = vst [vmem:[#allocation15_spill] sm:$0xff] %v10673_v13  ;;  %v2428_v55 = vadd.f32 %v10560_v14, %v12528_v30  ;;  %v2586_v5 = vmax.f32 %v2436_v39, 0.0 }
 0x1f1   :  { %5462 = vmatpush2.bf16.msra.mxu1 %v2657_v52  ;;  %4778 = vmatprep.mubr.bf16.mxu0 %v7684_v6  ;;  %v2656_v4 = vpack.c.bf16 %v2591_v17, %v2590_v57  ;;  %v10670_v6 = vpop.permute.xlu1 %3265  ;;  %v2585_v27 = vmax.f32 %v2431_v26, 0.0  ;;  %v12529_v52 = vld [vmem:[#allocation12_spill] sm:$0xff]  ;;  %v7691_v60 = vcombine.low %v2834_v63, %v2838_v22  ;;  %v2412_v39 = vadd.f32 %v10512_v40, %v8403_v36 }
 0x1f2   :  { %5463 = vmatprep.subr.bf16.mxu1 %v12502_v2  ;;  %5003 = vmatprep.mubr.bf16.mxu1 %v7622_v16  ;;  %12525 = vst [vmem:[#allocation13_spill] sm:$0xff] %v10670_v6  ;;  %v1327_v47 = vpop.f32.mrf.mxu0  ;;  %v2842_v16 = vld [vmem:[%s12482_s4 + $0x5c0] sm:$0xff]  ;;  %v2423_v17 = vadd.f32 %v10590_v0, %v12529_v52  ;;  %v2654_v14 = vpack.c.bf16 %v2587_v34, %v2586_v5  ;;  %v2791_v34 = vld [vmem:[%s12482_s4 + $0x428] sm:$0xff] }
 0x1f3   :  { %v10696_v18 = vpop.permute.xlu0 %3090  ;;  %v7700_v0 = vcombine.high %v2842_v16, %v2846_v45  ;;  %v2580_v40 = vmax.f32 %v2412_v39, 0.0  ;;  %v2854_v26 = vld [vmem:[%s12482_s4 + $0x620] sm:$0xff]  ;;  %v7699_v5 = vcombine.low %v2842_v16, %v2846_v45 }
 0x1f4   :  { %v8404_v11 = vpop.f32.mrf.mxu0  ;;  %v2583_v49 = vmax.f32 %v2423_v17, 0.0  ;;  %v2858_v16 = vld [vmem:[%s12482_s4 + $0x640] sm:$0xff] }
 0x1f5   :  { %5464 = vmatpush2.bf16.msra.mxu1 %v2656_v4  ;;  %v10694_v57 = vpop.permute.xlu1 %3185  ;;  %v2584_v4 = vmax.f32 %v2428_v55, 0.0 }
 0x1f6   :  { %5465 = vmatprep.subr.bf16.mxu1 %v12502_v2  ;;  %12530 = vst [vmem:[#allocation14_spill] sm:$0xff] %v10694_v57  ;;  %v1330_v22 = vpop.f32.mrf.mxu0 }
 0x1f7   :  { %v2407_v36 = vadd.f32 %v10553_v29, %v1330_v22  ;;  %v10720_v30 = vpop.permute.xlu0 %3010 }
 0x1f8   :  { %4779 = vmatmul.mubr.bf16.gmra.mxu0 %v7683_v56  ;;  %5004 = vmatmul.mubr.bf16.gmra.mxu1 %v7621_v62  ;;  %v12531_v56 = vld [vmem:[#allocation10_spill] sm:$0xff] }
 0x1f9   :  { %5466 = vmatpush2.bf16.msra.mxu1 %v2655_v9  ;;  %4786 = vmatprep.mubr.bf16.mxu0 %v7692_v35  ;;  %v2420_v62 = vadd.f32 %v10565_v21, %v12531_v56  ;;  %v2415_v35 = vadd.f32 %v10534_v19, %v8404_v11  ;;  %v2850_v21 = vld [vmem:[%s12482_s4 + $0x600] sm:$0xff]  ;;  %v10706_v32 = vpop.permute.xlu1 %3095  ;;  %v2404_v19 = vadd.f32 %v10521_v61, %v1327_v47  ;;  %v2787_v9 = vld [vmem:[%s12482_s4 + $0x408] sm:$0xff]  ;;  %v2579_v17 = vmax.f32 %v2407_v36, 0.0 }
 0x1fa   :  { %5467 = vmatprep.subr.bf16.mxu1 %v12502_v2  ;;  %5011 = vmatprep.mubr.bf16.mxu1 %v7630_v10  ;;  %v2653_v10 = vpack.c.bf16 %v2585_v27, %v2584_v4  ;;  %v7637_v61 = vcombine.low %v2779_v25, %v2783_v12  ;;  %v7708_v47 = vcombine.high %v2850_v21, %v2854_v26  ;;  %v2862_v25 = vld [vmem:[%s12482_s4 + $0x660] sm:$0xff]  ;;  %v2795_v12 = vld [vmem:[%s12482_s4 + $0x448] sm:$0xff] }
 0x1fb   :  { %v2582_v63 = vmax.f32 %v2420_v62, 0.0  ;;  %v2581_v44 = vmax.f32 %v2415_v35, 0.0  ;;  %v7646_v29 = vcombine.high %v2787_v9, %v2791_v34  ;;  %v2578_v27 = vmax.f32 %v2404_v19, 0.0  ;;  %v2866_v35 = vld [vmem:[%s12482_s4 + $0x680] sm:$0xff] }
 0x1fc   :  { %v7707_v4 = vcombine.low %v2850_v21, %v2854_v26  ;;  %v7645_v56 = vcombine.low %v2787_v9, %v2791_v34  ;;  %v7716_v62 = vcombine.high %v2858_v16, %v2862_v25 }
 0x1fd   :  { %5468 = vmatpush2.bf16.msra.mxu1 %v2654_v14  ;;  %v2652_v55 = vpack.c.bf16 %v2583_v49, %v2582_v63  ;;  %v2651_v52 = vpack.c.bf16 %v2581_v44, %v2580_v40  ;;  %v10723_v14 = vpop.permute.xlu1 %3015  ;;  %v2650_v45 = vpack.c.bf16 %v2579_v17, %v2578_v27  ;;  %v2803_v49 = vld [vmem:[%s12482_s4 + $0x488] sm:$0xff]  ;;  %v7715_v40 = vcombine.low %v2858_v16, %v2862_v25 }
 0x1fe   :  { %5469 = vmatprep.subr.bf16.mxu1 %v12502_v2  ;;  %v2807_v63 = vld [vmem:[%s12482_s4 + $0x4a8] sm:$0xff] }
 0x1ff   :  { %v7662_v26 = vcombine.high %v2803_v49, %v2807_v63  ;;  %v2815_v27 = vld [vmem:[%s12482_s4 + $0x4e8] sm:$0xff] }
 0x200   :  { %4787 = vmatmul.mubr.bf16.gmra.mxu0 %v7691_v60  ;;  %5012 = vmatmul.mubr.bf16.gmra.mxu1 %v7629_v31  ;;  %v10725_v60 = vpop.permute.xlu0 %3250  ;;  %v2799_v31 = vld [vmem:[%s12482_s4 + $0x468] sm:$0xff] }
 0x201   :  { %5470 = vmatpush2.bf16.msra.mxu1 %v2653_v10  ;;  %4794 = vmatprep.mubr.bf16.mxu0 %v7700_v0  ;;  %12532 = vst [vmem:[#allocation11_spill] sm:$0xff] %v10725_v60  ;;  %v7654_v0 = vcombine.high %v2795_v12, %v2799_v31  ;;  %v10740_v11 = vpop.permute.xlu1 %3255  ;;  %v2870_v10 = vld [vmem:[%s12482_s4 + $0x6a0] sm:$0xff]  ;;  %v7653_v19 = vcombine.low %v2795_v12, %v2799_v31 }
 0x202   :  { %5471 = vmatprep.subr.bf16.mxu1 %v12502_v2  ;;  %5019 = vmatprep.mubr.bf16.mxu1 %v7638_v7  ;;  %12533 = vst [vmem:[#allocation9_spill] sm:$0xff] %v10740_v11  ;;  %v7724_v36 = vcombine.high %v2866_v35, %v2870_v10  ;;  %v7723_v16 = vcombine.low %v2866_v35, %v2870_v10  ;;  %v2886_v35 = vld [vmem:[%s12482_s4 + $0x720] sm:$0xff]  ;;  %v2819_v10 = vld [vmem:[%s12482_s4 + $0x508] sm:$0xff] }
 0x204   :  { %v10742_v7 = vpop.permute.xlu0 %3170 }
 0x205   :  { %5472 = vmatpush2.bf16.msra.mxu1 %v2652_v55  ;;  %12534 = vst [vmem:[#allocation12_spill] sm:$0xff] %v10742_v7  ;;  %v10758_v22 = vpop.permute.xlu1 %3175  ;;  %v2874_v55 = vld [vmem:[%s12482_s4 + $0x6c0] sm:$0xff] }
 0x206   :  { %5473 = vmatprep.subr.bf16.mxu1 %v12502_v2  ;;  %12535 = vst [vmem:[#allocation10_spill] sm:$0xff] %v10758_v22 }
 0x208   :  { %4795 = vmatmul.mubr.bf16.gmra.mxu0 %v7699_v5  ;;  %5020 = vmatmul.mubr.bf16.gmra.mxu1 %v7637_v61  ;;  %v10762_v44 = vpop.permute.xlu0 %3080 }
 0x209   :  { %4802 = vmatprep.mubr.bf16.mxu0 %v7708_v47  ;;  %5027 = vmatprep.mubr.bf16.mxu1 %v7646_v29  ;;  %v10769_v5 = vpop.permute.xlu1 %3085  ;;  %v2878_v47 = vld [vmem:[%s12482_s4 + $0x6e0] sm:$0xff]  ;;  %v2811_v29 = vld [vmem:[%s12482_s4 + $0x4c8] sm:$0xff] }
 0x20a   :  { %5474 = vmatpush2.bf16.msra.mxu1 %v2651_v52  ;;  %v7732_v25 = vcombine.high %v2874_v55, %v2878_v47  ;;  %v7670_v12 = vcombine.high %v2811_v29, %v2815_v27 }
 0x20b   :  { %5475 = vmatprep.subr.bf16.mxu1 %v12502_v2 }
 0x20c   :  { %v10780_v52 = vpop.permute.xlu0 %3000 }
 0x20e   :  { %5476 = vmatpush2.bf16.msra.mxu1 %v2650_v45  ;;  %v7661_v45 = vcombine.low %v2803_v49, %v2807_v63  ;;  %v2823_v49 = vld [vmem:[%s12482_s4 + $0x528] sm:$0xff] }
 0x210   :  { %v10744_v39 = vpop.f32.mrf.mxu0  ;;  %4803 = vmatmul.mubr.bf16.gmra.mxu0 %v7707_v4  ;;  %5028 = vmatmul.mubr.bf16.gmra.mxu1 %v7645_v56  ;;  %v10784_v4 = vpop.permute.xlu1 %3005 }
 0x211   :  { %4810 = vmatprep.mubr.bf16.mxu0 %v7716_v62  ;;  %5035 = vmatprep.mubr.bf16.mxu1 %v7654_v0  ;;  %v10788_v62 = vpop.permute.xlu0 %3240  ;;  %v2882_v0 = vld [vmem:[%s12482_s4 + $0x700] sm:$0xff] }
 0x212   :  { %v4614_v2 = vpop.f32.mrf.mxu0  ;;  %12536 = vst [vmem:[#allocation33_spill] sm:$0xff] %v10788_v62 }
 0x214   :  { %v10760_v21 = vpop.f32.mrf.mxu0 }
 0x216   :  { %v4617_v9 = vpop.f32.mrf.mxu0 }
 0x217   :  { %v10804_v9 = vpop.permute.xlu1 %3245 }
 0x218   :  { %v10764_v34 = vpop.f32.mrf.mxu0  ;;  %4811 = vmatmul.mubr.bf16.gmra.mxu0 %v7715_v40  ;;  %5036 = vmatmul.mubr.bf16.gmra.mxu1 %v7653_v19  ;;  %v7731_v40 = vcombine.low %v2874_v55, %v2878_v47  ;;  %v7669_v19 = vcombine.low %v2811_v29, %v2815_v27  ;;  %12537 = vst [vmem:[#allocation34_spill] sm:$0xff] %v10804_v9  ;;  %v2894_v55 = vld [vmem:[%s12482_s4 + $0x760] sm:$0xff]  ;;  %v2827_v47 = vld [vmem:[%s12482_s4 + $0x548] sm:$0xff] }
 0x219   :  { %4818 = vmatprep.mubr.bf16.mxu0 %v7724_v36  ;;  %5043 = vmatprep.mubr.bf16.mxu1 %v7662_v26  ;;  %v7740_v36 = vcombine.high %v2882_v0, %v2886_v35  ;;  %v7678_v26 = vcombine.high %v2819_v10, %v2823_v49  ;;  %v2831_v29 = vld [vmem:[%s12482_s4 + $0x568] sm:$0xff]  ;;  %v2906_v9 = vld [vmem:[%s12482_s4 + $0x7c0] sm:$0xff] }
 0x21a   :  { %v4622_v61 = vpop.f32.mrf.mxu0 }
 0x21b   :  { %v10822_v27 = vpop.permute.xlu1 %3165 }
 0x21c   :  { %v10782_v17 = vpop.f32.mrf.mxu0  ;;  %12539 = vst [vmem:[#allocation36_spill] sm:$0xff] %v10822_v27 }
 0x21e   :  { %v4625_v31 = vpop.f32.mrf.mxu0 }
 0x21f   :  { %v10830_v8 = vpop.permute.xlu1 %3075 }
 0x220   :  { %v10786_v56 = vpop.f32.mrf.mxu0  ;;  %4819 = vmatmul.mubr.bf16.gmra.mxu0 %v7723_v16  ;;  %5044 = vmatmul.mubr.bf16.gmra.mxu1 %v7661_v45  ;;  %v10806_v16 = vpop.permute.xlu0 %3160 }
 0x221   :  { %4826 = vmatprep.mubr.bf16.mxu0 %v7732_v25  ;;  %5051 = vmatprep.mubr.bf16.mxu1 %v7670_v12  ;;  %12538 = vst [vmem:[#allocation35_spill] sm:$0xff] %v10806_v16  ;;  %v2890_v25 = vld [vmem:[%s12482_s4 + $0x740] sm:$0xff] }
 0x222   :  { %v4630_v2 = vpop.f32.mrf.mxu0 }
 0x223   :  { %v7739_v2 = vcombine.low %v2882_v0, %v2886_v35  ;;  %v2902_v35 = vld [vmem:[%s12482_s4 + $0x7a0] sm:$0xff]  ;;  %v10848_v59 = vpop.permute.xlu1 %2995 }
 0x224   :  { %v10802_v63 = vpop.f32.mrf.mxu0 }
 0x226   :  { %v4633_v61 = vpop.f32.mrf.mxu0 }
 0x228   :  { %v10808_v45 = vpop.f32.mrf.mxu0  ;;  %4827 = vmatmul.mubr.bf16.gmra.mxu0 %v7731_v40  ;;  %5052 = vmatmul.mubr.bf16.gmra.mxu1 %v7669_v19  ;;  %v7677_v40 = vcombine.low %v2819_v10, %v2823_v49  ;;  %v10826_v19 = vpop.permute.xlu0 %3070  ;;  %v2835_v10 = vld [vmem:[%s12482_s4 + $0x588] sm:$0xff] }
 0x229   :  { %4834 = vmatprep.mubr.bf16.mxu0 %v7740_v36  ;;  %5059 = vmatprep.mubr.bf16.mxu1 %v7678_v26  ;;  %v7748_v36 = vcombine.high %v2890_v25, %v2894_v55  ;;  %v7686_v26 = vcombine.high %v2827_v47, %v2831_v29  ;;  %v2839_v49 = vld [vmem:[%s12482_s4 + $0x5a8] sm:$0xff] }
 0x22a   :  { %v4638_v12 = vpop.f32.mrf.mxu0 }
 0x22c   :  { %v10824_v31 = vpop.f32.mrf.mxu0  ;;  %v10835_v0 = vpop.permute.xlu0 %2990 }
 0x22e   :  { %v4641_v61 = vpop.f32.mrf.mxu0 }
 0x230   :  { %v10828_v12 = vpop.f32.mrf.mxu0  ;;  %4835 = vmatmul.mubr.bf16.gmra.mxu0 %v7739_v2  ;;  %5060 = vmatmul.mubr.bf16.gmra.mxu1 %v7677_v40  ;;  %v7747_v40 = vcombine.low %v2890_v25, %v2894_v55  ;;  %v10852_v60 = vpop.permute.xlu0 %3230  ;;  %v2910_v25 = vld [vmem:[%s12482_s4 + $0x7e0] sm:$0xff]  ;;  %v2843_v55 = vld [vmem:[%s12482_s4 + $0x5c8] sm:$0xff] }
 0x231   :  { %4842 = vmatprep.mubr.bf16.mxu0 %v7748_v36  ;;  %5067 = vmatprep.mubr.bf16.mxu1 %v7686_v26  ;;  %v7685_v36 = vcombine.low %v2827_v47, %v2831_v29  ;;  %v7756_v26 = vcombine.high %v2898_v51, %v2902_v35  ;;  %12540 = vst [vmem:[#allocation37_spill] sm:$0xff] %v10852_v60  ;;  %v2847_v47 = vld [vmem:[%s12482_s4 + $0x5e8] sm:$0xff] }
 0x232   :  { %v4646_v6 = vpop.f32.mrf.mxu0 }
 0x233   :  { %v7694_v6 = vcombine.high %v2835_v10, %v2839_v49 }
 0x234   :  { %v10846_v2 = vpop.f32.mrf.mxu0  ;;  %v10870_v60 = vpop.permute.xlu0 %3150 }
 0x235   :  { %12542 = vst [vmem:[#allocation39_spill] sm:$0xff] %v10870_v60 }
 0x236   :  { %v4649_v61 = vpop.f32.mrf.mxu0 }
 0x238   :  { %v10850_v11 = vpop.f32.mrf.mxu0  ;;  %4843 = vmatmul.mubr.bf16.gmra.mxu0 %v7747_v40  ;;  %5068 = vmatmul.mubr.bf16.gmra.mxu1 %v7685_v36  ;;  %v7755_v40 = vcombine.low %v2898_v51, %v2902_v35  ;;  %v7693_v36 = vcombine.low %v2835_v10, %v2839_v49  ;;  %v2855_v51 = vld [vmem:[%s12482_s4 + $0x628] sm:$0xff]  ;;  %v2660_v35 = vld [vmem:[%s12482_s4 + $0x10] sm:$0xff] }
 0x239   :  { %4850 = vmatprep.mubr.bf16.mxu0 %v7756_v26  ;;  %5075 = vmatprep.mubr.bf16.mxu1 %v7694_v6  ;;  %v10868_v26 = vpop.permute.xlu1 %3235  ;;  %v7764_v6 = vcombine.high %v2906_v9, %v2910_v25  ;;  %v2664_v10 = vld [vmem:[%s12482_s4 + $0x30] sm:$0xff] }
 0x23a   :  { %v4654_v62 = vpop.f32.mrf.mxu0  ;;  %12541 = vst [vmem:[#allocation38_spill] sm:$0xff] %v10868_v26 }
 0x23b   :  { %v7702_v62 = vcombine.high %v2843_v55, %v2847_v47 }
 0x23c   :  { %v10866_v29 = vpop.f32.mrf.mxu0 }
 0x23d   :  { %v10886_v49 = vpop.permute.xlu1 %3155 }
 0x23e   :  { %v4657_v61 = vpop.f32.mrf.mxu0  ;;  %12543 = vst [vmem:[#allocation40_spill] sm:$0xff] %v10886_v49 }
 0x23f   :  { %v7520_v61 = vcombine.high %v2660_v35, %v2664_v10 }
 0x240   :  { %v10872_v24 = vpop.f32.mrf.mxu0  ;;  %4851 = vmatmul.mubr.bf16.gmra.mxu0 %v7755_v40  ;;  %5076 = vmatmul.mubr.bf16.gmra.mxu1 %v7693_v36  ;;  %v7763_v36 = vcombine.low %v2906_v9, %v2910_v25  ;;  %v2863_v25 = vld [vmem:[%s12482_s4 + $0x668] sm:$0xff] }
 0x241   :  { %4858 = vmatprep.mubr.bf16.mxu0 %v7764_v6  ;;  %5083 = vmatprep.mubr.bf16.mxu1 %v7702_v62  ;;  %v7701_v6 = vcombine.low %v2843_v55, %v2847_v47  ;;  %v10890_v62 = vpop.permute.xlu0 %3060  ;;  %v10894_v54 = vpop.permute.xlu1 %3065  ;;  %v2668_v55 = vld [vmem:[%s12482_s4 + $0x50] sm:$0xff] }
 0x242   :  { %v4662_v42 = vpop.f32.mrf.mxu0  ;;  %v2672_v47 = vld [vmem:[%s12482_s4 + $0x70] sm:$0xff] }
 0x243   :  { %v7710_v42 = vcombine.high %v2851_v15, %v2855_v51 }
 0x244   :  { %v10888_v40 = vpop.f32.mrf.mxu0 }
 0x245   :  { %v2981_v9 = vpop.permute.xlu0 %2980  ;;  %v2986_v22 = vpop.permute.xlu1 %2985 }
 0x246   :  { %v4665_v26 = vpop.f32.mrf.mxu0 }
 0x248   :  { %v10892_v53 = vpop.f32.mrf.mxu0  ;;  %4859 = vmatmul.mubr.bf16.gmra.mxu0 %v7763_v36  ;;  %5084 = vmatmul.mubr.bf16.gmra.mxu1 %v7701_v6  ;;  %v7709_v36 = vcombine.low %v2851_v15, %v2855_v51  ;;  %v7519_v6 = vcombine.low %v2660_v35, %v2664_v10  ;;  %v2867_v15 = vld [vmem:[%s12482_s4 + $0x688] sm:$0xff]  ;;  %v4616_v10 = vadd.f32 %v10760_v21, %v2986_v22 }
 0x249   :  { %5091 = vmatprep.mubr.bf16.mxu1 %v7710_v42  ;;  %5188 = vmatprep.mubr.bf16.mxu0 %v7520_v61  ;;  %v4613_v42 = vadd.f32 %v10744_v39, %v2981_v9  ;;  %v7528_v61 = vcombine.high %v2668_v55, %v2672_v47  ;;  %v2676_v39 = vld [vmem:[%s12482_s4 + $0x90] sm:$0xff] }
 0x24a   :  { %v4670_v57 = vpop.f32.mrf.mxu0 }
 0x24b   :  { %v7718_v57 = vcombine.high %v2859_v46, %v2863_v25 }
 0x24c   :  { %v10908_v26 = vpop.f32.mrf.mxu0 }
 0x24e   :  { %v4673_v13 = vpop.f32.mrf.mxu0 }
 0x24f   :  { %v2871_v13 = vld [vmem:[%s12482_s4 + $0x6a8] sm:$0xff] }
 0x250   :  { %v10911_v7 = vpop.f32.mrf.mxu0  ;;  %v4901_v27 = vpop.f32.mrf.mxu1  ;;  %5092 = vmatmul.mubr.bf16.gmra.mxu1 %v7709_v36  ;;  %5189 = vmatmul.mubr.bf16.vlgmr.msra.gmra.mxu0 %v7519_v6  ;;  %v7717_v6 = vcombine.low %v2859_v46, %v2863_v25  ;;  %v2875_v46 = vld [vmem:[%s12482_s4 + $0x6c8] sm:$0xff] }
 0x251   :  { %v10913_v16 = vadd.f32 %v4901_v27, %v4613_v42  ;;  %5099 = vmatprep.mubr.bf16.mxu1 %v7718_v57  ;;  %5196 = vmatprep.mubr.bf16.mxu0 %v7528_v61  ;;  %v2680_v27 = vld [vmem:[%s12482_s4 + $0xb0] sm:$0xff]  ;;  %v7527_v42 = vcombine.low %v2668_v55, %v2672_v47  ;;  %v4621_v57 = vadd.f32 %v10764_v34, %v10835_v0 }
 0x252   :  { %v4678_v51 = vpop.f32.mrf.mxu0  ;;  %v4903_v35 = vpop.f32.mrf.mxu1  ;;  %v2684_v0 = vld [vmem:[%s12482_s4 + $0xd0] sm:$0xff]  ;;  %v7725_v47 = vcombine.low %v2867_v15, %v2871_v13 }
 0x253   :  { %12544 = vst [vmem:[#allocation41_spill] sm:$0xff] %v10913_v16  ;;  %v7726_v51 = vcombine.high %v2867_v15, %v2871_v13  ;;  %v7536_v35 = vcombine.high %v2676_v39, %v2680_v27  ;;  %v2887_v15 = vld [vmem:[%s12482_s4 + $0x728] sm:$0xff]  ;;  %v2692_v13 = vld [vmem:[%s12482_s4 + $0x110] sm:$0xff] }
 0x254   :  { %v10928_v9 = vpop.f32.mrf.mxu0  ;;  %v4904_v36 = vpop.f32.mrf.mxu1 }
 0x255   :  { %v10932_v61 = vadd.f32 %v4904_v36, %v4616_v10  ;;  %v7535_v10 = vcombine.low %v2676_v39, %v2680_v27  ;;  %v4629_v36 = vadd.f32 %v10786_v56, %v10780_v52  ;;  %v2696_v39 = vld [vmem:[%s12482_s4 + $0x130] sm:$0xff]  ;;  %v4632_v27 = vadd.f32 %v10802_v63, %v10784_v4  ;;  %v2891_v63 = vld [vmem:[%s12482_s4 + $0x748] sm:$0xff] }
 0x256   :  { %v4681_v16 = vpop.f32.mrf.mxu0  ;;  %v4906_v49 = vpop.f32.mrf.mxu1 }
 0x257   :  { %v2879_v16 = vld [vmem:[%s12482_s4 + $0x6e8] sm:$0xff]  ;;  %v4624_v49 = vadd.f32 %v10782_v17, %v10848_v59 }
 0x258   :  { %v10934_v60 = vpop.f32.mrf.mxu0  ;;  %v4909_v41 = vpop.f32.mrf.mxu1  ;;  %5100 = vmatmul.mubr.bf16.gmra.mxu1 %v7717_v6  ;;  %5197 = vmatmul.mubr.bf16.gmra.mxu0 %v7527_v42  ;;  %v7734_v42 = vcombine.high %v2875_v46, %v2879_v16  ;;  %v2883_v17 = vld [vmem:[%s12482_s4 + $0x708] sm:$0xff] }
 0x259   :  { %v10936_v22 = vadd.f32 %v4909_v41, %v4621_v57  ;;  %5107 = vmatprep.mubr.bf16.mxu1 %v7726_v51  ;;  %5204 = vmatprep.mubr.bf16.mxu0 %v7536_v35  ;;  %v2688_v41 = vld [vmem:[%s12482_s4 + $0xf0] sm:$0xff] }
 0x25a   :  { %v4686_v21 = vpop.f32.mrf.mxu0  ;;  %v4911_v34 = vpop.f32.mrf.mxu1  ;;  %v7544_v57 = vcombine.high %v2684_v0, %v2688_v41 }
 0x25c   :  { %v10952_v25 = vpop.f32.mrf.mxu0  ;;  %v4912_v55 = vpop.f32.mrf.mxu1 }
 0x25d   :  { %v10956_v6 = vadd.f32 %v4912_v55, %v4624_v49 }
 0x25e   :  { %v4689_v51 = vpop.f32.mrf.mxu0  ;;  %v4914_v35 = vpop.f32.mrf.mxu1 }
 0x25f   :  { %v7552_v51 = vcombine.high %v2692_v13, %v2696_v39 }
 0x260   :  { %v10958_v21 = vpop.f32.mrf.mxu0  ;;  %v4917_v34 = vpop.f32.mrf.mxu1  ;;  %5108 = vmatmul.mubr.bf16.gmra.mxu1 %v7725_v47  ;;  %5205 = vmatmul.mubr.bf16.gmra.mxu0 %v7535_v10  ;;  %v7733_v47 = vcombine.low %v2875_v46, %v2879_v16  ;;  %v7543_v10 = vcombine.low %v2684_v0, %v2688_v41  ;;  %v2895_v46 = vld [vmem:[%s12482_s4 + $0x768] sm:$0xff]  ;;  %v2700_v16 = vld [vmem:[%s12482_s4 + $0x150] sm:$0xff]  ;;  %v4640_v41 = vadd.f32 %v10824_v31, %v10723_v14 }
 0x261   :  { %v10960_v59 = vadd.f32 %v4917_v34, %v4629_v36  ;;  %5115 = vmatprep.mubr.bf16.mxu1 %v7734_v42  ;;  %5212 = vmatprep.mubr.bf16.mxu0 %v7544_v57  ;;  %v4637_v36 = vadd.f32 %v10808_v45, %v10720_v30  ;;  %v7742_v57 = vcombine.high %v2883_v17, %v2887_v15  ;;  %v2704_v0 = vld [vmem:[%s12482_s4 + $0x170] sm:$0xff]  ;;  %v2899_v31 = vld [vmem:[%s12482_s4 + $0x788] sm:$0xff] }
 0x262   :  { %v4694_v52 = vpop.f32.mrf.mxu0  ;;  %v4919_v56 = vpop.f32.mrf.mxu1 }
 0x264   :  { %v10976_v49 = vpop.f32.mrf.mxu0  ;;  %v4920_v55 = vpop.f32.mrf.mxu1 }
 0x265   :  { %v10980_v42 = vadd.f32 %v4920_v55, %v4632_v27 }
 0x266   :  { %v4697_v35 = vpop.f32.mrf.mxu0  ;;  %v4922_v34 = vpop.f32.mrf.mxu1 }
 0x267   :  { %v7560_v35 = vcombine.high %v2700_v16, %v2704_v0 }
 0x268   :  { %v10982_v52 = vpop.f32.mrf.mxu0  ;;  %v4925_v56 = vpop.f32.mrf.mxu1  ;;  %5116 = vmatmul.mubr.bf16.gmra.mxu1 %v7733_v47  ;;  %5213 = vmatmul.mubr.bf16.gmra.mxu0 %v7543_v10  ;;  %v7741_v47 = vcombine.low %v2883_v17, %v2887_v15  ;;  %v7551_v10 = vcombine.low %v2692_v13, %v2696_v39  ;;  %v2903_v17 = vld [vmem:[%s12482_s4 + $0x7a8] sm:$0xff]  ;;  %v2708_v15 = vld [vmem:[%s12482_s4 + $0x190] sm:$0xff]  ;;  %v4648_v39 = vadd.f32 %v10846_v2, %v10648_v48 }
 0x269   :  { %v10984_v4 = vadd.f32 %v4925_v56, %v4637_v36  ;;  %5123 = vmatprep.mubr.bf16.mxu1 %v7742_v57  ;;  %5220 = vmatprep.mubr.bf16.mxu0 %v7552_v51  ;;  %v4645_v36 = vadd.f32 %v10828_v12, %v10635_v28  ;;  %v7750_v51 = vcombine.high %v2891_v63, %v2895_v46  ;;  %v2712_v13 = vld [vmem:[%s12482_s4 + $0x1b0] sm:$0xff]  ;;  %v2907_v2 = vld [vmem:[%s12482_s4 + $0x7c8] sm:$0xff] }
 0x26a   :  { %v4702_v30 = vpop.f32.mrf.mxu0  ;;  %v4927_v45 = vpop.f32.mrf.mxu1 }
 0x26c   :  { %v11000_v27 = vpop.f32.mrf.mxu0  ;;  %v4928_v55 = vpop.f32.mrf.mxu1 }
 0x26d   :  { %v11004_v57 = vadd.f32 %v4928_v55, %v4640_v41 }
 0x26e   :  { %v4705_v34 = vpop.f32.mrf.mxu0  ;;  %v4930_v56 = vpop.f32.mrf.mxu1 }
 0x26f   :  { %v7568_v34 = vcombine.high %v2708_v15, %v2712_v13 }
 0x270   :  { %v11006_v30 = vpop.f32.mrf.mxu0  ;;  %v4933_v45 = vpop.f32.mrf.mxu1  ;;  %5124 = vmatmul.mubr.bf16.gmra.mxu1 %v7741_v47  ;;  %5221 = vmatmul.mubr.bf16.gmra.mxu0 %v7551_v10  ;;  %v7749_v47 = vcombine.low %v2891_v63, %v2895_v46  ;;  %v7559_v10 = vcombine.low %v2700_v16, %v2704_v0  ;;  %v2911_v63 = vld [vmem:[%s12482_s4 + $0x7e8] sm:$0xff]  ;;  %v2716_v46 = vld [vmem:[%s12482_s4 + $0x1d0] sm:$0xff]  ;;  %v4656_v0 = vadd.f32 %v10866_v29, %v10563_v1 }
 0x271   :  { %v11008_v14 = vadd.f32 %v4933_v45, %v4645_v36  ;;  %5131 = vmatprep.mubr.bf16.mxu1 %v7750_v51  ;;  %5228 = vmatprep.mubr.bf16.mxu0 %v7560_v35  ;;  %v4653_v36 = vadd.f32 %v10850_v11, %v10537_v43  ;;  %v7758_v35 = vcombine.high %v2899_v31, %v2903_v17  ;;  %v2720_v16 = vld [vmem:[%s12482_s4 + $0x1f0] sm:$0xff] }
 0x272   :  { %v4710_v28 = vpop.f32.mrf.mxu0  ;;  %v4935_v12 = vpop.f32.mrf.mxu1  ;;  %v2724_v29 = vld [vmem:[%s12482_s4 + $0x210] sm:$0xff] }
 0x274   :  { %v11024_v41 = vpop.f32.mrf.mxu0  ;;  %v4936_v55 = vpop.f32.mrf.mxu1 }
 0x275   :  { %v11028_v51 = vadd.f32 %v4936_v55, %v4648_v39 }
 0x276   :  { %v4713_v56 = vpop.f32.mrf.mxu0  ;;  %v4938_v45 = vpop.f32.mrf.mxu1 }
 0x277   :  { %v7576_v56 = vcombine.high %v2716_v46, %v2720_v16 }
 0x278   :  { %v11030_v28 = vpop.f32.mrf.mxu0  ;;  %v4941_v12 = vpop.f32.mrf.mxu1  ;;  %5132 = vmatmul.mubr.bf16.gmra.mxu1 %v7749_v47  ;;  %5229 = vmatmul.mubr.bf16.gmra.mxu0 %v7559_v10  ;;  %v7757_v47 = vcombine.low %v2899_v31, %v2903_v17  ;;  %v7567_v10 = vcombine.low %v2708_v15, %v2712_v13  ;;  %v2728_v31 = vld [vmem:[%s12482_s4 + $0x230] sm:$0xff]  ;;  %v2661_v17 = vld [vmem:[%s12482_s4 + $0x18] sm:$0xff]  ;;  %v4664_v13 = vadd.f32 %v10888_v40, %v10452_v37 }
 0x279   :  { %v11032_v48 = vadd.f32 %v4941_v12, %v4653_v36  ;;  %5139 = vmatprep.mubr.bf16.mxu1 %v7758_v35  ;;  %5236 = vmatprep.mubr.bf16.mxu0 %v7568_v34  ;;  %v4661_v36 = vadd.f32 %v10872_v24, %v10423_v23  ;;  %v7766_v34 = vcombine.high %v2907_v2, %v2911_v63  ;;  %v2665_v15 = vld [vmem:[%s12482_s4 + $0x38] sm:$0xff]  ;;  %v5908_v40 = vld [vmem:[%s12485_s7 + $0x70] sm:$0xff] }
 0x27a   :  { %v4718_v43 = vpop.f32.mrf.mxu0  ;;  %v4943_v11 = vpop.f32.mrf.mxu1  ;;  %v5925_v37 = vld [vmem:[%s12485_s7 + $0xf8] sm:$0xff] }
 0x27b   :  { %6083 = vperm.xlu1 %8591, %v5925_v37   ;;  %v4677_v37 = vadd.f32 %v10911_v7, %v10890_v62  ;;  %v2740_v62 = vld [vmem:[%s12482_s4 + $0x290] sm:$0xff] }
 0x27c   :  { %v11048_v39 = vpop.f32.mrf.mxu0  ;;  %v4944_v55 = vpop.f32.mrf.mxu1 }
 0x27d   :  { %v11052_v35 = vadd.f32 %v4944_v55, %v4656_v0  ;;  %v5924_v0 = vld [vmem:[%s12485_s7 + $0xf0] sm:$0xff] }
 0x27e   :  { %v4721_v45 = vpop.f32.mrf.mxu0  ;;  %v4946_v12 = vpop.f32.mrf.mxu1  ;;  %6078 = vperm.xlu0 %8590, %v5924_v0   ;;  %v2673_v0 = vld [vmem:[%s12482_s4 + $0x78] sm:$0xff] }
 0x27f   :  { %v7584_v45 = vcombine.high %v2724_v29, %v2728_v31  ;;  %v7522_v12 = vcombine.high %v2661_v17, %v2665_v15 }
 0x280   :  { %v11054_v43 = vpop.f32.mrf.mxu0  ;;  %v4949_v11 = vpop.f32.mrf.mxu1  ;;  %5140 = vmatmul.mubr.bf16.gmra.mxu1 %v7757_v47  ;;  %5237 = vmatmul.mubr.bf16.gmra.mxu0 %v7567_v10  ;;  %v7765_v10 = vcombine.low %v2907_v2, %v2911_v63 }
 0x281   :  { %v11056_v1 = vadd.f32 %v4949_v11, %v4661_v36  ;;  %5147 = vmatprep.mubr.bf16.mxu1 %v7766_v34  ;;  %5244 = vmatprep.mubr.bf16.mxu0 %v7576_v56  ;;  %v7575_v36 = vcombine.low %v2716_v46, %v2720_v16  ;;  %v4669_v34 = vadd.f32 %v10892_v53, %v10294_v33  ;;  %v2732_v53 = vld [vmem:[%s12482_s4 + $0x250] sm:$0xff] }
 0x282   :  { %v4726_v24 = vpop.f32.mrf.mxu0  ;;  %v4951_v23 = vpop.f32.mrf.mxu1  ;;  %5998 = vperm.xlu0 %8590, %v5908_v40  }
 0x283   :  { %v2736_v23 = vld [vmem:[%s12482_s4 + $0x270] sm:$0xff] }
 0x284   :  { %v11075_v55 = vpop.f32.mrf.mxu0  ;;  %v4952_v47 = vpop.f32.mrf.mxu1 }
 0x285   :  { %v11079_v56 = vadd.f32 %v4952_v47, %v4664_v13  ;;  %v2669_v13 = vld [vmem:[%s12482_s4 + $0x58] sm:$0xff]  ;;  %v12545_v47 = vld [vmem:[#allocation18_spill] sm:$0xff] }
 0x286   :  { %v4729_v11 = vpop.f32.mrf.mxu0  ;;  %v4954_v24 = vpop.f32.mrf.mxu1 }
 0x287   :  { %v7583_v11 = vcombine.low %v2724_v29, %v2728_v31  ;;  %v7521_v24 = vcombine.low %v2661_v17, %v2665_v15  ;;  %v5906_v29 = vld [vmem:[%s12485_s7 + $0x60] sm:$0xff] }
 0x288   :  { %v11087_v2 = vpop.f32.mrf.mxu0  ;;  %v4957_v63 = vpop.f32.mrf.mxu1  ;;  %5148 = vmatmul.mubr.bf16.gmra.mxu1 %v7765_v10  ;;  %5245 = vmatmul.mubr.bf16.gmra.mxu0 %v7575_v36  ;;  %v4672_v10 = vadd.f32 %v10908_v26, %v12545_v47  ;;  %v5909_v36 = vld [vmem:[%s12485_s7 + $0x78] sm:$0xff]  ;;  %v7530_v26 = vcombine.high %v2669_v13, %v2673_v0  ;;  %v5923_v47 = vld [vmem:[%s12485_s7 + $0xe8] sm:$0xff] }
 0x289   :  { %v11089_v33 = vadd.f32 %v4957_v63, %v4669_v34  ;;  %5252 = vmatprep.mubr.bf16.mxu0 %v7584_v45  ;;  %5477 = vmatprep.mubr.bf16.mxu1 %v7522_v12  ;;  %v5922_v34 = vld [vmem:[%s12485_s7 + $0xe0] sm:$0xff]  ;;  %v7592_v63 = vcombine.high %v2732_v53, %v2736_v23 }
 0x28a   :  { %v4734_v46 = vpop.f32.mrf.mxu0  ;;  %v4959_v16 = vpop.f32.mrf.mxu1  ;;  %6003 = vperm.xlu1 %8591, %v5909_v36   ;;  %6068 = vperm.xlu0 %8590, %v5922_v34   ;;  %v2744_v36 = vld [vmem:[%s12482_s4 + $0x2b0] sm:$0xff]  ;;  %v2677_v34 = vld [vmem:[%s12482_s4 + $0x98] sm:$0xff] }
 0x28c   :  { %v11111_v45 = vpop.f32.mrf.mxu0  ;;  %v4960_v12 = vpop.f32.mrf.mxu1 }
 0x28d   :  { %v11115_v40 = vadd.f32 %v4960_v12, %v4672_v10  ;;  %v2681_v12 = vld [vmem:[%s12482_s4 + $0xb8] sm:$0xff] }
 0x28e   :  { %v4737_v46 = vpop.f32.mrf.mxu0  ;;  %v4962_v16 = vpop.f32.mrf.mxu1  ;;  %6073 = vperm.xlu1 %8591, %v5923_v47   ;;  %5988 = vperm.xlu0 %8590, %v5906_v29   ;;  %v4685_v47 = vadd.f32 %v10934_v60, %v10826_v19  ;;  %v2748_v19 = vld [vmem:[%s12482_s4 + $0x2d0] sm:$0xff] }
 0x28f   :  { %v7591_v46 = vcombine.low %v2732_v53, %v2736_v23  ;;  %v7529_v16 = vcombine.low %v2669_v13, %v2673_v0  ;;  %v5904_v53 = vld [vmem:[%s12485_s7 + $0x50] sm:$0xff] }
 0x290   :  { %v11123_v31 = vpop.f32.mrf.mxu0  ;;  %v4965_v17 = vpop.f32.mrf.mxu1  ;;  %5253 = vmatmul.mubr.bf16.gmra.mxu0 %v7583_v11  ;;  %5478 = vmatmul.mubr.bf16.vlgmr.msra.gmra.mxu1 %v7521_v24  ;;  %v4680_v11 = vadd.f32 %v10928_v9, %v10894_v54  ;;  %v5907_v24 = vld [vmem:[%s12485_s7 + $0x68] sm:$0xff]  ;;  %v7538_v54 = vcombine.high %v2677_v34, %v2681_v12 }
 0x291   :  { %v11125_v7 = vadd.f32 %v4965_v17, %v4677_v37  ;;  %5260 = vmatprep.mubr.bf16.mxu0 %v7592_v63  ;;  %5485 = vmatprep.mubr.bf16.mxu1 %v7530_v26  ;;  %v5920_v37 = vld [vmem:[%s12485_s7 + $0xd0] sm:$0xff]  ;;  %v7600_v17 = vcombine.high %v2740_v62, %v2744_v36 }
 0x292   :  { %v4742_v15 = vpop.f32.mrf.mxu0  ;;  %v4967_v10 = vpop.f32.mrf.mxu1  ;;  %5993 = vperm.xlu1 %8591, %v5907_v24   ;;  %6058 = vperm.xlu0 %8590, %v5920_v37   ;;  %v2752_v24 = vld [vmem:[%s12482_s4 + $0x2f0] sm:$0xff]  ;;  %v2685_v37 = vld [vmem:[%s12482_s4 + $0xd8] sm:$0xff] }
 0x293   :  { %v5921_v10 = vld [vmem:[%s12485_s7 + $0xd8] sm:$0xff] }
 0x294   :  { %v11147_v63 = vpop.f32.mrf.mxu0  ;;  %v4968_v26 = vpop.f32.mrf.mxu1 }
 0x295   :  { %v11151_v29 = vadd.f32 %v4968_v26, %v4680_v11  ;;  %v2689_v26 = vld [vmem:[%s12482_s4 + $0xf8] sm:$0xff] }
 0x296   :  { %v4745_v9 = vpop.f32.mrf.mxu0  ;;  %v4970_v15 = vpop.f32.mrf.mxu1  ;;  %6063 = vperm.xlu1 %8591, %v5921_v10   ;;  %5978 = vperm.xlu0 %8590, %v5904_v53   ;;  %v4693_v10 = vadd.f32 %v10958_v21, %v10762_v44  ;;  %v2756_v21 = vld [vmem:[%s12482_s4 + $0x310] sm:$0xff] }
 0x297   :  { %v7599_v9 = vcombine.low %v2740_v62, %v2744_v36  ;;  %v7537_v15 = vcombine.low %v2677_v34, %v2681_v12  ;;  %v5902_v62 = vld [vmem:[%s12485_s7 + $0x40] sm:$0xff] }
 0x298   :  { %v11159_v23 = vpop.f32.mrf.mxu0  ;;  %v4973_v13 = vpop.f32.mrf.mxu1  ;;  %5261 = vmatmul.mubr.bf16.gmra.mxu0 %v7591_v46  ;;  %5486 = vmatmul.mubr.bf16.gmra.mxu1 %v7529_v16  ;;  %v4688_v46 = vadd.f32 %v10952_v25, %v10830_v8  ;;  %v5905_v16 = vld [vmem:[%s12485_s7 + $0x58] sm:$0xff]  ;;  %v7546_v8 = vcombine.high %v2685_v37, %v2689_v26 }
 0x299   :  { %v11161_v60 = vadd.f32 %v4973_v13, %v4685_v47  ;;  %5268 = vmatprep.mubr.bf16.mxu0 %v7600_v17  ;;  %5493 = vmatprep.mubr.bf16.mxu1 %v7538_v54  ;;  %v5918_v47 = vld [vmem:[%s12485_s7 + $0xc0] sm:$0xff]  ;;  %v7608_v13 = vcombine.high %v2748_v19, %v2752_v24 }
 0x29a   :  { %v4750_v0 = vpop.f32.mrf.mxu0  ;;  %v4975_v11 = vpop.f32.mrf.mxu1  ;;  %5983 = vperm.xlu1 %8591, %v5905_v16   ;;  %6048 = vperm.xlu0 %8590, %v5918_v47   ;;  %v2760_v16 = vld [vmem:[%s12482_s4 + $0x330] sm:$0xff]  ;;  %v2693_v47 = vld [vmem:[%s12482_s4 + $0x118] sm:$0xff] }
 0x29b   :  { %v5919_v11 = vld [vmem:[%s12485_s7 + $0xc8] sm:$0xff] }
 0x29c   :  { %v11183_v17 = vpop.f32.mrf.mxu0  ;;  %v4976_v54 = vpop.f32.mrf.mxu1 }
 0x29d   :  { %v11187_v53 = vadd.f32 %v4976_v54, %v4688_v46  ;;  %v2697_v54 = vld [vmem:[%s12482_s4 + $0x138] sm:$0xff] }
 0x29e   :  { %v4753_v25 = vpop.f32.mrf.mxu0  ;;  %v4978_v0 = vpop.f32.mrf.mxu1  ;;  %6053 = vperm.xlu1 %8591, %v5919_v11   ;;  %5968 = vperm.xlu0 %8590, %v5902_v62   ;;  %v4701_v11 = vadd.f32 %v10982_v52, %v10696_v18  ;;  %v2764_v52 = vld [vmem:[%s12482_s4 + $0x350] sm:$0xff] }
 0x29f   :  { %v7607_v25 = vcombine.low %v2748_v19, %v2752_v24  ;;  %v7545_v0 = vcombine.low %v2685_v37, %v2689_v26  ;;  %v5900_v19 = vld [vmem:[%s12485_s7 + $0x30] sm:$0xff] }
 0x2a0   :  { %v11195_v36 = vpop.f32.mrf.mxu0  ;;  %v4981_v34 = vpop.f32.mrf.mxu1  ;;  %5269 = vmatmul.mubr.bf16.gmra.mxu0 %v7599_v9  ;;  %5494 = vmatmul.mubr.bf16.gmra.mxu1 %v7537_v15  ;;  %v4696_v9 = vadd.f32 %v10976_v49, %v10769_v5  ;;  %v5903_v15 = vld [vmem:[%s12485_s7 + $0x48] sm:$0xff]  ;;  %v7554_v5 = vcombine.high %v2693_v47, %v2697_v54 }
 0x2a1   :  { %v11197_v44 = vadd.f32 %v4981_v34, %v4693_v10  ;;  %5276 = vmatprep.mubr.bf16.mxu0 %v7608_v13  ;;  %5501 = vmatprep.mubr.bf16.mxu1 %v7546_v8  ;;  %v5916_v10 = vld [vmem:[%s12485_s7 + $0xb0] sm:$0xff]  ;;  %v7616_v34 = vcombine.high %v2756_v21, %v2760_v16 }
 0x2a2   :  { %v4758_v12 = vpop.f32.mrf.mxu0  ;;  %v4983_v46 = vpop.f32.mrf.mxu1  ;;  %5973 = vperm.xlu1 %8591, %v5903_v15   ;;  %6038 = vperm.xlu0 %8590, %v5916_v10   ;;  %v2768_v15 = vld [vmem:[%s12482_s4 + $0x370] sm:$0xff]  ;;  %v2701_v10 = vld [vmem:[%s12482_s4 + $0x158] sm:$0xff] }
 0x2a3   :  { %v5917_v46 = vld [vmem:[%s12485_s7 + $0xb8] sm:$0xff] }
 0x2a4   :  { %v11219_v13 = vpop.f32.mrf.mxu0  ;;  %v4984_v8 = vpop.f32.mrf.mxu1 }
 0x2a5   :  { %v11223_v62 = vadd.f32 %v4984_v8, %v4696_v9  ;;  %v2705_v8 = vld [vmem:[%s12482_s4 + $0x178] sm:$0xff] }
 0x2a6   :  { %v4761_v49 = vpop.f32.mrf.mxu0  ;;  %v4986_v12 = vpop.f32.mrf.mxu1  ;;  %6043 = vperm.xlu1 %8591, %v5917_v46   ;;  %5958 = vperm.xlu0 %8590, %v5900_v19   ;;  %v4709_v46 = vadd.f32 %v11006_v30, %v10622_v20  ;;  %v2772_v30 = vld [vmem:[%s12482_s4 + $0x390] sm:$0xff] }
 0x2a7   :  { %v7615_v49 = vcombine.low %v2756_v21, %v2760_v16  ;;  %v7553_v12 = vcombine.low %v2693_v47, %v2697_v54  ;;  %v5898_v21 = vld [vmem:[%s12485_s7 + $0x20] sm:$0xff] }
 0x2a8   :  { %v11231_v24 = vpop.f32.mrf.mxu0  ;;  %v4989_v37 = vpop.f32.mrf.mxu1  ;;  %5277 = vmatmul.mubr.bf16.gmra.mxu0 %v7607_v25  ;;  %5502 = vmatmul.mubr.bf16.gmra.mxu1 %v7545_v0  ;;  %v4704_v25 = vadd.f32 %v11000_v27, %v10706_v32  ;;  %v5901_v0 = vld [vmem:[%s12485_s7 + $0x38] sm:$0xff]  ;;  %v7562_v32 = vcombine.high %v2701_v10, %v2705_v8 }
 0x2a9   :  { %v11233_v18 = vadd.f32 %v4989_v37, %v4701_v11  ;;  %5284 = vmatprep.mubr.bf16.mxu0 %v7616_v34  ;;  %5509 = vmatprep.mubr.bf16.mxu1 %v7554_v5  ;;  %v5914_v11 = vld [vmem:[%s12485_s7 + $0xa0] sm:$0xff]  ;;  %v7624_v37 = vcombine.high %v2764_v52, %v2768_v15 }
 0x2aa   :  { %v4766_v26 = vpop.f32.mrf.mxu0  ;;  %v4991_v9 = vpop.f32.mrf.mxu1  ;;  %5963 = vperm.xlu1 %8591, %v5901_v0   ;;  %6028 = vperm.xlu0 %8590, %v5914_v11   ;;  %v2776_v0 = vld [vmem:[%s12482_s4 + $0x3b0] sm:$0xff]  ;;  %v2709_v11 = vld [vmem:[%s12482_s4 + $0x198] sm:$0xff] }
 0x2ab   :  { %v5915_v9 = vld [vmem:[%s12485_s7 + $0xa8] sm:$0xff] }
 0x2ac   :  { %v11255_v34 = vpop.f32.mrf.mxu0  ;;  %v4992_v5 = vpop.f32.mrf.mxu1 }
 0x2ad   :  { %v11259_v19 = vadd.f32 %v4992_v5, %v4704_v25  ;;  %v2713_v5 = vld [vmem:[%s12482_s4 + $0x1b8] sm:$0xff] }
 0x2ae   :  { %v4769_v27 = vpop.f32.mrf.mxu0  ;;  %v4994_v26 = vpop.f32.mrf.mxu1  ;;  %6033 = vperm.xlu1 %8591, %v5915_v9   ;;  %5948 = vperm.xlu0 %8590, %v5898_v21   ;;  %v4717_v9 = vadd.f32 %v11030_v28, %v10509_v50  ;;  %v2780_v28 = vld [vmem:[%s12482_s4 + $0x3d0] sm:$0xff] }
 0x2af   :  { %12546 = vst [vmem:[#allocation18_spill] sm:$0xff] %v11259_v19  ;;  %v7623_v27 = vcombine.low %v2764_v52, %v2768_v15  ;;  %v7561_v26 = vcombine.low %v2701_v10, %v2705_v8  ;;  %v5896_v52 = vld [vmem:[%s12485_s7 + $0x10] sm:$0xff] }
 0x2b0   :  { %v11267_v16 = vpop.f32.mrf.mxu0  ;;  %v4997_v47 = vpop.f32.mrf.mxu1  ;;  %5285 = vmatmul.mubr.bf16.gmra.mxu0 %v7615_v49  ;;  %5510 = vmatmul.mubr.bf16.gmra.mxu1 %v7553_v12  ;;  %v4712_v49 = vadd.f32 %v11024_v41, %v10632_v58  ;;  %v5899_v12 = vld [vmem:[%s12485_s7 + $0x28] sm:$0xff]  ;;  %v7570_v58 = vcombine.high %v2709_v11, %v2713_v5 }
 0x2b1   :  { %v11269_v20 = vadd.f32 %v4997_v47, %v4709_v46  ;;  %5292 = vmatprep.mubr.bf16.mxu0 %v7624_v37  ;;  %5517 = vmatprep.mubr.bf16.mxu1 %v7562_v32  ;;  %v5912_v46 = vld [vmem:[%s12485_s7 + $0x90] sm:$0xff]  ;;  %v7632_v47 = vcombine.high %v2772_v30, %v2776_v0 }
 0x2b2   :  { %v4774_v54 = vpop.f32.mrf.mxu0  ;;  %v4999_v25 = vpop.f32.mrf.mxu1  ;;  %5953 = vperm.xlu1 %8591, %v5899_v12   ;;  %6018 = vperm.xlu0 %8590, %v5912_v46   ;;  %v2784_v12 = vld [vmem:[%s12482_s4 + $0x3f0] sm:$0xff]  ;;  %v2717_v46 = vld [vmem:[%s12482_s4 + $0x1d8] sm:$0xff] }
 0x2b3   :  { %12547 = vst [vmem:[#allocation42_spill] sm:$0xff] %v11269_v20  ;;  %v5913_v25 = vld [vmem:[%s12485_s7 + $0x98] sm:$0xff] }
 0x2b4   :  { %v11291_v37 = vpop.f32.mrf.mxu0  ;;  %v5000_v32 = vpop.f32.mrf.mxu1  ;;  %v6803_v20 = vld [vmem:[%s12487_s9 + $0x58] sm:$0xff] }
 0x2b5   :  { %v11295_v21 = vadd.f32 %v5000_v32, %v4712_v49  ;;  %v2721_v32 = vld [vmem:[%s12482_s4 + $0x1f8] sm:$0xff] }
 0x2b6   :  { %v4777_v41 = vpop.f32.mrf.mxu0  ;;  %v5002_v54 = vpop.f32.mrf.mxu1  ;;  %6023 = vperm.xlu1 %8591, %v5913_v25   ;;  %5938 = vperm.xlu0 %8590, %v5896_v52   ;;  %v4725_v25 = vadd.f32 %v11054_v43, %v10396_v3  ;;  %v11346_v43 = vld [vmem:[%s12482_s4 + $0x410] sm:$0xff] }
 0x2b7   :  { %12548 = vst [vmem:[#allocation43_spill] sm:$0xff] %v11295_v21  ;;  %v7631_v41 = vcombine.low %v2772_v30, %v2776_v0  ;;  %v7569_v54 = vcombine.low %v2709_v11, %v2713_v5  ;;  %v5894_v30 = vld [vmem:[%s12485_s7] sm:$0xff] }
 0x2b8   :  { %v11303_v15 = vpop.f32.mrf.mxu0  ;;  %v5005_v10 = vpop.f32.mrf.mxu1  ;;  %5293 = vmatmul.mubr.bf16.gmra.mxu0 %v7623_v27  ;;  %5518 = vmatmul.mubr.bf16.gmra.mxu1 %v7561_v26  ;;  %v4720_v27 = vadd.f32 %v11048_v39, %v10532_v38  ;;  %v5897_v26 = vld [vmem:[%s12485_s7 + $0x18] sm:$0xff]  ;;  %v7578_v38 = vcombine.high %v2717_v46, %v2721_v32 }
 0x2b9   :  { %v11305_v50 = vadd.f32 %v5005_v10, %v4717_v9  ;;  %5300 = vmatprep.mubr.bf16.mxu0 %v7632_v47  ;;  %5525 = vmatprep.mubr.bf16.mxu1 %v7570_v58  ;;  %v5910_v9 = vld [vmem:[%s12485_s7 + $0x80] sm:$0xff]  ;;  %v7640_v10 = vcombine.high %v2780_v28, %v2784_v12 }
 0x2ba   :  { %v4782_v8 = vpop.f32.mrf.mxu0  ;;  %v5007_v49 = vpop.f32.mrf.mxu1  ;;  %5943 = vperm.xlu1 %8591, %v5897_v26   ;;  %6008 = vperm.xlu0 %8590, %v5910_v9   ;;  %v2792_v26 = vld [vmem:[%s12482_s4 + $0x430] sm:$0xff]  ;;  %v2725_v9 = vld [vmem:[%s12482_s4 + $0x218] sm:$0xff] }
 0x2bb   :  { %12549 = vst [vmem:[#allocation44_spill] sm:$0xff] %v11305_v50  ;;  %v5911_v49 = vld [vmem:[%s12485_s7 + $0x88] sm:$0xff]  ;;  %v6807_v50 = vld [vmem:[%s12487_s9 + $0x78] sm:$0xff] }
 0x2bc   :  { %v11327_v47 = vpop.f32.mrf.mxu0  ;;  %v5008_v58 = vpop.f32.mrf.mxu1 }
 0x2bd   :  { %v11331_v52 = vadd.f32 %v5008_v58, %v4720_v27  ;;  %v2729_v58 = vld [vmem:[%s12482_s4 + $0x238] sm:$0xff] }
 0x2be   :  { %v4785_v39 = vpop.f32.mrf.mxu0  ;;  %v5010_v8 = vpop.f32.mrf.mxu1  ;;  %6013 = vperm.xlu1 %8591, %v5911_v49   ;;  %5928 = vperm.xlu0 %8590, %v5894_v30   ;;  %v12553_v49 = vld [vmem:[#allocation16_spill] sm:$0xff] }
 0x2bf   :  { %12550 = vst [vmem:[#allocation45_spill] sm:$0xff] %v11331_v52  ;;  %v4733_v30 = vadd.f32 %v11087_v2, %v12553_v49 }
 0x2c0   :  { %v11339_v0 = vpop.f32.mrf.mxu0  ;;  %v5013_v11 = vpop.f32.mrf.mxu1  ;;  %5301 = vmatmul.mubr.bf16.gmra.mxu0 %v7631_v41  ;;  %5526 = vmatmul.mubr.bf16.gmra.mxu1 %v7569_v54  ;;  %v12552_v41 = vld [vmem:[#allocation23_spill] sm:$0xff] }
 0x2c1   :  { %v11341_v3 = vadd.f32 %v5013_v11, %v4725_v25  ;;  %5308 = vmatprep.mubr.bf16.mxu0 %v7640_v10  ;;  %5533 = vmatprep.mubr.bf16.mxu1 %v7578_v38  ;;  %v4728_v54 = vadd.f32 %v11075_v55, %v12552_v41  ;;  %v11359_v25 = vpop.permute.xlu0 %3220  ;;  %v5895_v10 = vld [vmem:[%s12485_s7 + $0x8] sm:$0xff]  ;;  %v6806_v38 = vld [vmem:[%s12487_s9 + $0x70] sm:$0xff]  ;;  %v7639_v11 = vcombine.low %v2780_v28, %v2784_v12  ;;  %v6804_v28 = vld [vmem:[%s12487_s9 + $0x60] sm:$0xff] }
 0x2c2   :  { %v4790_v5 = vpop.f32.mrf.mxu0  ;;  %v5015_v27 = vpop.f32.mrf.mxu1  ;;  %v7648_v55 = vcombine.high %v11346_v43, %v2792_v26  ;;  %v7586_v41 = vcombine.high %v2725_v9, %v2729_v58  ;;  %5933 = vperm.xlu1 %8591, %v5895_v10   ;;  %6880 = vperm.xlu0 %8590, %v6806_v38   ;;  %v2800_v38 = vld [vmem:[%s12482_s4 + $0x470] sm:$0xff] }
 0x2c3   :  { %12551 = vst [vmem:[#allocation46_spill] sm:$0xff] %v11341_v3  ;;  %v7577_v5 = vcombine.low %v2717_v46, %v2721_v32  ;;  %v11384_v32 = vpop.permute.xlu1 %3225 }
 0x2c4   :  { %v11367_v39 = vpop.f32.mrf.mxu0  ;;  %v5016_v8 = vpop.f32.mrf.mxu1 }
 0x2c5   :  { %v11371_v27 = vadd.f32 %v5016_v8, %v4728_v54  ;;  %v2733_v8 = vld [vmem:[%s12482_s4 + $0x258] sm:$0xff] }
 0x2c6   :  { %v4793_v3 = vpop.f32.mrf.mxu0  ;;  %v5018_v52 = vpop.f32.mrf.mxu1  ;;  %6885 = vperm.xlu1 %8591, %v6807_v50   ;;  %6870 = vperm.xlu0 %8590, %v6804_v28  }
 0x2c7   :  { %12554 = vst [vmem:[#allocation23_spill] sm:$0xff] %v11371_v27  ;;  %v3141_v52 = vpop.permute.xlu0 %3140  ;;  %v2796_v3 = vld [vmem:[%s12482_s4 + $0x450] sm:$0xff]  ;;  %v3146_v21 = vpop.permute.xlu1 %3145 }
 0x2c8   :  { %v11380_v12 = vpop.f32.mrf.mxu0  ;;  %v5021_v2 = vpop.f32.mrf.mxu1  ;;  %5309 = vmatmul.mubr.bf16.gmra.mxu0 %v7639_v11  ;;  %5534 = vmatmul.mubr.bf16.gmra.mxu1 %v7577_v5  ;;  %v2737_v11 = vld [vmem:[%s12482_s4 + $0x278] sm:$0xff]  ;;  %v12556_v5 = vld [vmem:[#allocation17_spill] sm:$0xff]  ;;  %v4741_v50 = vadd.f32 %v11123_v31, %v3141_v52  ;;  %v7656_v28 = vcombine.high %v2796_v3, %v2800_v38 }
 0x2c9   :  { %v11382_v46 = vadd.f32 %v5021_v2, %v4733_v30  ;;  %5316 = vmatprep.mubr.bf16.mxu0 %v7648_v55  ;;  %5541 = vmatprep.mubr.bf16.mxu1 %v7586_v41  ;;  %v4736_v49 = vadd.f32 %v11111_v45, %v12556_v5  ;;  %v6805_v30 = vld [vmem:[%s12487_s9 + $0x68] sm:$0xff]  ;;  %v6802_v55 = vld [vmem:[%s12487_s9 + $0x50] sm:$0xff]  ;;  %v7594_v45 = vcombine.high %v2733_v8, %v2737_v11 }
 0x2ca   :  { %v4798_v54 = vpop.f32.mrf.mxu0  ;;  %v5023_v10 = vpop.f32.mrf.mxu1  ;;  %6875 = vperm.xlu1 %8591, %v6805_v30   ;;  %6860 = vperm.xlu0 %8590, %v6802_v55   ;;  %v2741_v30 = vld [vmem:[%s12482_s4 + $0x298] sm:$0xff] }
 0x2cb   :  { %12555 = vst [vmem:[#allocation16_spill] sm:$0xff] %v11382_v46  ;;  %v7647_v54 = vcombine.low %v11346_v43, %v2792_v26  ;;  %v7585_v10 = vcombine.low %v2725_v9, %v2729_v58  ;;  %v6800_v43 = vld [vmem:[%s12487_s9 + $0x40] sm:$0xff]  ;;  %v2804_v58 = vld [vmem:[%s12482_s4 + $0x490] sm:$0xff]  ;;  %v2745_v55 = vld [vmem:[%s12482_s4 + $0x2b8] sm:$0xff] }
 0x2cc   :  { %v11406_v41 = vpop.f32.mrf.mxu0  ;;  %v5024_v2 = vpop.f32.mrf.mxu1 }
 0x2cd   :  { %v11409_v46 = vadd.f32 %v5024_v2, %v4736_v49  ;;  %v2808_v49 = vld [vmem:[%s12482_s4 + $0x4b0] sm:$0xff]  ;;  %v4744_v2 = vadd.f32 %v11147_v63, %v3146_v21  ;;  %v7602_v63 = vcombine.high %v2741_v30, %v2745_v55 }
 0x2ce   :  { %v4801_v5 = vpop.f32.mrf.mxu0  ;;  %v5026_v27 = vpop.f32.mrf.mxu1  ;;  %6865 = vperm.xlu1 %8591, %v6803_v20   ;;  %6850 = vperm.xlu0 %8590, %v6800_v43   ;;  %v7664_v43 = vcombine.high %v2804_v58, %v2808_v49 }
 0x2cf   :  { %12557 = vst [vmem:[#allocation17_spill] sm:$0xff] %v11409_v46  ;;  %v7593_v5 = vcombine.low %v2733_v8, %v2737_v11  ;;  %v6799_v46 = vld [vmem:[%s12487_s9 + $0x38] sm:$0xff]  ;;  %v2812_v11 = vld [vmem:[%s12482_s4 + $0x4d0] sm:$0xff] }
 0x2d0   :  { %v11418_v26 = vpop.f32.mrf.mxu0  ;;  %v5029_v9 = vpop.f32.mrf.mxu1  ;;  %5317 = vmatmul.mubr.bf16.gmra.mxu0 %v7647_v54  ;;  %5542 = vmatmul.mubr.bf16.gmra.mxu1 %v7585_v10  ;;  %v6801_v54 = vld [vmem:[%s12487_s9 + $0x48] sm:$0xff]  ;;  %v6798_v10 = vld [vmem:[%s12487_s9 + $0x30] sm:$0xff] }
 0x2d1   :  { %v11420_v31 = vadd.f32 %v5029_v9, %v4741_v50  ;;  %5324 = vmatprep.mubr.bf16.mxu0 %v7656_v28  ;;  %5549 = vmatprep.mubr.bf16.mxu1 %v7594_v45  ;;  %v7655_v45 = vcombine.low %v2796_v3, %v2800_v38  ;;  %v12559_v9 = vld [vmem:[#allocation39_spill] sm:$0xff]  ;;  %v6796_v3 = vld [vmem:[%s12487_s9 + $0x20] sm:$0xff] }
 0x2d2   :  { %v4806_v27 = vpop.f32.mrf.mxu0  ;;  %v5031_v52 = vpop.f32.mrf.mxu1  ;;  %6855 = vperm.xlu1 %8591, %v6801_v54   ;;  %6840 = vperm.xlu0 %8590, %v6798_v10   ;;  %v2816_v10 = vld [vmem:[%s12482_s4 + $0x4f0] sm:$0xff] }
 0x2d3   :  { %12558 = vst [vmem:[#allocation47_spill] sm:$0xff] %v11420_v31  ;;  %v4749_v27 = vadd.f32 %v11159_v23, %v12559_v9 }
 0x2d4   :  { %v11441_v50 = vpop.f32.mrf.mxu0  ;;  %v5032_v28 = vpop.f32.mrf.mxu1 }
 0x2d5   :  { %v11445_v20 = vadd.f32 %v5032_v28, %v4744_v2  ;;  %v2749_v28 = vld [vmem:[%s12482_s4 + $0x2d8] sm:$0xff] }
 0x2d6   :  { %v4809_v21 = vpop.f32.mrf.mxu0  ;;  %v5034_v52 = vpop.f32.mrf.mxu1  ;;  %6845 = vperm.xlu1 %8591, %v6799_v46   ;;  %6830 = vperm.xlu0 %8590, %v6796_v3  }
 0x2d7   :  { %12560 = vst [vmem:[#allocation39_spill] sm:$0xff] %v11445_v20  ;;  %v7663_v52 = vcombine.low %v2804_v58, %v2808_v49  ;;  %v6795_v20 = vld [vmem:[%s12487_s9 + $0x18] sm:$0xff]  ;;  %v6792_v58 = vld [vmem:[%s12487_s9] sm:$0xff] }
 0x2d8   :  { %v11453_v38 = vpop.f32.mrf.mxu0  ;;  %v5037_v8 = vpop.f32.mrf.mxu1  ;;  %5325 = vmatmul.mubr.bf16.gmra.mxu0 %v7655_v45  ;;  %5550 = vmatmul.mubr.bf16.gmra.mxu1 %v7593_v5  ;;  %v2753_v45 = vld [vmem:[%s12482_s4 + $0x2f8] sm:$0xff] }
 0x2d9   :  { %v11455_v23 = vadd.f32 %v5037_v8, %v4749_v27  ;;  %5332 = vmatprep.mubr.bf16.mxu0 %v7664_v43  ;;  %5557 = vmatprep.mubr.bf16.mxu1 %v7602_v63  ;;  %v12562_v5 = vld [vmem:[#allocation40_spill] sm:$0xff]  ;;  %v6797_v27 = vld [vmem:[%s12487_s9 + $0x28] sm:$0xff]  ;;  %v6794_v43 = vld [vmem:[%s12487_s9 + $0x10] sm:$0xff]  ;;  %v7601_v8 = vcombine.low %v2741_v30, %v2745_v55 }
 0x2da   :  { %v4814_v2 = vpop.f32.mrf.mxu0  ;;  %v5039_v54 = vpop.f32.mrf.mxu1  ;;  %v4752_v9 = vadd.f32 %v11183_v17, %v12562_v5  ;;  %v7610_v17 = vcombine.high %v2749_v28, %v2753_v45  ;;  %6835 = vperm.xlu1 %8591, %v6797_v27   ;;  %6820 = vperm.xlu0 %8590, %v6794_v43   ;;  %v2820_v55 = vld [vmem:[%s12482_s4 + $0x510] sm:$0xff]  ;;  %v2757_v43 = vld [vmem:[%s12482_s4 + $0x318] sm:$0xff] }
 0x2db   :  { %12561 = vst [vmem:[#allocation48_spill] sm:$0xff] %v11455_v23  ;;  %v12563_v2 = vld [vmem:[#allocation35_spill] sm:$0xff]  ;;  %v7672_v54 = vcombine.high %v2812_v11, %v2816_v10 }
 0x2dc   :  { %v11477_v63 = vpop.f32.mrf.mxu0  ;;  %v5040_v21 = vpop.f32.mrf.mxu1  ;;  %v4757_v46 = vadd.f32 %v11195_v36, %v12563_v2  ;;  %v2824_v27 = vld [vmem:[%s12482_s4 + $0x530] sm:$0xff]  ;;  %v6793_v2 = vld [vmem:[%s12487_s9 + $0x8] sm:$0xff] }
 0x2dd   :  { %v11481_v3 = vadd.f32 %v5040_v21, %v4752_v9  ;;  %v2761_v21 = vld [vmem:[%s12482_s4 + $0x338] sm:$0xff] }
 0x2de   :  { %v4817_v5 = vpop.f32.mrf.mxu0  ;;  %v5042_v23 = vpop.f32.mrf.mxu1  ;;  %6825 = vperm.xlu1 %8591, %v6795_v20   ;;  %6810 = vperm.xlu0 %8590, %v6792_v58  }
 0x2df   :  { %12564 = vst [vmem:[#allocation40_spill] sm:$0xff] %v11481_v3  ;;  %v7671_v5 = vcombine.low %v2812_v11, %v2816_v10  ;;  %v7096_v3 = vld [vmem:[%s12489_s11 + $0x18] sm:$0xff]  ;;  %v7093_v11 = vld [vmem:[%s12489_s11] sm:$0xff] }
 0x2e0   :  { %v11489_v49 = vpop.f32.mrf.mxu0  ;;  %v5045_v30 = vpop.f32.mrf.mxu1  ;;  %5333 = vmatmul.mubr.bf16.gmra.mxu0 %v7663_v52  ;;  %5558 = vmatmul.mubr.bf16.gmra.mxu1 %v7601_v8  ;;  %v12566_v52 = vld [vmem:[#allocation36_spill] sm:$0xff] }
 0x2e1   :  { %v11491_v36 = vadd.f32 %v5045_v30, %v4757_v46  ;;  %5340 = vmatprep.mubr.bf16.mxu0 %v7672_v54  ;;  %5565 = vmatprep.mubr.bf16.mxu1 %v7610_v17  ;;  %v4760_v8 = vadd.f32 %v11219_v13, %v12566_v52  ;;  %v7095_v46 = vld [vmem:[%s12489_s11 + $0x10] sm:$0xff]  ;;  %v7609_v30 = vcombine.low %v2749_v28, %v2753_v45 }
 0x2e2   :  { %v4822_v23 = vpop.f32.mrf.mxu0  ;;  %v5047_v9 = vpop.f32.mrf.mxu1  ;;  %v7618_v13 = vcombine.high %v2757_v43, %v2761_v21  ;;  %6815 = vperm.xlu1 %8591, %v6793_v2   ;;  %7109 = vperm.xlu0 %8590, %v7095_v46   ;;  %v2828_v45 = vld [vmem:[%s12482_s4 + $0x550] sm:$0xff]  ;;  %v2765_v46 = vld [vmem:[%s12482_s4 + $0x358] sm:$0xff] }
 0x2e3   :  { %12565 = vst [vmem:[#allocation35_spill] sm:$0xff] %v11491_v36  ;;  %v12567_v23 = vld [vmem:[#allocation12_spill] sm:$0xff]  ;;  %v7680_v9 = vcombine.high %v2820_v55, %v2824_v27  ;;  %v2832_v2 = vld [vmem:[%s12482_s4 + $0x570] sm:$0xff] }
 0x2e4   :  { %v11513_v54 = vpop.f32.mrf.mxu0  ;;  %v5048_v17 = vpop.f32.mrf.mxu1  ;;  %v4765_v20 = vadd.f32 %v11231_v24, %v12567_v23  ;;  %v7094_v23 = vld [vmem:[%s12489_s11 + $0x8] sm:$0xff] }
 0x2e5   :  { %v11517_v58 = vadd.f32 %v5048_v17, %v4760_v8  ;;  %v2769_v17 = vld [vmem:[%s12482_s4 + $0x378] sm:$0xff] }
 0x2e6   :  { %v4825_v52 = vpop.f32.mrf.mxu0  ;;  %v5050_v36 = vpop.f32.mrf.mxu1  ;;  %7114 = vperm.xlu1 %8591, %v7096_v3   ;;  %7099 = vperm.xlu0 %8590, %v7093_v11   ;;  %v7688_v3 = vcombine.high %v2828_v45, %v2832_v2  ;;  %v7626_v11 = vcombine.high %v2765_v46, %v2769_v17 }
 0x2e7   :  { %12568 = vst [vmem:[#allocation36_spill] sm:$0xff] %v11517_v58  ;;  %v7679_v52 = vcombine.low %v2820_v55, %v2824_v27 }
 0x2e8   :  { %v11525_v10 = vpop.f32.mrf.mxu0  ;;  %v5053_v28 = vpop.f32.mrf.mxu1  ;;  %5341 = vmatmul.mubr.bf16.gmra.mxu0 %v7671_v5  ;;  %5566 = vmatmul.mubr.bf16.gmra.mxu1 %v7609_v30  ;;  %v12570_v5 = vld [vmem:[#allocation10_spill] sm:$0xff] }
 0x2e9   :  { %v11527_v24 = vadd.f32 %v5053_v28, %v4765_v20  ;;  %5348 = vmatprep.mubr.bf16.mxu0 %v7680_v9  ;;  %5573 = vmatprep.mubr.bf16.mxu1 %v7618_v13  ;;  %v4768_v30 = vadd.f32 %v11255_v34, %v12570_v5  ;;  %v7185_v20 = vld [vmem:[#allocation2] sm:$0x1]  ;;  %v7617_v28 = vcombine.low %v2757_v43, %v2761_v21  ;;  %v2773_v43 = vld [vmem:[%s12482_s4 + $0x398] sm:$0xff] }
 0x2ea   :  { %v4830_v36 = vpop.f32.mrf.mxu0  ;;  %v5055_v8 = vpop.f32.mrf.mxu1  ;;  %7104 = vperm.xlu1 %8591, %v7094_v23   ;;  %7188 = vperm.xlu0 %8590, %v7185_v20   ;;  %v2777_v21 = vld [vmem:[%s12482_s4 + $0x3b8] sm:$0xff] }
 0x2eb   :  { %12569 = vst [vmem:[#allocation12_spill] sm:$0xff] %v11527_v24  ;;  %v12571_v36 = vld [vmem:[#allocation15_spill] sm:$0xff] }
 0x2ec   :  { %v11546_v9 = vpop.f32.mrf.mxu0  ;;  %v5056_v13 = vpop.f32.mrf.mxu1  ;;  %v4773_v8 = vadd.f32 %v11267_v16, %v12571_v36  ;;  %v2836_v16 = vld [vmem:[%s12482_s4 + $0x590] sm:$0xff] }
 0x2ed   :  { %v11550_v24 = vadd.f32 %v5056_v13, %v4768_v30  ;;  %v7687_v13 = vcombine.low %v2828_v45, %v2832_v2  ;;  %v2844_v45 = vld [vmem:[%s12482_s4 + $0x5d0] sm:$0xff] }
 0x2ee   :  { %v4833_v58 = vpop.f32.mrf.mxu0  ;;  %v5058_v31 = vpop.f32.mrf.mxu1 }
 0x2ef   :  { %v2840_v31 = vld [vmem:[%s12482_s4 + $0x5b0] sm:$0xff] }
 0x2f0   :  { %v11552_v34 = vpop.f32.mrf.mxu0  ;;  %v5061_v5 = vpop.f32.mrf.mxu1  ;;  %5349 = vmatmul.mubr.bf16.gmra.mxu0 %v7679_v52  ;;  %5574 = vmatmul.mubr.bf16.gmra.mxu1 %v7617_v28  ;;  %v12573_v58 = vld [vmem:[#allocation14_spill] sm:$0xff]  ;;  %v7625_v52 = vcombine.low %v2765_v46, %v2769_v17  ;;  %v2781_v17 = vld [vmem:[%s12482_s4 + $0x3d8] sm:$0xff] }
 0x2f1   :  { %v11554_v19 = vadd.f32 %v5061_v5, %v4773_v8  ;;  %5356 = vmatprep.mubr.bf16.mxu0 %v7688_v3  ;;  %5581 = vmatprep.mubr.bf16.mxu1 %v7626_v11  ;;  %v4776_v30 = vadd.f32 %v11291_v37, %v12573_v58  ;;  %v12574_v28 = vld [vmem:[#allocation30_spill] sm:$0xff]  ;;  %v7696_v3 = vcombine.high %v2836_v16, %v2840_v31  ;;  %v12577_v58 = vld [vmem:[#allocation31_spill] sm:$0xff] }
 0x2f2   :  { %v4838_v55 = vpop.f32.mrf.mxu0  ;;  %v5063_v27 = vpop.f32.mrf.mxu1  ;;  %v4781_v36 = vadd.f32 %v11303_v15, %v12574_v28  ;;  %v7634_v11 = vcombine.high %v2773_v43, %v2777_v21  ;;  %v2848_v46 = vld [vmem:[%s12482_s4 + $0x5f0] sm:$0xff]  ;;  %v7633_v28 = vcombine.low %v2773_v43, %v2777_v21  ;;  %v2789_v21 = vld [vmem:[%s12482_s4 + $0x418] sm:$0xff] }
 0x2f3   :  { %12572 = vst [vmem:[#allocation10_spill] sm:$0xff] %v11554_v19  ;;  %v2856_v43 = vld [vmem:[%s12482_s4 + $0x630] sm:$0xff] }
 0x2f4   :  { %v11570_v23 = vpop.f32.mrf.mxu0  ;;  %v5064_v20 = vpop.f32.mrf.mxu1 }
 0x2f5   :  { %v11574_v8 = vadd.f32 %v5064_v20, %v4776_v30  ;;  %v4784_v30 = vadd.f32 %v11327_v47, %v12577_v58  ;;  %v12581_v58 = vld [vmem:[#allocation27_spill] sm:$0xff] }
 0x2f6   :  { %v4841_v5 = vpop.f32.mrf.mxu0  ;;  %v5066_v55 = vpop.f32.mrf.mxu1 }
 0x2f7   :  { %12575 = vst [vmem:[#allocation15_spill] sm:$0xff] %v11574_v8  ;;  %v7704_v5 = vcombine.high %v2844_v45, %v2848_v46 }
 0x2f8   :  { %v11576_v27 = vpop.f32.mrf.mxu0  ;;  %v5069_v19 = vpop.f32.mrf.mxu1  ;;  %5357 = vmatmul.mubr.bf16.gmra.mxu0 %v7687_v13  ;;  %5582 = vmatmul.mubr.bf16.gmra.mxu1 %v7625_v52  ;;  %v7695_v52 = vcombine.low %v2836_v16, %v2840_v31  ;;  %v2852_v16 = vld [vmem:[%s12482_s4 + $0x610] sm:$0xff] }
 0x2f9   :  { %v11578_v37 = vadd.f32 %v5069_v19, %v4781_v36  ;;  %5364 = vmatprep.mubr.bf16.mxu0 %v7696_v3  ;;  %5589 = vmatprep.mubr.bf16.mxu1 %v7634_v11  ;;  %v2785_v19 = vld [vmem:[%s12482_s4 + $0x3f8] sm:$0xff]  ;;  %v12578_v36 = vld [vmem:[#allocation26_spill] sm:$0xff] }
 0x2fa   :  { %v4846_v15 = vpop.f32.mrf.mxu0  ;;  %v5071_v2 = vpop.f32.mrf.mxu1  ;;  %v4789_v3 = vadd.f32 %v11339_v0, %v12578_v36  ;;  %v7642_v55 = vcombine.high %v2781_v17, %v2785_v19  ;;  %v7641_v36 = vcombine.low %v2781_v17, %v2785_v19  ;;  %v2864_v17 = vld [vmem:[%s12482_s4 + $0x670] sm:$0xff]  ;;  %v2797_v19 = vld [vmem:[%s12482_s4 + $0x458] sm:$0xff] }
 0x2fb   :  { %12576 = vst [vmem:[#allocation14_spill] sm:$0xff] %v11578_v37 }
 0x2fc   :  { %v11594_v20 = vpop.f32.mrf.mxu0  ;;  %v5072_v13 = vpop.f32.mrf.mxu1 }
 0x2fd   :  { %v11598_v11 = vadd.f32 %v5072_v13, %v4784_v30  ;;  %v4792_v30 = vadd.f32 %v11367_v39, %v12581_v58  ;;  %v12585_v58 = vld [vmem:[#allocation22_spill] sm:$0xff] }
 0x2fe   :  { %v4849_v15 = vpop.f32.mrf.mxu0  ;;  %v5074_v2 = vpop.f32.mrf.mxu1 }
 0x2ff   :  { %12579 = vst [vmem:[#allocation30_spill] sm:$0xff] %v11598_v11  ;;  %v7712_v15 = vcombine.high %v2852_v16, %v2856_v43 }
 0x300   :  { %v11600_v37 = vpop.f32.mrf.mxu0  ;;  %v5077_v8 = vpop.f32.mrf.mxu1  ;;  %5365 = vmatmul.mubr.bf16.gmra.mxu0 %v7695_v52  ;;  %5590 = vmatmul.mubr.bf16.gmra.mxu1 %v7633_v28  ;;  %v7703_v28 = vcombine.low %v2844_v45, %v2848_v46  ;;  %v2860_v45 = vld [vmem:[%s12482_s4 + $0x650] sm:$0xff] }
 0x301   :  { %v11602_v47 = vadd.f32 %v5077_v8, %v4789_v3  ;;  %5372 = vmatprep.mubr.bf16.mxu0 %v7704_v5  ;;  %5597 = vmatprep.mubr.bf16.mxu1 %v7642_v55  ;;  %v2793_v8 = vld [vmem:[%s12482_s4 + $0x438] sm:$0xff]  ;;  %v12582_v3 = vld [vmem:[#allocation21_spill] sm:$0xff] }
 0x302   :  { %v4854_v0 = vpop.f32.mrf.mxu0  ;;  %v5079_v31 = vpop.f32.mrf.mxu1  ;;  %v4797_v5 = vadd.f32 %v11380_v12, %v12582_v3  ;;  %v7650_v2 = vcombine.high %v2789_v21, %v2793_v8  ;;  %v7649_v3 = vcombine.low %v2789_v21, %v2793_v8  ;;  %v2805_v21 = vld [vmem:[%s12482_s4 + $0x498] sm:$0xff] }
 0x303   :  { %12580 = vst [vmem:[#allocation31_spill] sm:$0xff] %v11602_v47  ;;  %v2809_v8 = vld [vmem:[%s12482_s4 + $0x4b8] sm:$0xff] }
 0x304   :  { %v11618_v13 = vpop.f32.mrf.mxu0  ;;  %v5080_v52 = vpop.f32.mrf.mxu1 }
 0x305   :  { %v11622_v55 = vadd.f32 %v5080_v52, %v4792_v30  ;;  %v4800_v30 = vadd.f32 %v11406_v41, %v12585_v58  ;;  %v12587_v41 = vld [vmem:[#allocation41_spill] sm:$0xff] }
 0x306   :  { %v4857_v0 = vpop.f32.mrf.mxu0  ;;  %v5082_v31 = vpop.f32.mrf.mxu1 }
 0x307   :  { %12583 = vst [vmem:[#allocation26_spill] sm:$0xff] %v11622_v55 }
 0x308   :  { %v11624_v47 = vpop.f32.mrf.mxu0  ;;  %v5085_v11 = vpop.f32.mrf.mxu1  ;;  %5373 = vmatmul.mubr.bf16.gmra.mxu0 %v7703_v28  ;;  %5598 = vmatmul.mubr.bf16.gmra.mxu1 %v7641_v36  ;;  %v7711_v36 = vcombine.low %v2852_v16, %v2856_v43 }
 0x309   :  { %v11626_v39 = vadd.f32 %v5085_v11, %v4797_v5  ;;  %5380 = vmatprep.mubr.bf16.mxu0 %v7712_v15  ;;  %5605 = vmatprep.mubr.bf16.mxu1 %v7650_v2  ;;  %v2801_v11 = vld [vmem:[%s12482_s4 + $0x478] sm:$0xff]  ;;  %v4805_v5 = vadd.f32 %v11418_v26, %v11359_v25  ;;  %v7720_v2 = vcombine.high %v2860_v45, %v2864_v17  ;;  %v2868_v25 = vld [vmem:[%s12482_s4 + $0x690] sm:$0xff] }
 0x30a   :  { %v4862_v12 = vpop.f32.mrf.mxu0  ;;  %v5087_v46 = vpop.f32.mrf.mxu1  ;;  %v7658_v0 = vcombine.high %v2797_v19, %v2801_v11  ;;  %v2872_v26 = vld [vmem:[%s12482_s4 + $0x6b0] sm:$0xff] }
 0x30b   :  { %12584 = vst [vmem:[#allocation27_spill] sm:$0xff] %v11626_v39 }
 0x30c   :  { %v11642_v52 = vpop.f32.mrf.mxu0  ;;  %v5088_v28 = vpop.f32.mrf.mxu1 }
 0x30d   :  { %v11646_v15 = vadd.f32 %v5088_v28, %v4800_v30 }
 0x30e   :  { %v4865_v31 = vpop.f32.mrf.mxu0  ;;  %v5090_v12 = vpop.f32.mrf.mxu1 }
 0x310   :  { %v5093_v46 = vpop.f32.mrf.mxu1  ;;  %v5190_v39 = vpop.f32.mrf.mxu0  ;;  %5381 = vmatmul.mubr.bf16.gmra.mxu0 %v7711_v36  ;;  %5606 = vmatmul.mubr.bf16.gmra.mxu1 %v7649_v3  ;;  %v7719_v36 = vcombine.low %v2860_v45, %v2864_v17  ;;  %v7657_v3 = vcombine.low %v2797_v19, %v2801_v11  ;;  %v2813_v19 = vld [vmem:[%s12482_s4 + $0x4d8] sm:$0xff] }
 0x311   :  { %v11648_v55 = vadd.f32 %v5093_v46, %v4805_v5  ;;  %v11651_v58 = vadd.f32 %v5190_v39, %v12587_v41  ;;  %5388 = vmatprep.mubr.bf16.mxu0 %v7720_v2  ;;  %5613 = vmatprep.mubr.bf16.mxu1 %v7658_v0  ;;  %v4808_v39 = vadd.f32 %v11441_v50, %v11384_v32  ;;  %v12588_v2 = vld [vmem:[#allocation37_spill] sm:$0xff] }
 0x312   :  { %v5095_v16 = vpop.f32.mrf.mxu1  ;;  %v5192_v43 = vpop.f32.mrf.mxu0  ;;  %v7728_v5 = vcombine.high %v2868_v25, %v2872_v26  ;;  %v4813_v0 = vadd.f32 %v11453_v38, %v12588_v2  ;;  %v7666_v46 = vcombine.high %v2805_v21, %v2809_v8  ;;  %v2876_v38 = vld [vmem:[%s12482_s4 + $0x6d0] sm:$0xff] }
 0x313   :  { %12586 = vst [vmem:[#allocation21_spill] sm:$0xff] %v11648_v55 }
 0x314   :  { %v5096_v30 = vpop.f32.mrf.mxu1  ;;  %v5193_v28 = vpop.f32.mrf.mxu0 }
 0x315   :  { %v11669_v31 = vadd.f32 %v5096_v30, %v4808_v39  ;;  %v11672_v12 = vadd.f32 %v5193_v28, %v10932_v61  ;;  %v2880_v61 = vld [vmem:[%s12482_s4 + $0x6f0] sm:$0xff]  ;;  %v7727_v28 = vcombine.low %v2868_v25, %v2872_v26 }
 0x316   :  { %v5098_v41 = vpop.f32.mrf.mxu1  ;;  %v5195_v16 = vpop.f32.mrf.mxu0 }
 0x318   :  { %v5101_v43 = vpop.f32.mrf.mxu1  ;;  %v5198_v55 = vpop.f32.mrf.mxu0  ;;  %5389 = vmatmul.mubr.bf16.gmra.mxu0 %v7719_v36  ;;  %5614 = vmatmul.mubr.bf16.gmra.mxu1 %v7657_v3  ;;  %v7665_v36 = vcombine.low %v2805_v21, %v2809_v8  ;;  %v7736_v3 = vcombine.high %v2876_v38, %v2880_v61  ;;  %v2821_v8 = vld [vmem:[%s12482_s4 + $0x518] sm:$0xff] }
 0x319   :  { %v11674_v32 = vadd.f32 %v5101_v43, %v4813_v0  ;;  %v11677_v50 = vadd.f32 %v5198_v55, %v10936_v22  ;;  %5396 = vmatprep.mubr.bf16.mxu0 %v7728_v5  ;;  %5621 = vmatprep.mubr.bf16.mxu1 %v7666_v46  ;;  %v2817_v22 = vld [vmem:[%s12482_s4 + $0x4f8] sm:$0xff]  ;;  %v12589_v55 = vld [vmem:[#allocation38_spill] sm:$0xff]  ;;  %v12590_v5 = vld [vmem:[#allocation33_spill] sm:$0xff] }
 0x31a   :  { %v5103_v45 = vpop.f32.mrf.mxu1  ;;  %v5200_v17 = vpop.f32.mrf.mxu0  ;;  %v4816_v11 = vadd.f32 %v11477_v63, %v12589_v55  ;;  %v4821_v2 = vadd.f32 %v11489_v49, %v12590_v5  ;;  %v7674_v41 = vcombine.high %v2813_v19, %v2817_v22  ;;  %v2884_v49 = vld [vmem:[%s12482_s4 + $0x710] sm:$0xff] }
 0x31b   :  { %v12591_v55 = vld [vmem:[#allocation34_spill] sm:$0xff]  ;;  %v12592_v5 = vld [vmem:[#allocation11_spill] sm:$0xff] }
 0x31c   :  { %v5104_v39 = vpop.f32.mrf.mxu1  ;;  %v5201_v30 = vpop.f32.mrf.mxu0 }
 0x31d   :  { %v11695_v0 = vadd.f32 %v5104_v39, %v4816_v11  ;;  %v11698_v46 = vadd.f32 %v5201_v30, %v10956_v6  ;;  %v2888_v6 = vld [vmem:[%s12482_s4 + $0x730] sm:$0xff]  ;;  %v4824_v11 = vadd.f32 %v11513_v54, %v12591_v55  ;;  %v12593_v55 = vld [vmem:[#allocation9_spill] sm:$0xff] }
 0x31e   :  { %v5106_v16 = vpop.f32.mrf.mxu1  ;;  %v5203_v43 = vpop.f32.mrf.mxu0 }
 0x320   :  { %v5109_v45 = vpop.f32.mrf.mxu1  ;;  %v5206_v17 = vpop.f32.mrf.mxu0  ;;  %5397 = vmatmul.mubr.bf16.gmra.mxu0 %v7727_v28  ;;  %5622 = vmatmul.mubr.bf16.gmra.mxu1 %v7665_v36  ;;  %v7735_v28 = vcombine.low %v2876_v38, %v2880_v61  ;;  %v7673_v36 = vcombine.low %v2813_v19, %v2817_v22  ;;  %v2829_v22 = vld [vmem:[%s12482_s4 + $0x558] sm:$0xff] }
 0x321   :  { %v11700_v63 = vadd.f32 %v5109_v45, %v4821_v2  ;;  %v11703_v25 = vadd.f32 %v5206_v17, %v10960_v59  ;;  %5404 = vmatprep.mubr.bf16.mxu0 %v7736_v3  ;;  %5629 = vmatprep.mubr.bf16.mxu1 %v7674_v41  ;;  %v2825_v59 = vld [vmem:[%s12482_s4 + $0x538] sm:$0xff]  ;;  %v7744_v3 = vcombine.high %v2884_v49, %v2888_v6 }
 0x322   :  { %v5111_v26 = vpop.f32.mrf.mxu1  ;;  %v5208_v21 = vpop.f32.mrf.mxu0  ;;  %v4829_v2 = vadd.f32 %v11525_v10, %v12592_v5  ;;  %v7682_v43 = vcombine.high %v2821_v8, %v2825_v59  ;;  %v2892_v10 = vld [vmem:[%s12482_s4 + $0x750] sm:$0xff]  ;;  %v12594_v5 = vld [vmem:[#allocation32_spill] sm:$0xff] }
 0x324   :  { %v5112_v39 = vpop.f32.mrf.mxu1  ;;  %v5209_v30 = vpop.f32.mrf.mxu0 }
 0x325   :  { %v11721_v41 = vadd.f32 %v5112_v39, %v4824_v11  ;;  %v11724_v16 = vadd.f32 %v5209_v30, %v10980_v42  ;;  %v2896_v42 = vld [vmem:[%s12482_s4 + $0x770] sm:$0xff]  ;;  %v4832_v11 = vadd.f32 %v11546_v9, %v12593_v55  ;;  %v12595_v55 = vld [vmem:[#allocation13_spill] sm:$0xff] }
 0x326   :  { %v5114_v45 = vpop.f32.mrf.mxu1  ;;  %v5211_v17 = vpop.f32.mrf.mxu0 }
 0x328   :  { %v5117_v26 = vpop.f32.mrf.mxu1  ;;  %v5214_v21 = vpop.f32.mrf.mxu0  ;;  %5405 = vmatmul.mubr.bf16.gmra.mxu0 %v7735_v28  ;;  %5630 = vmatmul.mubr.bf16.gmra.mxu1 %v7673_v36  ;;  %v7743_v28 = vcombine.low %v2884_v49, %v2888_v6  ;;  %v7681_v36 = vcombine.low %v2821_v8, %v2825_v59  ;;  %v2837_v59 = vld [vmem:[%s12482_s4 + $0x598] sm:$0xff] }
 0x329   :  { %v11726_v54 = vadd.f32 %v5117_v26, %v4829_v2  ;;  %v11729_v38 = vadd.f32 %v5214_v21, %v10984_v4  ;;  %5412 = vmatprep.mubr.bf16.mxu0 %v7744_v3  ;;  %5637 = vmatprep.mubr.bf16.mxu1 %v7682_v43  ;;  %v2833_v4 = vld [vmem:[%s12482_s4 + $0x578] sm:$0xff]  ;;  %v7752_v3 = vcombine.high %v2892_v10, %v2896_v42 }
 0x32a   :  { %v5119_v61 = vpop.f32.mrf.mxu1  ;;  %v5216_v19 = vpop.f32.mrf.mxu0  ;;  %v4837_v2 = vadd.f32 %v11552_v34, %v12594_v5  ;;  %v7690_v17 = vcombine.high %v2829_v22, %v2833_v4  ;;  %v2900_v34 = vld [vmem:[%s12482_s4 + $0x790] sm:$0xff]  ;;  %v12596_v5 = vld [vmem:[#allocation28_spill] sm:$0xff] }
 0x32c   :  { %v5120_v39 = vpop.f32.mrf.mxu1  ;;  %v5217_v30 = vpop.f32.mrf.mxu0 }
 0x32d   :  { %v11747_v43 = vadd.f32 %v5120_v39, %v4832_v11  ;;  %v11750_v45 = vadd.f32 %v5217_v30, %v11004_v57  ;;  %v2904_v57 = vld [vmem:[%s12482_s4 + $0x7b0] sm:$0xff]  ;;  %v4840_v11 = vadd.f32 %v11570_v23, %v12595_v55  ;;  %v12597_v55 = vld [vmem:[#allocation29_spill] sm:$0xff] }
 0x32e   :  { %v5122_v26 = vpop.f32.mrf.mxu1  ;;  %v5219_v21 = vpop.f32.mrf.mxu0 }
 0x330   :  { %v5125_v61 = vpop.f32.mrf.mxu1  ;;  %v5222_v19 = vpop.f32.mrf.mxu0  ;;  %5413 = vmatmul.mubr.bf16.gmra.mxu0 %v7743_v28  ;;  %5638 = vmatmul.mubr.bf16.gmra.mxu1 %v7681_v36  ;;  %v7751_v28 = vcombine.low %v2892_v10, %v2896_v42  ;;  %v7689_v36 = vcombine.low %v2829_v22, %v2833_v4  ;;  %v2845_v4 = vld [vmem:[%s12482_s4 + $0x5d8] sm:$0xff] }
 0x331   :  { %v11752_v9 = vadd.f32 %v5125_v61, %v4837_v2  ;;  %v11755_v49 = vadd.f32 %v5222_v19, %v11008_v14  ;;  %5420 = vmatprep.mubr.bf16.mxu0 %v7752_v3  ;;  %5645 = vmatprep.mubr.bf16.mxu1 %v7690_v17  ;;  %v2841_v14 = vld [vmem:[%s12482_s4 + $0x5b8] sm:$0xff]  ;;  %v7760_v3 = vcombine.high %v2900_v34, %v2904_v57 }
 0x332   :  { %v5127_v6 = vpop.f32.mrf.mxu1  ;;  %v5224_v8 = vpop.f32.mrf.mxu0  ;;  %v4845_v2 = vadd.f32 %v11576_v27, %v12596_v5  ;;  %v7698_v21 = vcombine.high %v2837_v59, %v2841_v14  ;;  %v2908_v27 = vld [vmem:[%s12482_s4 + $0x7d0] sm:$0xff]  ;;  %v12598_v5 = vld [vmem:[#allocation24_spill] sm:$0xff] }
 0x334   :  { %v5128_v39 = vpop.f32.mrf.mxu1  ;;  %v5225_v30 = vpop.f32.mrf.mxu0 }
 0x335   :  { %v11773_v17 = vadd.f32 %v5128_v39, %v4840_v11  ;;  %v11776_v26 = vadd.f32 %v5225_v30, %v11028_v51  ;;  %v2912_v51 = vld [vmem:[%s12482_s4 + $0x7f0] sm:$0xff]  ;;  %v4848_v11 = vadd.f32 %v11594_v20, %v12597_v55 }
 0x336   :  { %v5130_v61 = vpop.f32.mrf.mxu1  ;;  %v5227_v19 = vpop.f32.mrf.mxu0 }
 0x338   :  { %v5133_v6 = vpop.f32.mrf.mxu1  ;;  %v5230_v8 = vpop.f32.mrf.mxu0  ;;  %5421 = vmatmul.mubr.bf16.gmra.mxu0 %v7751_v28  ;;  %5646 = vmatmul.mubr.bf16.gmra.mxu1 %v7689_v36  ;;  %v7759_v28 = vcombine.low %v2900_v34, %v2904_v57  ;;  %v7697_v36 = vcombine.low %v2837_v59, %v2841_v14  ;;  %v2857_v59 = vld [vmem:[%s12482_s4 + $0x638] sm:$0xff]  ;;  %v12599_v14 = vld [vmem:[#allocation25_spill] sm:$0xff] }
 0x339   :  { %v11778_v23 = vadd.f32 %v5133_v6, %v4845_v2  ;;  %v11781_v10 = vadd.f32 %v5230_v8, %v11032_v48  ;;  %5428 = vmatprep.mubr.bf16.mxu0 %v7760_v3  ;;  %5653 = vmatprep.mubr.bf16.mxu1 %v7698_v21  ;;  %v2849_v48 = vld [vmem:[%s12482_s4 + $0x5f8] sm:$0xff]  ;;  %v7768_v3 = vcombine.high %v2908_v27, %v2912_v51 }
 0x33a   :  { %v5135_v42 = vpop.f32.mrf.mxu1  ;;  %v5232_v22 = vpop.f32.mrf.mxu0  ;;  %v4853_v2 = vadd.f32 %v11600_v37, %v12598_v5  ;;  %v7706_v19 = vcombine.high %v2845_v4, %v2849_v48  ;;  %v4856_v55 = vadd.f32 %v11618_v13, %v12599_v14 }
 0x33c   :  { %v5136_v39 = vpop.f32.mrf.mxu1  ;;  %v5233_v30 = vpop.f32.mrf.mxu0 }
 0x33d   :  { %v11799_v21 = vadd.f32 %v5136_v39, %v4848_v11  ;;  %v11802_v61 = vadd.f32 %v5233_v30, %v11052_v35  ;;  %v2853_v35 = vld [vmem:[%s12482_s4 + $0x618] sm:$0xff]  ;;  %v7767_v30 = vcombine.low %v2908_v27, %v2912_v51 }
 0x33e   :  { %v5138_v6 = vpop.f32.mrf.mxu1  ;;  %v5235_v8 = vpop.f32.mrf.mxu0  ;;  %v7713_v14 = vcombine.low %v2853_v35, %v2857_v59 }
 0x340   :  { %v5141_v42 = vpop.f32.mrf.mxu1  ;;  %v5238_v22 = vpop.f32.mrf.mxu0  ;;  %5429 = vmatmul.mubr.bf16.gmra.mxu0 %v7759_v28  ;;  %5654 = vmatmul.mubr.bf16.gmra.mxu1 %v7697_v36  ;;  %v12600_v28 = vld [vmem:[#allocation19_spill] sm:$0xff] }
 0x341   :  { %v11804_v20 = vadd.f32 %v5141_v42, %v4853_v2  ;;  %v11807_v34 = vadd.f32 %v5238_v22, %v11056_v1  ;;  %5436 = vmatprep.mubr.bf16.mxu0 %v7768_v3  ;;  %5661 = vmatprep.mubr.bf16.mxu1 %v7706_v19  ;;  %v7705_v1 = vcombine.low %v2845_v4, %v2849_v48  ;;  %v2865_v4 = vld [vmem:[%s12482_s4 + $0x678] sm:$0xff] }
 0x342   :  { %v5143_v37 = vpop.f32.mrf.mxu1  ;;  %v5240_v57 = vpop.f32.mrf.mxu0  ;;  %v4861_v36 = vadd.f32 %v11624_v47, %v12600_v28  ;;  %v7714_v2 = vcombine.high %v2853_v35, %v2857_v59  ;;  %v12602_v48 = vld [vmem:[#allocation20_spill] sm:$0xff] }
 0x343   :  { %v4864_v22 = vadd.f32 %v11642_v52, %v12602_v48  ;;  %v2869_v35 = vld [vmem:[%s12482_s4 + $0x698] sm:$0xff] }
 0x344   :  { %v5144_v11 = vpop.f32.mrf.mxu1  ;;  %v5241_v39 = vpop.f32.mrf.mxu0 }
 0x345   :  { %v11819_v3 = vadd.f32 %v5144_v11, %v4856_v55  ;;  %v11822_v5 = vadd.f32 %v5241_v39, %v11079_v56  ;;  %v2861_v56 = vld [vmem:[%s12482_s4 + $0x658] sm:$0xff] }
 0x346   :  { %v5146_v19 = vpop.f32.mrf.mxu1  ;;  %v5243_v6 = vpop.f32.mrf.mxu0  ;;  %v7722_v11 = vcombine.high %v2861_v56, %v2865_v4 }
 0x348   :  { %v5149_v8 = vpop.f32.mrf.mxu1  ;;  %v5246_v42 = vpop.f32.mrf.mxu0  ;;  %5437 = vmatmul.mubr.bf16.gmra.mxu0 %v7767_v30  ;;  %5662 = vmatmul.mubr.bf16.gmra.mxu1 %v7705_v1 }
 0x349   :  { %v11824_v13 = vadd.f32 %v5149_v8, %v4861_v36  ;;  %v11827_v27 = vadd.f32 %v5246_v42, %v11089_v33  ;;  %5669 = vmatprep.mubr.bf16.mxu1 %v7714_v2  ;;  %v7721_v8 = vcombine.low %v2861_v56, %v2865_v4 }
 0x34a   :  { %v5151_v51 = vpop.f32.mrf.mxu1  ;;  %v5248_v47 = vpop.f32.mrf.mxu0 }
 0x34b   :  { %12601 = vst [vmem:[#allocation22_spill] sm:$0xff] %v11824_v13 }
 0x34c   :  { %v5152_v37 = vpop.f32.mrf.mxu1  ;;  %v5249_v57 = vpop.f32.mrf.mxu0 }
 0x34d   :  { %v11837_v55 = vadd.f32 %v5152_v37, %v4864_v22  ;;  %v11840_v33 = vadd.f32 %v5249_v57, %v11115_v40  ;;  %v2873_v40 = vld [vmem:[%s12482_s4 + $0x6b8] sm:$0xff] }
 0x34e   :  { %v5154_v39 = vpop.f32.mrf.mxu1  ;;  %v5251_v30 = vpop.f32.mrf.mxu0 }
 0x34f   :  { %12603 = vst [vmem:[#allocation41_spill] sm:$0xff] %v11837_v55  ;;  %v2881_v39 = vld [vmem:[%s12482_s4 + $0x6f8] sm:$0xff] }
 0x350   :  { %v5254_v1 = vpop.f32.mrf.mxu0  ;;  %v5479_v28 = vpop.f32.mrf.mxu1  ;;  %5670 = vmatmul.mubr.bf16.gmra.mxu1 %v7713_v14 }
 0x351   :  { %v11843_v36 = vadd.f32 %v5254_v1, %v11125_v7  ;;  %v5480_v2 = vadd.f32 %v5479_v28, %v11651_v58  ;;  %5677 = vmatprep.mubr.bf16.mxu1 %v7722_v11  ;;  %v7730_v58 = vcombine.high %v2869_v35, %v2873_v40  ;;  %v7729_v28 = vcombine.low %v2869_v35, %v2873_v40 }
 0x352   :  { %v5256_v52 = vpop.f32.mrf.mxu0  ;;  %v5481_v19 = vpop.f32.mrf.mxu1 }
 0x353   :  { %v5734_v48 = vmax.f32 %v5480_v2, 0.0 }
 0x354   :  { %v5257_v59 = vpop.f32.mrf.mxu0  ;;  %v5482_v6 = vpop.f32.mrf.mxu1 }
 0x355   :  { %v11853_v42 = vadd.f32 %v5257_v59, %v11151_v29  ;;  %v5483_v7 = vadd.f32 %v5482_v6, %v11672_v12  ;;  %v2877_v12 = vld [vmem:[%s12482_s4 + $0x6d8] sm:$0xff] }
 0x356   :  { %v5259_v51 = vpop.f32.mrf.mxu0  ;;  %v5484_v47 = vpop.f32.mrf.mxu1 }
 0x357   :  { %v5735_v22 = vmax.f32 %v5483_v7, 0.0  ;;  %v2889_v47 = vld [vmem:[%s12482_s4 + $0x738] sm:$0xff] }
 0x358   :  { %v5262_v37 = vpop.f32.mrf.mxu0  ;;  %v5487_v57 = vpop.f32.mrf.mxu1  ;;  %5678 = vmatmul.mubr.bf16.gmra.mxu1 %v7721_v8 }
 0x359   :  { %v11856_v14 = vpack.c.bf16 %v5735_v22, %v5734_v48  ;;  %v11859_v11 = vadd.f32 %v5262_v37, %v11161_v60  ;;  %v5488_v56 = vadd.f32 %v5487_v57, %v11677_v50  ;;  %5685 = vmatprep.mubr.bf16.mxu1 %v7730_v58  ;;  %v7738_v50 = vcombine.high %v2877_v12, %v2881_v39 }
 0x35a   :  { %v5264_v29 = vpop.f32.mrf.mxu0  ;;  %v5489_v4 = vpop.f32.mrf.mxu1  ;;  %v7737_v37 = vcombine.low %v2877_v12, %v2881_v39 }
 0x35b   :  { %v5736_v59 = vmax.f32 %v5488_v56, 0.0 }
 0x35c   :  { %v5265_v30 = vpop.f32.mrf.mxu0  ;;  %v5490_v1 = vpop.f32.mrf.mxu1 }
 0x35d   :  { %v11869_v2 = vadd.f32 %v5265_v30, %v11187_v53  ;;  %v5491_v60 = vadd.f32 %v5490_v1, %v11698_v46  ;;  %v2885_v46 = vld [vmem:[%s12482_s4 + $0x718] sm:$0xff] }
 0x35e   :  { %v5267_v52 = vpop.f32.mrf.mxu0  ;;  %v5492_v19 = vpop.f32.mrf.mxu1 }
 0x35f   :  { %v5737_v6 = vmax.f32 %v5491_v60, 0.0  ;;  %v2897_v52 = vld [vmem:[%s12482_s4 + $0x778] sm:$0xff] }
 0x360   :  { %v5270_v8 = vpop.f32.mrf.mxu0  ;;  %v5495_v7 = vpop.f32.mrf.mxu1  ;;  %5686 = vmatmul.mubr.bf16.gmra.mxu1 %v7729_v28 }
 0x361   :  { %v11872_v58 = vpack.c.bf16 %v5737_v6, %v5736_v59  ;;  %v11875_v51 = vadd.f32 %v5270_v8, %v11197_v44  ;;  %v5496_v35 = vadd.f32 %v5495_v7, %v11703_v25  ;;  %5693 = vmatprep.mubr.bf16.mxu1 %v7738_v50  ;;  %v7746_v25 = vcombine.high %v2885_v46, %v2889_v47  ;;  %v12604_v8 = vld [vmem:[#allocation18_spill] sm:$0xff] }
 0x362   :  { %v5272_v53 = vpop.f32.mrf.mxu0  ;;  %v5497_v40 = vpop.f32.mrf.mxu1  ;;  %v7745_v6 = vcombine.low %v2885_v46, %v2889_v47 }
 0x363   :  { %v5738_v4 = vmax.f32 %v5496_v35, 0.0 }
 0x364   :  { %v5273_v48 = vpop.f32.mrf.mxu0  ;;  %v5498_v22 = vpop.f32.mrf.mxu1 }
 0x365   :  { %v11885_v57 = vadd.f32 %v5273_v48, %v11223_v62  ;;  %v5499_v44 = vadd.f32 %v5498_v22, %v11724_v16  ;;  %v2893_v16 = vld [vmem:[%s12482_s4 + $0x758] sm:$0xff] }
 0x366   :  { %v5275_v56 = vpop.f32.mrf.mxu0  ;;  %v5500_v29 = vpop.f32.mrf.mxu1 }
 0x367   :  { %v5739_v30 = vmax.f32 %v5499_v44, 0.0  ;;  %v8725_v44 = vld [vmem:[#allocation3 + $0x4] ss:$16 sps:$4 sm:$0xff]   ;;  %v12605_v56 = vld [vmem:[#allocation42_spill] sm:$0xff] }
 0x368   :  { %v5278_v1 = vpop.f32.mrf.mxu0  ;;  %v5503_v28 = vpop.f32.mrf.mxu1  ;;  %5694 = vmatmul.mubr.bf16.gmra.mxu1 %v7737_v37  ;;  %6438 = vmatprep.mubr.bf16.mxu0 %v8725_v44 }
 0x369   :  { %v11888_v60 = vpack.c.bf16 %v5739_v30, %v5738_v4  ;;  %v11891_v50 = vadd.f32 %v5278_v1, %v11233_v18  ;;  %v5504_v12 = vadd.f32 %v5503_v28, %v11729_v38  ;;  %5701 = vmatprep.mubr.bf16.mxu1 %v7746_v25  ;;  %v7754_v38 = vcombine.high %v2893_v16, %v2897_v52  ;;  %v2905_v30 = vld [vmem:[%s12482_s4 + $0x7b8] sm:$0xff] }
 0x36a   :  { %v5280_v62 = vpop.f32.mrf.mxu0  ;;  %v5505_v39 = vpop.f32.mrf.mxu1 }
 0x36b   :  { %v5740_v40 = vmax.f32 %v5504_v12, 0.0  ;;  %v7753_v12 = vcombine.low %v2893_v16, %v2897_v52  ;;  %v12606_v62 = vld [vmem:[#allocation43_spill] sm:$0xff] }
 0x36c   :  { %v5281_v19 = vpop.f32.mrf.mxu0  ;;  %v5506_v59 = vpop.f32.mrf.mxu1 }
 0x36d   :  { %v11901_v7 = vadd.f32 %v5281_v19, %v12604_v8  ;;  %v5507_v18 = vadd.f32 %v5506_v59, %v11750_v45  ;;  %v2901_v45 = vld [vmem:[%s12482_s4 + $0x798] sm:$0xff] }
 0x36e   :  { %v5283_v35 = vpop.f32.mrf.mxu0  ;;  %v5508_v53 = vpop.f32.mrf.mxu1  ;;  %v7762_v19 = vcombine.high %v2901_v45, %v2905_v30 }
 0x36f   :  { %v5741_v48 = vmax.f32 %v5507_v18, 0.0 }
 0x370   :  { %v5286_v22 = vpop.f32.mrf.mxu0  ;;  %v5511_v37 = vpop.f32.mrf.mxu1  ;;  %5702 = vmatmul.mubr.bf16.gmra.mxu1 %v7745_v6 }
 0x371   :  { %v11904_v25 = vpack.c.bf16 %v5741_v48, %v5740_v40  ;;  %v11907_v29 = vadd.f32 %v5286_v22, %v12605_v56  ;;  %v5512_v46 = vadd.f32 %v5511_v37, %v11755_v49  ;;  %5709 = vmatprep.mubr.bf16.mxu1 %v7754_v38  ;;  %v12607_v40 = vld [vmem:[#allocation44_spill] sm:$0xff] }
 0x372   :  { %v5288_v47 = vpop.f32.mrf.mxu0  ;;  %v5513_v4 = vpop.f32.mrf.mxu1  ;;  %v2913_v37 = vld [vmem:[%s12482_s4 + $0x7f8] sm:$0xff] }
 0x373   :  { %v5742_v8 = vmax.f32 %v5512_v46, 0.0  ;;  %v7761_v46 = vcombine.low %v2901_v45, %v2905_v30  ;;  %v12608_v47 = vld [vmem:[#allocation45_spill] sm:$0xff] }
 0x374   :  { %v5289_v1 = vpop.f32.mrf.mxu0  ;;  %v5514_v28 = vpop.f32.mrf.mxu1 }
 0x375   :  { %v11917_v39 = vadd.f32 %v5289_v1, %v12606_v62  ;;  %v5515_v49 = vadd.f32 %v5514_v28, %v11776_v26  ;;  %v2909_v26 = vld [vmem:[%s12482_s4 + $0x7d8] sm:$0xff] }
 0x376   :  { %v5291_v59 = vpop.f32.mrf.mxu0  ;;  %v5516_v6 = vpop.f32.mrf.mxu1 }
 0x377   :  { %v5743_v18 = vmax.f32 %v5515_v49, 0.0 }
 0x378   :  { %v5294_v38 = vpop.f32.mrf.mxu0  ;;  %v5519_v35 = vpop.f32.mrf.mxu1  ;;  %5710 = vmatmul.mubr.bf16.gmra.mxu1 %v7753_v12 }
 0x379   :  { %v11920_v53 = vpack.c.bf16 %v5743_v18, %v5742_v8  ;;  %v11923_v48 = vadd.f32 %v5294_v38, %v12607_v40  ;;  %v5520_v16 = vadd.f32 %v5519_v35, %v11781_v10  ;;  %5717 = vmatprep.mubr.bf16.mxu1 %v7762_v19  ;;  %v7770_v10 = vcombine.high %v2909_v26, %v2913_v37  ;;  %v12609_v8 = vld [vmem:[#allocation46_spill] sm:$0xff] }
 0x37a   :  { %v5296_v52 = vpop.f32.mrf.mxu0  ;;  %v5521_v22 = vpop.f32.mrf.mxu1  ;;  %v7769_v40 = vcombine.low %v2909_v26, %v2913_v37 }
 0x37b   :  { %v5744_v62 = vmax.f32 %v5520_v16, 0.0  ;;  %v12610_v52 = vld [vmem:[#allocation23_spill] sm:$0xff] }
 0x37c   :  { %v5297_v44 = vpop.f32.mrf.mxu0  ;;  %v5522_v56 = vpop.f32.mrf.mxu1 }
 0x37d   :  { %v11933_v4 = vadd.f32 %v5297_v44, %v12608_v47  ;;  %v5523_v1 = vadd.f32 %v5522_v56, %v11802_v61 }
 0x37e   :  { %v5299_v28 = vpop.f32.mrf.mxu0  ;;  %v5524_v12 = vpop.f32.mrf.mxu1 }
 0x37f   :  { %v5745_v49 = vmax.f32 %v5523_v1, 0.0 }
 0x380   :  { %v5302_v19 = vpop.f32.mrf.mxu0  ;;  %v5527_v59 = vpop.f32.mrf.mxu1  ;;  %5718 = vmatmul.mubr.bf16.gmra.mxu1 %v7761_v46 }
 0x381   :  { %v11936_v6 = vpack.c.bf16 %v5745_v49, %v5744_v62  ;;  %v11939_v18 = vadd.f32 %v5302_v19, %v12609_v8  ;;  %v5528_v45 = vadd.f32 %v5527_v59, %v11807_v34  ;;  %5725 = vmatprep.mubr.bf16.mxu1 %v7770_v10  ;;  %v12611_v34 = vld [vmem:[#allocation16_spill] sm:$0xff] }
 0x382   :  { %v5304_v30 = vpop.f32.mrf.mxu0  ;;  %v5529_v38 = vpop.f32.mrf.mxu1 }
 0x383   :  { %v5746_v46 = vmax.f32 %v5528_v45, 0.0 }
 0x384   :  { %v5305_v35 = vpop.f32.mrf.mxu0  ;;  %v5530_v61 = vpop.f32.mrf.mxu1 }
 0x385   :  { %v11943_v22 = vadd.f32 %v5305_v35, %v12610_v52  ;;  %v5531_v16 = vadd.f32 %v5530_v61, %v11822_v5 }
 0x386   :  { %v5307_v44 = vpop.f32.mrf.mxu0  ;;  %v5532_v56 = vpop.f32.mrf.mxu1 }
 0x387   :  { %v5747_v47 = vmax.f32 %v5531_v16, 0.0 }
 0x388   :  { %v5310_v1 = vpop.f32.mrf.mxu0  ;;  %v5535_v28 = vpop.f32.mrf.mxu1  ;;  %5726 = vmatmul.mubr.bf16.gmra.mxu1 %v7769_v40  ;;  %v12612_v40 = vld [vmem:[#allocation47_spill] sm:$0xff] }
 0x389   :  { %v11946_v12 = vpack.c.bf16 %v5747_v47, %v5746_v46  ;;  %v11949_v10 = vadd.f32 %v5310_v1, %v12611_v34  ;;  %v5536_v62 = vadd.f32 %v5535_v28, %v11827_v27  ;;  %v12613_v47 = vld [vmem:[#allocation39_spill] sm:$0xff] }
 0x38a   :  { %v5312_v26 = vpop.f32.mrf.mxu0  ;;  %v5537_v37 = vpop.f32.mrf.mxu1 }
 0x38b   :  { %v5748_v45 = vmax.f32 %v5536_v62, 0.0 }
 0x38c   :  { %v11952_v49 = vpop.f32.mrf.mxu0  ;;  %v5538_v19 = vpop.f32.mrf.mxu1 }
 0x38d   :  { %v5539_v5 = vadd.f32 %v5538_v19, %v11840_v33 }
 0x38e   :  { %v5315_v59 = vpop.f32.mrf.mxu0  ;;  %v5540_v8 = vpop.f32.mrf.mxu1 }
 0x38f   :  { %v5749_v30 = vmax.f32 %v5539_v5, 0.0  ;;  %v12614_v59 = vld [vmem:[#allocation48_spill] sm:$0xff] }
 0x390   :  { %v5318_v38 = vpop.f32.mrf.mxu0  ;;  %v5543_v35 = vpop.f32.mrf.mxu1 }
 0x391   :  { %v11955_v61 = vpack.c.bf16 %v5749_v30, %v5748_v45  ;;  %v11958_v52 = vadd.f32 %v5318_v38, %v12612_v40  ;;  %v5544_v27 = vadd.f32 %v5543_v35, %v11843_v36  ;;  %v12615_v40 = vld [vmem:[#allocation40_spill] sm:$0xff] }
 0x392   :  { %v5320_v16 = vpop.f32.mrf.mxu0  ;;  %v5545_v44 = vpop.f32.mrf.mxu1 }
 0x393   :  { %v5750_v62 = vmax.f32 %v5544_v27, 0.0 }
 0x394   :  { %v5321_v56 = vpop.f32.mrf.mxu0  ;;  %v5546_v46 = vpop.f32.mrf.mxu1 }
 0x395   :  { %v11962_v1 = vadd.f32 %v5321_v56, %v12613_v47  ;;  %v5547_v33 = vadd.f32 %v5546_v46, %v11853_v42 }
 0x396   :  { %v5323_v28 = vpop.f32.mrf.mxu0  ;;  %v5548_v34 = vpop.f32.mrf.mxu1 }
 0x397   :  { %v5751_v26 = vmax.f32 %v5547_v33, 0.0  ;;  %v12616_v34 = vld [vmem:[#allocation35_spill] sm:$0xff] }
 0x398   :  { %v5326_v37 = vpop.f32.mrf.mxu0  ;;  %v5551_v19 = vpop.f32.mrf.mxu1 }
 0x399   :  { %v11965_v5 = vpack.c.bf16 %v5751_v26, %v5750_v62  ;;  %v11968_v8 = vadd.f32 %v5326_v37, %v12614_v59  ;;  %v5552_v36 = vadd.f32 %v5551_v19, %v11859_v11 }
 0x39a   :  { %v5328_v45 = vpop.f32.mrf.mxu0  ;;  %v5553_v30 = vpop.f32.mrf.mxu1 }
 0x39b   :  { %v5752_v56 = vmax.f32 %v5552_v36, 0.0  ;;  %v12617_v45 = vld [vmem:[#allocation36_spill] sm:$0xff] }
 0x39c   :  { %v5329_v38 = vpop.f32.mrf.mxu0  ;;  %v5554_v35 = vpop.f32.mrf.mxu1 }
 0x39d   :  { %v11972_v16 = vadd.f32 %v5329_v38, %v12615_v40  ;;  %v5555_v42 = vadd.f32 %v5554_v35, %v11869_v2 }
 0x39e   :  { %v5331_v27 = vpop.f32.mrf.mxu0  ;;  %v5556_v44 = vpop.f32.mrf.mxu1 }
 0x39f   :  { %v5753_v46 = vmax.f32 %v5555_v42, 0.0 }
 0x3a0   :  { %v5334_v47 = vpop.f32.mrf.mxu0  ;;  %v5559_v33 = vpop.f32.mrf.mxu1 }
 0x3a1   :  { %v11975_v28 = vpack.c.bf16 %v5753_v46, %v5752_v56  ;;  %v11978_v62 = vadd.f32 %v5334_v47, %v12616_v34  ;;  %v5560_v37 = vadd.f32 %v5559_v33, %v11875_v51  ;;  %v12618_v56 = vld [vmem:[#allocation12_spill] sm:$0xff] }
 0x3a2   :  { %v5336_v11 = vpop.f32.mrf.mxu0  ;;  %v5561_v26 = vpop.f32.mrf.mxu1 }
 0x3a3   :  { %v5754_v35 = vmax.f32 %v5560_v37, 0.0 }
 0x3a4   :  { %v5337_v19 = vpop.f32.mrf.mxu0  ;;  %v5562_v59 = vpop.f32.mrf.mxu1 }
 0x3a5   :  { %v11982_v30 = vadd.f32 %v5337_v19, %v12617_v45  ;;  %v5563_v2 = vadd.f32 %v5562_v59, %v11885_v57 }
 0x3a6   :  { %v5339_v36 = vpop.f32.mrf.mxu0  ;;  %v5564_v38 = vpop.f32.mrf.mxu1 }
 0x3a7   :  { %v5755_v40 = vmax.f32 %v5563_v2, 0.0 }
 0x3a8   :  { %v5342_v42 = vpop.f32.mrf.mxu0  ;;  %v5567_v27 = vpop.f32.mrf.mxu1 }
 0x3a9   :  { %v11985_v44 = vpack.c.bf16 %v5755_v40, %v5754_v35  ;;  %v11988_v46 = vadd.f32 %v5342_v42, %v12618_v56  ;;  %v5568_v33 = vadd.f32 %v5567_v27, %v11891_v50  ;;  %v12619_v35 = vld [vmem:[#allocation10_spill] sm:$0xff] }
 0x3aa   :  { %v5344_v47 = vpop.f32.mrf.mxu0  ;;  %v5569_v51 = vpop.f32.mrf.mxu1 }
 0x3ab   :  { %v5756_v59 = vmax.f32 %v5568_v33, 0.0  ;;  %v12620_v47 = vld [vmem:[#allocation15_spill] sm:$0xff] }
 0x3ac   :  { %v5345_v34 = vpop.f32.mrf.mxu0  ;;  %v5570_v11 = vpop.f32.mrf.mxu1 }
 0x3ad   :  { %v11992_v26 = vadd.f32 %v5345_v34, %v11550_v24  ;;  %v5571_v57 = vadd.f32 %v5570_v11, %v11901_v7 }
 0x3ae   :  { %v5347_v37 = vpop.f32.mrf.mxu0  ;;  %v5572_v19 = vpop.f32.mrf.mxu1 }
 0x3af   :  { %v5757_v45 = vmax.f32 %v5571_v57, 0.0 }
 0x3b0   :  { %v5350_v2 = vpop.f32.mrf.mxu0  ;;  %v5575_v36 = vpop.f32.mrf.mxu1 }
 0x3b1   :  { %v11995_v38 = vpack.c.bf16 %v5757_v45, %v5756_v59  ;;  %v11998_v40 = vadd.f32 %v5350_v2, %v12619_v35  ;;  %v5576_v27 = vadd.f32 %v5575_v36, %v11907_v29  ;;  %v12621_v45 = vld [vmem:[#allocation14_spill] sm:$0xff] }
 0x3b2   :  { %v5352_v42 = vpop.f32.mrf.mxu0  ;;  %v5577_v50 = vpop.f32.mrf.mxu1 }
 0x3b3   :  { %v5758_v11 = vmax.f32 %v5576_v27, 0.0 }
 0x3b4   :  { %v5353_v56 = vpop.f32.mrf.mxu0  ;;  %v5578_v24 = vpop.f32.mrf.mxu1 }
 0x3b5   :  { %v12002_v51 = vadd.f32 %v5353_v56, %v12620_v47  ;;  %v5579_v7 = vadd.f32 %v5578_v24, %v11917_v39  ;;  %v12622_v56 = vld [vmem:[#allocation30_spill] sm:$0xff] }
 0x3b6   :  { %v5355_v33 = vpop.f32.mrf.mxu0  ;;  %v5580_v34 = vpop.f32.mrf.mxu1 }
 0x3b7   :  { %v5759_v57 = vmax.f32 %v5579_v7, 0.0 }
 0x3b8   :  { %v5358_v37 = vpop.f32.mrf.mxu0  ;;  %v5583_v19 = vpop.f32.mrf.mxu1 }
 0x3b9   :  { %v12005_v59 = vpack.c.bf16 %v5759_v57, %v5758_v11  ;;  %v12008_v2 = vadd.f32 %v5358_v37, %v12621_v45  ;;  %v5584_v36 = vadd.f32 %v5583_v19, %v11923_v48  ;;  %v12623_v37 = vld [vmem:[#allocation31_spill] sm:$0xff] }
 0x3ba   :  { %v5360_v35 = vpop.f32.mrf.mxu0  ;;  %v5585_v29 = vpop.f32.mrf.mxu1 }
 0x3bb   :  { %v5760_v7 = vmax.f32 %v5584_v36, 0.0 }
 0x3bc   :  { %v5361_v42 = vpop.f32.mrf.mxu0  ;;  %v5586_v50 = vpop.f32.mrf.mxu1 }
 0x3bd   :  { %v12012_v47 = vadd.f32 %v5361_v42, %v12622_v56  ;;  %v5587_v39 = vadd.f32 %v5586_v50, %v11933_v4  ;;  %v12624_v42 = vld [vmem:[#allocation26_spill] sm:$0xff] }
 0x3be   :  { %v5363_v27 = vpop.f32.mrf.mxu0  ;;  %v5588_v24 = vpop.f32.mrf.mxu1 }
 0x3bf   :  { %v5761_v33 = vmax.f32 %v5587_v39, 0.0 }
 0x3c0   :  { %v5366_v34 = vpop.f32.mrf.mxu0  ;;  %v5591_v11 = vpop.f32.mrf.mxu1 }
 0x3c1   :  { %v5811_v57 = vpack.c.bf16 %v5761_v33, %v5760_v7  ;;  %v12016_v45 = vadd.f32 %v5366_v34, %v12623_v37  ;;  %v5592_v48 = vadd.f32 %v5591_v11, %v11939_v18  ;;  %v12625_v34 = vld [vmem:[#allocation27_spill] sm:$0xff]  ;;  %v12626_v18 = vld [vmem:[#allocation17_spill] sm:$0xff] }
 0x3c2   :  { %v5368_v35 = vpop.f32.mrf.mxu0  ;;  %v5593_v29 = vpop.f32.mrf.mxu1  ;;  %v5314_v11 = vadd.f32 %v11952_v49, %v12626_v18 }
 0x3c3   :  { %v5762_v39 = vmax.f32 %v5592_v48, 0.0 }
 0x3c4   :  { %v5369_v19 = vpop.f32.mrf.mxu0  ;;  %v5594_v55 = vpop.f32.mrf.mxu1 }
 0x3c5   :  { %v12020_v56 = vadd.f32 %v5369_v19, %v12624_v42  ;;  %v5595_v4 = vadd.f32 %v5594_v55, %v11943_v22 }
 0x3c6   :  { %v5371_v50 = vpop.f32.mrf.mxu0  ;;  %v5596_v36 = vpop.f32.mrf.mxu1 }
 0x3c7   :  { %v5763_v27 = vmax.f32 %v5595_v4, 0.0 }
 0x3c8   :  { %v5374_v24 = vpop.f32.mrf.mxu0  ;;  %v5599_v7 = vpop.f32.mrf.mxu1 }
 0x3c9   :  { %v5812_v33 = vpack.c.bf16 %v5763_v27, %v5762_v39  ;;  %v12024_v37 = vadd.f32 %v5374_v24, %v12625_v34  ;;  %v5600_v19 = vadd.f32 %v5599_v7, %v11949_v10  ;;  %v12627_v34 = vld [vmem:[#allocation21_spill] sm:$0xff] }
 0x3ca   :  { %v5376_v35 = vpop.f32.mrf.mxu0  ;;  %v5601_v29 = vpop.f32.mrf.mxu1 }
 0x3cb   :  { %v5764_v50 = vmax.f32 %v5600_v19, 0.0 }
 0x3cc   :  { %v5377_v42 = vpop.f32.mrf.mxu0  ;;  %v5602_v13 = vpop.f32.mrf.mxu1 }
 0x3cd   :  { %v12030_v55 = vadd.f32 %v5377_v42, %v11646_v15  ;;  %v5603_v22 = vadd.f32 %v5602_v13, %v5314_v11 }
 0x3ce   :  { %v5379_v48 = vpop.f32.mrf.mxu0  ;;  %v5604_v4 = vpop.f32.mrf.mxu1 }
 0x3cf   :  { %v5765_v36 = vmax.f32 %v5603_v22, 0.0 }
 0x3d0   :  { %v5382_v39 = vpop.f32.mrf.mxu0  ;;  %v5607_v27 = vpop.f32.mrf.mxu1 }
 0x3d1   :  { %v5813_v24 = vpack.c.bf16 %v5765_v36, %v5764_v50  ;;  %v12033_v35 = vadd.f32 %v5382_v39, %v12627_v34  ;;  %v5608_v49 = vadd.f32 %v5607_v27, %v11958_v52 }
 0x3d2   :  { %v5384_v29 = vpop.f32.mrf.mxu0  ;;  %v5609_v10 = vpop.f32.mrf.mxu1 }
 0x3d3   :  { %7986 = vmatprep.subr.bf16.mxu0 %v5813_v24  ;;  %v5766_v42 = vmax.f32 %v5608_v49, 0.0 }
 0x3d4   :  { %v5385_v7 = vpop.f32.mrf.mxu0  ;;  %v5610_v18 = vpop.f32.mrf.mxu1  ;;  %7987 = vmatpush3.bf16.msra.mxu0 %v11955_v61 }
 0x3d5   :  { %v12038_v15 = vadd.f32 %v5385_v7, %v11669_v31  ;;  %v5611_v13 = vadd.f32 %v5610_v18, %v11962_v1  ;;  %7988 = vmatprep.subr.bf16.mxu0 %v5812_v33 }
 0x3d6   :  { %v5387_v11 = vpop.f32.mrf.mxu0  ;;  %v5612_v19 = vpop.f32.mrf.mxu1 }
 0x3d7   :  { %v5767_v22 = vmax.f32 %v5611_v13, 0.0 }
 0x3d8   :  { %v5390_v48 = vpop.f32.mrf.mxu0  ;;  %v5615_v4 = vpop.f32.mrf.mxu1  ;;  %7989 = vmatpush3.bf16.msra.mxu0 %v11946_v12 }
 0x3d9   :  { %v12042_v52 = vpack.c.bf16 %v5767_v22, %v5766_v42  ;;  %v12045_v50 = vadd.f32 %v5390_v48, %v11674_v32  ;;  %v5616_v61 = vadd.f32 %v5615_v4, %v11968_v8  ;;  %7990 = vmatprep.subr.bf16.mxu0 %v5811_v57 }
 0x3da   :  { %v5392_v31 = vpop.f32.mrf.mxu0  ;;  %v5617_v36 = vpop.f32.mrf.mxu1 }
 0x3db   :  { %v5768_v32 = vmax.f32 %v5616_v61, 0.0 }
 0x3dc   :  { %v5393_v1 = vpop.f32.mrf.mxu0  ;;  %v5618_v33 = vpop.f32.mrf.mxu1  ;;  %7991 = vmatpush3.bf16.msra.mxu0 %v11936_v6 }
 0x3dd   :  { %v12050_v39 = vadd.f32 %v5393_v1, %v11695_v0  ;;  %v5619_v27 = vadd.f32 %v5618_v33, %v11972_v16  ;;  %7992 = vmatprep.subr.bf16.mxu0 %v12005_v59  ;;  %v8728_v1 = vld [vmem:[#allocation3 + $0x24] ss:$16 sps:$4 sm:$0xff]   ;;  %v8773_v33 = vld [vmem:[#allocation3 + $0xc] ss:$16 sps:$4 sm:$0xff]  }
 0x3de   :  { %v5395_v12 = vpop.f32.mrf.mxu0  ;;  %v5620_v24 = vpop.f32.mrf.mxu1  ;;  %6599 = vmatprep.mubr.bf16.mxu1 %v8773_v33 }
 0x3df   :  { %v5769_v34 = vmax.f32 %v5619_v27, 0.0 }
 0x3e0   :  { %v5398_v49 = vpop.f32.mrf.mxu0  ;;  %v5623_v8 = vpop.f32.mrf.mxu1  ;;  %7993 = vmatpush3.bf16.msra.mxu0 %v11920_v53 }
 0x3e1   :  { %v12055_v57 = vpack.c.bf16 %v5769_v34, %v5768_v32  ;;  %v12058_v29 = vadd.f32 %v5398_v49, %v11700_v63  ;;  %v5624_v0 = vadd.f32 %v5623_v8, %v11978_v62  ;;  %7994 = vmatprep.subr.bf16.mxu0 %v11995_v38 }
 0x3e2   :  { %v5400_v6 = vpop.f32.mrf.mxu0  ;;  %v5625_v16 = vpop.f32.mrf.mxu1 }
 0x3e3   :  { %v5770_v13 = vmax.f32 %v5624_v0, 0.0 }
 0x3e4   :  { %v5401_v59 = vpop.f32.mrf.mxu0  ;;  %v5626_v10 = vpop.f32.mrf.mxu1  ;;  %7995 = vmatpush3.bf16.msra.mxu0 %v11904_v25 }
 0x3e5   :  { %v12064_v7 = vadd.f32 %v5401_v59, %v11721_v41  ;;  %v5627_v53 = vadd.f32 %v5626_v10, %v11982_v30  ;;  %7996 = vmatprep.subr.bf16.mxu0 %v11985_v44 }
 0x3e6   :  { %v5403_v18 = vpop.f32.mrf.mxu0  ;;  %v5628_v63 = vpop.f32.mrf.mxu1 }
 0x3e7   :  { %v5771_v11 = vmax.f32 %v5627_v53, 0.0 }
 0x3e8   :  { %v5406_v62 = vpop.f32.mrf.mxu0  ;;  %v5631_v19 = vpop.f32.mrf.mxu1  ;;  %7997 = vmatpush3.bf16.msra.mxu0 %v11888_v60 }
 0x3e9   :  { %v12069_v38 = vpack.c.bf16 %v5771_v11, %v5770_v13  ;;  %v12072_v42 = vadd.f32 %v5406_v62, %v11726_v54  ;;  %v5632_v41 = vadd.f32 %v5631_v19, %v11988_v46  ;;  %7998 = vmatprep.subr.bf16.mxu0 %v11975_v28  ;;  %v8723_v46 = vld [vmem:[#allocation3] ss:$16 sps:$4 sm:$0xff]  }
 0x3ea   :  { %v5408_v25 = vpop.f32.mrf.mxu0  ;;  %v5633_v30 = vpop.f32.mrf.mxu1 }
 0x3eb   :  { %v5772_v61 = vmax.f32 %v5632_v41, 0.0  ;;  %v8729_v30 = vld [vmem:[#allocation3 + $0x40] ss:$16 sps:$4 sm:$0xff]  }
 0x3ec   :  { %v5409_v44 = vpop.f32.mrf.mxu0  ;;  %v5634_v22 = vpop.f32.mrf.mxu1  ;;  %7999 = vmatpush3.bf16.msra.mxu0 %v11872_v58 }
 0x3ed   :  { %v12078_v48 = vadd.f32 %v5409_v44, %v11747_v43  ;;  %v5635_v60 = vadd.f32 %v5634_v22, %v11992_v26  ;;  %8000 = vmatprep.subr.bf16.mxu0 %v11965_v5  ;;  %v8734_v22 = vld [vmem:[#allocation3 + $0x64] ss:$16 sps:$4 sm:$0xff]  }
 0x3ee   :  { %v5411_v4 = vpop.f32.mrf.mxu0  ;;  %v5636_v54 = vpop.f32.mrf.mxu1 }
 0x3ef   :  { %v5773_v31 = vmax.f32 %v5635_v60, 0.0 }
 0x3f0   :  { %v5414_v36 = vpop.f32.mrf.mxu0  ;;  %v5639_v28 = vpop.f32.mrf.mxu1  ;;  %8001 = vmatpush3.bf16.msra.mxu0 %v11856_v14 }
 0x3f1   :  { %v12083_v27 = vpack.c.bf16 %v5773_v31, %v5772_v61  ;;  %v12086_v43 = vadd.f32 %v5414_v36, %v11752_v9  ;;  %v5640_v58 = vadd.f32 %v5639_v28, %v11998_v40  ;;  %v8726_v9 = vld [vmem:[#allocation3 + $0x20] ss:$16 sps:$4 sm:$0xff]   ;;  %v8731_v40 = vld [vmem:[#allocation3 + $0x44] ss:$16 sps:$4 sm:$0xff]  }
 0x3f2   :  { %v5416_v26 = vpop.f32.mrf.mxu0  ;;  %v5641_v5 = vpop.f32.mrf.mxu1 }
 0x3f3   :  { %6439 = vmatmul.mubr.bf16.vlgmr.msra.gmra.mxu0 %v8723_v46  ;;  %v5774_v8 = vmax.f32 %v5640_v58, 0.0  ;;  %v8732_v58 = vld [vmem:[#allocation3 + $0x60] ss:$16 sps:$4 sm:$0xff]   ;;  %v8737_v5 = vld [vmem:[#allocation3 + $0x84] ss:$16 sps:$4 sm:$0xff]  }
 0x3f4   :  { %v5417_v12 = vpop.f32.mrf.mxu0  ;;  %v5642_v24 = vpop.f32.mrf.mxu1  ;;  %6446 = vmatprep.mubr.bf16.mxu0 %v8728_v1 }
 0x3f5   :  { %v12090_v32 = vadd.f32 %v5417_v12, %v11773_v17  ;;  %v5643_v14 = vadd.f32 %v5642_v24, %v12002_v51  ;;  %v12628_v12 = vld [vmem:[#allocation22_spill] sm:$0xff] }
 0x3f6   :  { %v5419_v34 = vpop.f32.mrf.mxu0  ;;  %v5644_v49 = vpop.f32.mrf.mxu1 }
 0x3f7   :  { %v5775_v0 = vmax.f32 %v5643_v14, 0.0 }
 0x3f8   :  { %v5422_v6 = vpop.f32.mrf.mxu0  ;;  %v5647_v16 = vpop.f32.mrf.mxu1 }
 0x3f9   :  { %v12093_v59 = vpack.c.bf16 %v5775_v0, %v5774_v8  ;;  %v12096_v10 = vadd.f32 %v5422_v6, %v11778_v23  ;;  %v5648_v53 = vadd.f32 %v5647_v16, %v12008_v2 }
 0x3fa   :  { %v5424_v18 = vpop.f32.mrf.mxu0  ;;  %v5649_v17 = vpop.f32.mrf.mxu1 }
 0x3fb   :  { %6447 = vmatmul.mubr.bf16.gmra.mxu0 %v8726_v9  ;;  %v5776_v41 = vmax.f32 %v5648_v53, 0.0  ;;  %v8740_v18 = vld [vmem:[#allocation3 + $0xa4] ss:$16 sps:$4 sm:$0xff]  }
 0x3fc   :  { %v5425_v63 = vpop.f32.mrf.mxu0  ;;  %v5650_v51 = vpop.f32.mrf.mxu1  ;;  %6454 = vmatprep.mubr.bf16.mxu0 %v8731_v40  ;;  %v8735_v40 = vld [vmem:[#allocation3 + $0x80] ss:$16 sps:$4 sm:$0xff]  }
 0x3fd   :  { %v12100_v13 = vadd.f32 %v5425_v63, %v11799_v21  ;;  %v5651_v11 = vadd.f32 %v5650_v51, %v12012_v47 }
 0x3fe   :  { %v5427_v62 = vpop.f32.mrf.mxu0  ;;  %v5652_v19 = vpop.f32.mrf.mxu1 }
 0x3ff   :  { %v5777_v25 = vmax.f32 %v5651_v11, 0.0 }
 0x400   :  { %v5430_v23 = vpop.f32.mrf.mxu0  ;;  %v5655_v44 = vpop.f32.mrf.mxu1 }
 0x401   :  { %v12103_v2 = vpack.c.bf16 %v5777_v25, %v5776_v41  ;;  %v12106_v60 = vadd.f32 %v5430_v23, %v11804_v20  ;;  %v5656_v4 = vadd.f32 %v5655_v44, %v12016_v45  ;;  %v8738_v41 = vld [vmem:[#allocation3 + $0xa0] ss:$16 sps:$4 sm:$0xff]  }
 0x402   :  { %v5432_v54 = vpop.f32.mrf.mxu0  ;;  %v5657_v21 = vpop.f32.mrf.mxu1 }
 0x403   :  { %6455 = vmatmul.mubr.bf16.gmra.mxu0 %v8729_v30  ;;  %v5778_v1 = vmax.f32 %v5656_v4, 0.0  ;;  %v8743_v30 = vld [vmem:[#allocation3 + $0xc4] ss:$16 sps:$4 sm:$0xff]  }
 0x404   :  { %v5433_v61 = vpop.f32.mrf.mxu0  ;;  %v5658_v47 = vpop.f32.mrf.mxu1  ;;  %6462 = vmatprep.mubr.bf16.mxu0 %v8734_v22 }
 0x405   :  { %v12110_v31 = vadd.f32 %v5433_v61, %v11819_v3  ;;  %v5659_v46 = vadd.f32 %v5658_v47, %v12020_v56 }
 0x406   :  { %v5435_v36 = vpop.f32.mrf.mxu0  ;;  %v5660_v28 = vpop.f32.mrf.mxu1 }
 0x407   :  { %v5779_v33 = vmax.f32 %v5659_v46, 0.0  ;;  %v8746_v46 = vld [vmem:[#allocation3 + $0xe4] ss:$16 sps:$4 sm:$0xff]  }
 0x408   :  { %v5438_v20 = vpop.f32.mrf.mxu0  ;;  %v5663_v26 = vpop.f32.mrf.mxu1 }
 0x409   :  { %v12113_v45 = vpack.c.bf16 %v5779_v33, %v5778_v1  ;;  %v12116_v24 = vadd.f32 %v5438_v20, %v12628_v12  ;;  %v5664_v14 = vadd.f32 %v5663_v26, %v12024_v37  ;;  %v8749_v12 = vld [vmem:[#allocation3 + $0x104] ss:$16 sps:$4 sm:$0xff]  }
 0x40a   :  { %v5440_v34 = vpop.f32.mrf.mxu0  ;;  %v5665_v3 = vpop.f32.mrf.mxu1 }
 0x40b   :  { %6463 = vmatmul.mubr.bf16.gmra.mxu0 %v8732_v58  ;;  %v5780_v6 = vmax.f32 %v5664_v14, 0.0 }
 0x40c   :  { %v12119_v49 = vpop.f32.mrf.mxu0  ;;  %v5666_v56 = vpop.f32.mrf.mxu1  ;;  %6470 = vmatprep.mubr.bf16.mxu0 %v8737_v5 }
 0x40d   :  { %v5667_v8 = vadd.f32 %v5666_v56, %v12030_v55 }
 0x40e   :  { %v5668_v0 = vpop.f32.mrf.mxu1  ;;  %v5443_v9 = vpop.f32.mrf.mxu0 }
 0x40f   :  { %v5781_v16 = vmax.f32 %v5667_v8, 0.0 }
 0x410   :  { %v5671_v53 = vpop.f32.mrf.mxu1 }
 0x411   :  { %v12122_v17 = vpack.c.bf16 %v5781_v16, %v5780_v6  ;;  %v5672_v37 = vadd.f32 %v5671_v53, %v12033_v35  ;;  %v8752_v16 = vld [vmem:[#allocation3 + $0x124] ss:$16 sps:$4 sm:$0xff]  }
 0x412   :  { %v5673_v63 = vpop.f32.mrf.mxu1 }
 0x413   :  { %6471 = vmatmul.mubr.bf16.gmra.mxu0 %v8735_v40  ;;  %v5782_v19 = vmax.f32 %v5672_v37, 0.0 }
 0x414   :  { %v5674_v51 = vpop.f32.mrf.mxu1  ;;  %6478 = vmatprep.mubr.bf16.mxu0 %v8740_v18 }
 0x415   :  { %v5675_v11 = vadd.f32 %v5674_v51, %v12038_v15  ;;  %v8741_v15 = vld [vmem:[#allocation3 + $0xc0] ss:$16 sps:$4 sm:$0xff]  }
 0x416   :  { %v5676_v62 = vpop.f32.mrf.mxu1 }
 0x417   :  { %v5783_v55 = vmax.f32 %v5675_v11, 0.0 }
 0x418   :  { %v5679_v25 = vpop.f32.mrf.mxu1 }
 0x419   :  { %v12126_v23 = vpack.c.bf16 %v5783_v55, %v5782_v19  ;;  %v5680_v44 = vadd.f32 %v5679_v25, %v12045_v50  ;;  %v8755_v19 = vld [vmem:[#allocation3 + $0x144] ss:$16 sps:$4 sm:$0xff]  }
 0x41a   :  { %v5681_v22 = vpop.f32.mrf.mxu1 }
 0x41b   :  { %6479 = vmatmul.mubr.bf16.gmra.mxu0 %v8738_v41  ;;  %v5784_v21 = vmax.f32 %v5680_v44, 0.0 }
 0x41c   :  { %v5682_v4 = vpop.f32.mrf.mxu1  ;;  %6486 = vmatprep.mubr.bf16.mxu0 %v8743_v30 }
 0x41d   :  { %v5683_v35 = vadd.f32 %v5682_v4, %v12050_v39  ;;  %v8744_v39 = vld [vmem:[#allocation3 + $0xe0] ss:$16 sps:$4 sm:$0xff]  }
 0x41e   :  { %v5684_v54 = vpop.f32.mrf.mxu1 }
 0x41f   :  { %v5785_v61 = vmax.f32 %v5683_v35, 0.0  ;;  %v8753_v35 = vld [vmem:[#allocation3 + $0x140] ss:$16 sps:$4 sm:$0xff]   ;;  %v8758_v54 = vld [vmem:[#allocation3 + $0x164] ss:$16 sps:$4 sm:$0xff]  }
 0x420   :  { %v5687_v47 = vpop.f32.mrf.mxu1 }
 0x421   :  { %v12130_v36 = vpack.c.bf16 %v5785_v61, %v5784_v21  ;;  %v5688_v1 = vadd.f32 %v5687_v47, %v12058_v29 }
 0x422   :  { %v5689_v28 = vpop.f32.mrf.mxu1 }
 0x423   :  { %6487 = vmatmul.mubr.bf16.gmra.mxu0 %v8741_v15  ;;  %v5786_v20 = vmax.f32 %v5688_v1, 0.0 }
 0x424   :  { %v5690_v33 = vpop.f32.mrf.mxu1  ;;  %6494 = vmatprep.mubr.bf16.mxu0 %v8746_v46 }
 0x425   :  { %v5691_v50 = vadd.f32 %v5690_v33, %v12064_v7  ;;  %v8747_v7 = vld [vmem:[#allocation3 + $0x100] ss:$16 sps:$4 sm:$0xff]  }
 0x426   :  { %v5692_v58 = vpop.f32.mrf.mxu1  ;;  %v8756_v33 = vld [vmem:[#allocation3 + $0x160] ss:$16 sps:$4 sm:$0xff]  }
 0x427   :  { %v5787_v26 = vmax.f32 %v5691_v50, 0.0  ;;  %v8761_v50 = vld [vmem:[#allocation3 + $0x184] ss:$16 sps:$4 sm:$0xff]  }
 0x428   :  { %v5695_v5 = vpop.f32.mrf.mxu1 }
 0x429   :  { %v12134_v14 = vpack.c.bf16 %v5787_v26, %v5786_v20  ;;  %v5696_v3 = vadd.f32 %v5695_v5, %v12072_v42  ;;  %v12629_v26 = vld [vmem:[#allocation41_spill] sm:$0xff] }
 0x42a   :  { %v5697_v34 = vpop.f32.mrf.mxu1 }
 0x42b   :  { %6495 = vmatmul.mubr.bf16.gmra.mxu0 %v8744_v39  ;;  %v5788_v0 = vmax.f32 %v5696_v3, 0.0  ;;  %v5442_v39 = vadd.f32 %v12119_v49, %v12629_v26  ;;  %v8765_v49 = vld [vmem:[#allocation3 + $0x1c0] ss:$16 sps:$4 sm:$0xff]  }
 0x42c   :  { %v5698_v56 = vpop.f32.mrf.mxu1  ;;  %6502 = vmatprep.mubr.bf16.mxu0 %v8749_v12 }
 0x42d   :  { %v5699_v29 = vadd.f32 %v5698_v56, %v12078_v48  ;;  %v8750_v48 = vld [vmem:[#allocation3 + $0x120] ss:$16 sps:$4 sm:$0xff]  }
 0x42e   :  { %v5700_v8 = vpop.f32.mrf.mxu1  ;;  %v8759_v56 = vld [vmem:[#allocation3 + $0x180] ss:$16 sps:$4 sm:$0xff]  }
 0x42f   :  { %v5789_v9 = vmax.f32 %v5699_v29, 0.0  ;;  %v8764_v29 = vld [vmem:[#allocation3 + $0x1a4] ss:$16 sps:$4 sm:$0xff]  }
 0x430   :  { %v5703_v6 = vpop.f32.mrf.mxu1 }
 0x431   :  { %v12138_v40 = vpack.c.bf16 %v5789_v9, %v5788_v0  ;;  %v5704_v18 = vadd.f32 %v5703_v6, %v12086_v43  ;;  %v8762_v0 = vld [vmem:[#allocation3 + $0x1a0] ss:$16 sps:$4 sm:$0xff]   ;;  %v8770_v9 = vld [vmem:[#allocation3 + $0x1e4] ss:$16 sps:$4 sm:$0xff]   ;;  %v8791_v6 = vld [vmem:[#allocation3 + $0xcc] ss:$16 sps:$4 sm:$0xff]  }
 0x432   :  { %v5705_v53 = vpop.f32.mrf.mxu1 }
 0x433   :  { %6503 = vmatmul.mubr.bf16.gmra.mxu0 %v8747_v7  ;;  %v5790_v51 = vmax.f32 %v5704_v18, 0.0  ;;  %v8782_v7 = vld [vmem:[#allocation3 + $0x6c] ss:$16 sps:$4 sm:$0xff]   ;;  %v8792_v53 = vld [vmem:[#allocation3 + $0xe8] ss:$16 sps:$4 sm:$0xff]  }
 0x434   :  { %v5706_v37 = vpop.f32.mrf.mxu1  ;;  %6510 = vmatprep.mubr.bf16.mxu0 %v8752_v16  ;;  %v8789_v16 = vld [vmem:[#allocation3 + $0xc8] ss:$16 sps:$4 sm:$0xff]   ;;  %v8797_v18 = vld [vmem:[#allocation3 + $0x10c] ss:$16 sps:$4 sm:$0xff]  }
 0x435   :  { %v5707_v42 = vadd.f32 %v5706_v37, %v12090_v32  ;;  %v8795_v37 = vld [vmem:[#allocation3 + $0x108] ss:$16 sps:$4 sm:$0xff]  }
 0x436   :  { %v5708_v63 = vpop.f32.mrf.mxu1 }
 0x437   :  { %v5791_v11 = vmax.f32 %v5707_v42, 0.0  ;;  %v8800_v42 = vld [vmem:[#allocation3 + $0x12c] ss:$16 sps:$4 sm:$0xff]  }
 0x438   :  { %v5711_v62 = vpop.f32.mrf.mxu1 }
 0x439   :  { %v5826_v55 = vpack.c.bf16 %v5791_v11, %v5790_v51  ;;  %v5712_v25 = vadd.f32 %v5711_v62, %v12096_v10  ;;  %v8798_v62 = vld [vmem:[#allocation3 + $0x128] ss:$16 sps:$4 sm:$0xff]  }
 0x43a   :  { %v5713_v41 = vpop.f32.mrf.mxu1 }
 0x43b   :  { %6511 = vmatmul.mubr.bf16.gmra.mxu0 %v8750_v48  ;;  %v5792_v22 = vmax.f32 %v5712_v25, 0.0 }
 0x43c   :  { %v5714_v30 = vpop.f32.mrf.mxu1  ;;  %6518 = vmatprep.mubr.bf16.mxu0 %v8755_v19  ;;  %v8803_v19 = vld [vmem:[#allocation3 + $0x14c] ss:$16 sps:$4 sm:$0xff]  }
 0x43d   :  { %v5715_v43 = vadd.f32 %v5714_v30, %v12100_v13 }
 0x43e   :  { %v5716_v44 = vpop.f32.mrf.mxu1 }
 0x43f   :  { %v5793_v4 = vmax.f32 %v5715_v43, 0.0 }
 0x440   :  { %v5719_v32 = vpop.f32.mrf.mxu1 }
 0x441   :  { %v5827_v21 = vpack.c.bf16 %v5793_v4, %v5792_v22  ;;  %v5720_v15 = vadd.f32 %v5719_v32, %v12106_v60  ;;  %v8801_v22 = vld [vmem:[#allocation3 + $0x148] ss:$16 sps:$4 sm:$0xff]   ;;  %v8806_v4 = vld [vmem:[#allocation3 + $0x16c] ss:$16 sps:$4 sm:$0xff]  }
 0x442   :  { %v5721_v61 = vpop.f32.mrf.mxu1 }
 0x443   :  { %6519 = vmatmul.mubr.bf16.gmra.mxu0 %v8753_v35  ;;  %v5794_v28 = vmax.f32 %v5720_v15, 0.0 }
 0x444   :  { %v5722_v47 = vpop.f32.mrf.mxu1  ;;  %6526 = vmatprep.mubr.bf16.mxu0 %v8758_v54 }
 0x445   :  { %v5723_v10 = vadd.f32 %v5722_v47, %v12110_v31  ;;  %v8804_v47 = vld [vmem:[#allocation3 + $0x168] ss:$16 sps:$4 sm:$0xff]  }
 0x446   :  { %v5724_v46 = vpop.f32.mrf.mxu1 }
 0x447   :  { %v5795_v1 = vmax.f32 %v5723_v10, 0.0  ;;  %v8809_v10 = vld [vmem:[#allocation3 + $0x18c] ss:$16 sps:$4 sm:$0xff]  }
 0x448   :  { %v5727_v13 = vpop.f32.mrf.mxu1 }
 0x449   :  { %v5828_v58 = vpack.c.bf16 %v5795_v1, %v5794_v28  ;;  %v5728_v5 = vadd.f32 %v5727_v13, %v12116_v24  ;;  %v8767_v24 = vld [vmem:[#allocation3 + $0x1c4] ss:$16 sps:$4 sm:$0xff]  }
 0x44a   :  { %v5729_v20 = vpop.f32.mrf.mxu1 }
 0x44b   :  { %6527 = vmatmul.mubr.bf16.gmra.mxu0 %v8756_v33  ;;  %v5796_v3 = vmax.f32 %v5728_v5, 0.0  ;;  %v8812_v20 = vld [vmem:[#allocation3 + $0x1ac] ss:$16 sps:$4 sm:$0xff]  }
 0x44c   :  { %v5730_v60 = vpop.f32.mrf.mxu1  ;;  %6534 = vmatprep.mubr.bf16.mxu0 %v8761_v50 }
 0x44d   :  { %v5731_v12 = vadd.f32 %v5730_v60, %v5442_v39 }
 0x44e   :  { %v5732_v34 = vpop.f32.mrf.mxu1 }
 0x44f   :  { %v5797_v31 = vmax.f32 %v5731_v12, 0.0 }
 0x451   :  { %v5829_v8 = vpack.c.bf16 %v5797_v31, %v5796_v3  ;;  %v8810_v3 = vld [vmem:[#allocation3 + $0x1a8] ss:$16 sps:$4 sm:$0xff]   ;;  %v8815_v31 = vld [vmem:[#allocation3 + $0x1cc] ss:$16 sps:$4 sm:$0xff]  }
 0x453   :  { %6535 = vmatmul.mubr.bf16.gmra.mxu0 %v8759_v56  ;;  %8098 = vmatprep.subr.bf16.mxu1 %v5829_v8  ;;  %v12181_v8 = vpop.permute.xlu0 %6078 }
 0x454   :  { %8099 = vmatpush3.bf16.msra.mxu1 %v12122_v17  ;;  %6542 = vmatprep.mubr.bf16.mxu0 %v8764_v29  ;;  %v8779_v17 = vld [vmem:[#allocation3 + $0x4c] ss:$16 sps:$4 sm:$0xff]  }
 0x455   :  { %8100 = vmatprep.subr.bf16.mxu1 %v5828_v58  ;;  %v8807_v58 = vld [vmem:[#allocation3 + $0x188] ss:$16 sps:$4 sm:$0xff]  }
 0x458   :  { %8101 = vmatpush3.bf16.msra.mxu1 %v12113_v45  ;;  %v8768_v45 = vld [vmem:[#allocation3 + $0x1e0] ss:$16 sps:$4 sm:$0xff]  }
 0x459   :  { %8102 = vmatprep.subr.bf16.mxu1 %v5827_v21 }
 0x45b   :  { %6543 = vmatmul.mubr.bf16.gmra.mxu0 %v8762_v0 }
 0x45c   :  { %8103 = vmatpush3.bf16.msra.mxu1 %v12103_v2  ;;  %6550 = vmatprep.mubr.bf16.mxu0 %v8767_v24  ;;  %v8776_v2 = vld [vmem:[#allocation3 + $0x2c] ss:$16 sps:$4 sm:$0xff]  }
 0x45d   :  { %8104 = vmatprep.subr.bf16.mxu1 %v5826_v55 }
 0x460   :  { %8105 = vmatpush3.bf16.msra.mxu1 %v12093_v59  ;;  %v8771_v59 = vld [vmem:[#allocation3 + $0x8] ss:$16 sps:$4 sm:$0xff]  }
 0x461   :  { %8106 = vmatprep.subr.bf16.mxu1 %v12138_v40  ;;  %v8794_v40 = vld [vmem:[#allocation3 + $0xec] ss:$16 sps:$4 sm:$0xff]  }
 0x463   :  { %6551 = vmatmul.mubr.bf16.gmra.mxu0 %v8765_v49 }
 0x464   :  { %8107 = vmatpush3.bf16.msra.mxu1 %v12083_v27  ;;  %6558 = vmatprep.mubr.bf16.mxu0 %v8770_v9  ;;  %v8774_v27 = vld [vmem:[#allocation3 + $0x28] ss:$16 sps:$4 sm:$0xff]   ;;  %v12185_v9 = vpop.permute.xlu1 %6083 }
 0x465   :  { %8108 = vmatprep.subr.bf16.mxu1 %v12134_v14  ;;  %v8777_v14 = vld [vmem:[#allocation3 + $0x48] ss:$16 sps:$4 sm:$0xff]  }
 0x468   :  { %8109 = vmatpush3.bf16.msra.mxu1 %v12069_v38  ;;  %v8780_v38 = vld [vmem:[#allocation3 + $0x68] ss:$16 sps:$4 sm:$0xff]  }
 0x469   :  { %8110 = vmatprep.subr.bf16.mxu1 %v12130_v36  ;;  %v8785_v36 = vld [vmem:[#allocation3 + $0x8c] ss:$16 sps:$4 sm:$0xff]  }
 0x46b   :  { %6559 = vmatmul.mubr.bf16.gmra.mxu0 %v8768_v45 }
 0x46c   :  { %8111 = vmatpush3.bf16.msra.mxu1 %v12055_v57  ;;  %v8783_v57 = vld [vmem:[#allocation3 + $0x88] ss:$16 sps:$4 sm:$0xff]  }
 0x46d   :  { %8112 = vmatprep.subr.bf16.mxu1 %v12126_v23  ;;  %v8788_v23 = vld [vmem:[#allocation3 + $0xac] ss:$16 sps:$4 sm:$0xff]  }
 0x470   :  { %8113 = vmatpush3.bf16.msra.mxu1 %v12042_v52  ;;  %v8786_v52 = vld [vmem:[#allocation3 + $0xa8] ss:$16 sps:$4 sm:$0xff]  }
 0x473   :  { %6600 = vmatmul.mubr.bf16.vlgmr.msra.gmra.mxu1 %v8771_v59  ;;  %v8813_v59 = vld [vmem:[#allocation3 + $0x1c8] ss:$16 sps:$4 sm:$0xff]  }
 0x474   :  { %6607 = vmatprep.mubr.bf16.mxu1 %v8776_v2  ;;  %v8818_v2 = vld [vmem:[#allocation3 + $0x1ec] ss:$16 sps:$4 sm:$0xff]  }
 0x47b   :  { %6608 = vmatmul.mubr.bf16.gmra.mxu1 %v8774_v27  ;;  %v12187_v27 = vpop.permute.xlu0 %5998 }
 0x47c   :  { %6615 = vmatprep.mubr.bf16.mxu1 %v8779_v17 }
 0x483   :  { %6616 = vmatmul.mubr.bf16.gmra.mxu1 %v8777_v14 }
 0x484   :  { %6623 = vmatprep.mubr.bf16.mxu1 %v8782_v7 }
 0x48b   :  { %6624 = vmatmul.mubr.bf16.gmra.mxu1 %v8780_v38  ;;  %v12191_v38 = vpop.permute.xlu1 %6003 }
 0x48c   :  { %6631 = vmatprep.mubr.bf16.mxu1 %v8785_v36 }
 0x493   :  { %6632 = vmatmul.mubr.bf16.gmra.mxu1 %v8783_v57 }
 0x494   :  { %6639 = vmatprep.mubr.bf16.mxu1 %v8788_v23  ;;  %v12195_v23 = vpop.permute.xlu0 %6068 }
 0x49b   :  { %6640 = vmatmul.mubr.bf16.gmra.mxu1 %v8786_v52 }
 0x49c   :  { %6647 = vmatprep.mubr.bf16.mxu1 %v8791_v6  ;;  %v8816_v6 = vld [vmem:[#allocation3 + $0x1e8] ss:$16 sps:$4 sm:$0xff]  }
 0x4a3   :  { %6648 = vmatmul.mubr.bf16.gmra.mxu1 %v8789_v16 }
 0x4a4   :  { %6655 = vmatprep.mubr.bf16.mxu1 %v8794_v40 }
 0x4ab   :  { %6656 = vmatmul.mubr.bf16.gmra.mxu1 %v8792_v53  ;;  %v12199_v53 = vpop.permute.xlu1 %6073 }
 0x4ac   :  { %6663 = vmatprep.mubr.bf16.mxu1 %v8797_v18 }
 0x4b3   :  { %v8002_v63 = vpop.f32.mrf.mxu0  ;;  %6664 = vmatmul.mubr.bf16.gmra.mxu1 %v8795_v37  ;;  %v12201_v37 = vpop.permute.xlu0 %5988 }
 0x4b4   :  { %6671 = vmatprep.mubr.bf16.mxu1 %v8800_v42 }
 0x4b5   :  { %v8003_v51 = vpop.f32.mrf.mxu0 }
 0x4b6   :  { %v12161_v11 = vadd.f32 %v8003_v51, %v8002_v63 }
 0x4b7   :  { %v8005_v48 = vpop.f32.mrf.mxu0 }
 0x4b9   :  { %v8006_v55 = vpop.f32.mrf.mxu0 }
 0x4ba   :  { %v12163_v41 = vadd.f32 %v8006_v55, %v8005_v48  ;;  %v12205_v48 = vpop.permute.xlu1 %5993  ;;  %v12209_v55 = vpop.permute.xlu0 %6058 }
 0x4bb   :  { %v8008_v25 = vpop.f32.mrf.mxu0  ;;  %6672 = vmatmul.mubr.bf16.gmra.mxu1 %v8798_v62  ;;  %12630 = vst [vmem:[#allocation37_spill] sm:$0xff] %v12209_v55 }
 0x4bc   :  { %6679 = vmatprep.mubr.bf16.mxu1 %v8803_v19 }
 0x4bd   :  { %v8009_v30 = vpop.f32.mrf.mxu0 }
 0x4be   :  { %v12165_v43 = vadd.f32 %v8009_v30, %v8008_v25 }
 0x4bf   :  { %v8011_v44 = vpop.f32.mrf.mxu0 }
 0x4c1   :  { %v8012_v35 = vpop.f32.mrf.mxu0 }
 0x4c2   :  { %v12167_v32 = vadd.f32 %v8012_v35, %v8011_v44  ;;  %v12215_v35 = vpop.permute.xlu0 %5978 }
 0x4c3   :  { %v8014_v54 = vpop.f32.mrf.mxu0  ;;  %6680 = vmatmul.mubr.bf16.gmra.mxu1 %v8801_v22  ;;  %v12213_v22 = vpop.permute.xlu1 %6063 }
 0x4c4   :  { %6687 = vmatprep.mubr.bf16.mxu1 %v8806_v4 }
 0x4c5   :  { %v8015_v21 = vpop.f32.mrf.mxu0 }
 0x4c6   :  { %v12169_v61 = vadd.f32 %v8015_v21, %v8014_v54 }
 0x4c7   :  { %v8017_v15 = vpop.f32.mrf.mxu0 }
 0x4c9   :  { %v8018_v46 = vpop.f32.mrf.mxu0 }
 0x4ca   :  { %v12171_v28 = vadd.f32 %v8018_v46, %v8017_v15 }
 0x4cb   :  { %v8020_v1 = vpop.f32.mrf.mxu0  ;;  %6688 = vmatmul.mubr.bf16.gmra.mxu1 %v8804_v47  ;;  %v12219_v47 = vpop.permute.xlu1 %5983 }
 0x4cc   :  { %6695 = vmatprep.mubr.bf16.mxu1 %v8809_v10 }
 0x4cd   :  { %v8021_v33 = vpop.f32.mrf.mxu0 }
 0x4ce   :  { %v12173_v13 = vadd.f32 %v8021_v33, %v8020_v1  ;;  %v12223_v1 = vpop.permute.xlu0 %6048 }
 0x4cf   :  { %v8023_v50 = vpop.f32.mrf.mxu0  ;;  %12631 = vst [vmem:[#allocation38_spill] sm:$0xff] %v12223_v1 }
 0x4d1   :  { %v8024_v26 = vpop.f32.mrf.mxu0 }
 0x4d2   :  { %v12175_v39 = vadd.f32 %v8024_v26, %v8023_v50  ;;  %v12229_v26 = vpop.permute.xlu0 %5968 }
 0x4d3   :  { %v8026_v5 = vpop.f32.mrf.mxu0  ;;  %6696 = vmatmul.mubr.bf16.gmra.mxu1 %v8807_v58 }
 0x4d4   :  { %6703 = vmatprep.mubr.bf16.mxu1 %v8812_v20  ;;  %v12227_v20 = vpop.permute.xlu1 %6053 }
 0x4d5   :  { %v8027_v60 = vpop.f32.mrf.mxu0  ;;  %12632 = vst [vmem:[#allocation33_spill] sm:$0xff] %v12227_v20 }
 0x4d6   :  { %v12177_v12 = vadd.f32 %v8027_v60, %v8026_v5  ;;  %v12233_v60 = vpop.permute.xlu0 %6038 }
 0x4d7   :  { %v8029_v34 = vpop.f32.mrf.mxu0  ;;  %12633 = vst [vmem:[#allocation34_spill] sm:$0xff] %v12233_v60 }
 0x4d8   :  { %v12231_v5 = vpop.permute.xlu1 %5973 }
 0x4d9   :  { %v8030_v56 = vpop.f32.mrf.mxu0 }
 0x4da   :  { %v12179_v29 = vadd.f32 %v8030_v56, %v8029_v34 }
 0x4db   :  { %v8032_v0 = vpop.f32.mrf.mxu0  ;;  %6704 = vmatmul.mubr.bf16.gmra.mxu1 %v8810_v3  ;;  %v5959_v3 = vpop.permute.xlu0 %5958 }
 0x4dc   :  { %6711 = vmatprep.mubr.bf16.mxu1 %v8815_v31  ;;  %v12235_v34 = vpop.permute.xlu1 %6043 }
 0x4dd   :  { %v8033_v24 = vpop.f32.mrf.mxu0  ;;  %12634 = vst [vmem:[#allocation11_spill] sm:$0xff] %v12235_v34 }
 0x4de   :  { %v12183_v49 = vadd.f32 %v8033_v24, %v8032_v0 }
 0x4df   :  { %v8035_v45 = vpop.f32.mrf.mxu0  ;;  %v12237_v56 = vpop.permute.xlu0 %6028 }
 0x4e0   :  { %v5964_v31 = vpop.permute.xlu1 %5963 }
 0x4e1   :  { %v8036_v17 = vpop.f32.mrf.mxu0 }
 0x4e2   :  { %v12189_v14 = vadd.f32 %v8036_v17, %v8035_v45 }
 0x4e3   :  { %v8038_v7 = vpop.f32.mrf.mxu0  ;;  %6712 = vmatmul.mubr.bf16.gmra.mxu1 %v8813_v59  ;;  %v5949_v24 = vpop.permute.xlu0 %5948 }
 0x4e4   :  { %6719 = vmatprep.mubr.bf16.mxu1 %v8818_v2  ;;  %v12239_v0 = vpop.permute.xlu1 %6033 }
 0x4e5   :  { %v8039_v36 = vpop.f32.mrf.mxu0  ;;  %12635 = vst [vmem:[#allocation9_spill] sm:$0xff] %v12239_v0 }
 0x4e6   :  { %v12193_v57 = vadd.f32 %v8039_v36, %v8038_v7 }
 0x4e7   :  { %v8041_v52 = vpop.f32.mrf.mxu0  ;;  %v12241_v59 = vpop.permute.xlu0 %6018 }
 0x4e8   :  { %v5954_v45 = vpop.permute.xlu1 %5953 }
 0x4e9   :  { %v8042_v16 = vpop.f32.mrf.mxu0 }
 0x4ea   :  { %v12197_v40 = vadd.f32 %v8042_v16, %v8041_v52 }
 0x4eb   :  { %v8044_v18 = vpop.f32.mrf.mxu0  ;;  %6720 = vmatmul.mubr.bf16.gmra.mxu1 %v8816_v6  ;;  %v5939_v17 = vpop.permute.xlu0 %5938 }
 0x4ec   :  { %v12243_v2 = vpop.permute.xlu1 %6023  ;;  %v6449_v0 = vadd.f32 %v12165_v43, %v5939_v17 }
 0x4ed   :  { %v8045_v42 = vpop.f32.mrf.mxu0 }
 0x4ee   :  { %v12203_v63 = vadd.f32 %v8045_v42, %v8044_v18 }
 0x4ef   :  { %v8047_v51 = vpop.f32.mrf.mxu0  ;;  %v12245_v36 = vpop.permute.xlu0 %6008 }
 0x4f0   :  { %v5944_v7 = vpop.permute.xlu1 %5943 }
 0x4f1   :  { %v8048_v62 = vpop.f32.mrf.mxu0 }
 0x4f2   :  { %v12207_v19 = vadd.f32 %v8048_v62, %v8047_v51 }
 0x4f3   :  { %v8050_v25 = vpop.f32.mrf.mxu0  ;;  %v5929_v16 = vpop.permute.xlu0 %5928 }
 0x4f4   :  { %v12247_v52 = vpop.permute.xlu1 %6013  ;;  %v6441_v42 = vadd.f32 %v12161_v11, %v5929_v16  ;;  %v6452_v16 = vadd.f32 %v12167_v32, %v5944_v7 }
 0x4f5   :  { %v8051_v30 = vpop.f32.mrf.mxu0 }
 0x4f6   :  { %v12211_v44 = vadd.f32 %v8051_v30, %v8050_v25 }
 0x4f7   :  { %v8053_v4 = vpop.f32.mrf.mxu0 }
 0x4f8   :  { %v5934_v30 = vpop.permute.xlu1 %5933 }
 0x4f9   :  { %v8054_v54 = vpop.f32.mrf.mxu0 }
 0x4fa   :  { %v12217_v21 = vadd.f32 %v8054_v54, %v8053_v4  ;;  %v6444_v54 = vadd.f32 %v12163_v41, %v5934_v30 }
 0x4fb   :  { %v8056_v15 = vpop.f32.mrf.mxu0 }
 0x4fd   :  { %v8057_v10 = vpop.f32.mrf.mxu0 }
 0x4fe   :  { %v12221_v46 = vadd.f32 %v8057_v10, %v8056_v15 }
 0x4ff   :  { %v8059_v33 = vpop.f32.mrf.mxu0 }
 0x501   :  { %v8060_v50 = vpop.f32.mrf.mxu0 }
 0x502   :  { %v12225_v58 = vadd.f32 %v8060_v50, %v8059_v33 }
 0x503   :  { %v12260_v7 = vpop.f32.mrf.mxu0 }
 0x533   :  { %v8114_v6 = vpop.f32.mrf.mxu1 }
 0x535   :  { %v8115_v18 = vpop.f32.mrf.mxu1 }
 0x536   :  { %v8116_v51 = vadd.f32 %v8115_v18, %v8114_v6 }
 0x537   :  { %v8117_v62 = vpop.f32.mrf.mxu1 }
 0x538   :  { %v6602_v25 = vadd.f32 %v8116_v51, %v6441_v42 }
 0x539   :  { %v8118_v4 = vpop.f32.mrf.mxu1 }
 0x53a   :  { %v8119_v15 = vadd.f32 %v8118_v4, %v8117_v62  ;;  %v6728_v60 = vmax.f32 %v6602_v25, 0.0  ;;  %v6457_v62 = vadd.f32 %v12169_v61, %v5949_v24 }
 0x53b   :  { %v8120_v10 = vpop.f32.mrf.mxu1 }
 0x53c   :  { %v6605_v33 = vadd.f32 %v8119_v15, %v6444_v54 }
 0x53d   :  { %v8121_v50 = vpop.f32.mrf.mxu1 }
 0x53e   :  { %v6729_v34 = vmax.f32 %v6605_v33, 0.0  ;;  %v8122_v1 = vadd.f32 %v8121_v50, %v8120_v10 }
 0x53f   :  { %v8123_v20 = vpop.f32.mrf.mxu1 }
 0x540   :  { %v12252_v55 = vpack.c.bf16 %v6729_v34, %v6728_v60  ;;  %v6610_v11 = vadd.f32 %v8122_v1, %v6449_v0  ;;  %v6460_v60 = vadd.f32 %v12171_v28, %v5954_v45 }
 0x541   :  { %v8124_v6 = vpop.f32.mrf.mxu1 }
 0x542   :  { %12636 = vst [vmem:[#allocation32_spill] sm:$0xff] %v12252_v55  ;;  %v8125_v18 = vadd.f32 %v8124_v6, %v8123_v20  ;;  %v6730_v30 = vmax.f32 %v6610_v11, 0.0  ;;  %v6465_v20 = vadd.f32 %v12173_v13, %v5959_v3  ;;  %v6473_v13 = vadd.f32 %v12177_v12, %v12229_v26 }
 0x543   :  { %v8126_v42 = vpop.f32.mrf.mxu1 }
 0x544   :  { %v6613_v51 = vadd.f32 %v8125_v18, %v6452_v16  ;;  %v6468_v16 = vadd.f32 %v12175_v39, %v5964_v31  ;;  %v12265_v18 = vpop.f32.mrf.mxu0 }
 0x545   :  { %v8127_v41 = vpop.f32.mrf.mxu1 }
 0x546   :  { %v6731_v4 = vmax.f32 %v6613_v51, 0.0  ;;  %v8128_v54 = vadd.f32 %v8127_v41, %v8126_v42  ;;  %v12269_v3 = vpop.f32.mrf.mxu0 }
 0x547   :  { %v8129_v43 = vpop.f32.mrf.mxu1 }
 0x548   :  { %v12256_v17 = vpack.c.bf16 %v6731_v4, %v6730_v30  ;;  %v6618_v25 = vadd.f32 %v8128_v54, %v6457_v62  ;;  %v8821_v54 = vld [vmem:[%s12486_s8 + $0x4] ss:$8 sps:$4 sm:$0xff]  }
 0x549   :  { %v8130_v15 = vpop.f32.mrf.mxu1  ;;  %7000 = vmatprep.mubr.bf16.mxu0 %v8821_v54 }
 0x54a   :  { %12637 = vst [vmem:[#allocation13_spill] sm:$0xff] %v12256_v17  ;;  %v8131_v1 = vadd.f32 %v8130_v15, %v8129_v43  ;;  %v6732_v10 = vmax.f32 %v6618_v25, 0.0  ;;  %v6476_v25 = vadd.f32 %v12179_v29, %v12231_v5  ;;  %v12278_v15 = vpop.f32.mrf.mxu0  ;;  %v6484_v29 = vadd.f32 %v12189_v14, %v12219_v47 }
 0x54b   :  { %v8132_v34 = vpop.f32.mrf.mxu1  ;;  %v6492_v14 = vadd.f32 %v12197_v40, %v12205_v48  ;;  %v6500_v40 = vadd.f32 %v12207_v19, %v12191_v38  ;;  %v6508_v38 = vadd.f32 %v12217_v21, %v12247_v52  ;;  %v6516_v21 = vadd.f32 %v12225_v58, %v12243_v2 }
 0x54c   :  { %v6621_v0 = vadd.f32 %v8131_v1, %v6460_v60  ;;  %v8064_v52 = vadd.f32 %v12265_v18, %v12260_v7 }
 0x54d   :  { %v8133_v32 = vpop.f32.mrf.mxu1 }
 0x54e   :  { %v6733_v61 = vmax.f32 %v6621_v0, 0.0  ;;  %v8134_v24 = vadd.f32 %v8133_v32, %v8132_v34  ;;  %v6481_v34 = vadd.f32 %v12183_v49, %v12215_v35  ;;  %v12282_v0 = vpop.f32.mrf.mxu0  ;;  %v6489_v49 = vadd.f32 %v12193_v57, %v12201_v37 }
 0x54f   :  { %v8135_v33 = vpop.f32.mrf.mxu1  ;;  %v6497_v57 = vadd.f32 %v12203_v63, %v12187_v27  ;;  %v6505_v27 = vadd.f32 %v12211_v44, %v12245_v36  ;;  %v6513_v44 = vadd.f32 %v12221_v46, %v12241_v59  ;;  %v6521_v59 = vadd.f32 %v8064_v52, %v12237_v56 }
 0x550   :  { %v12262_v50 = vpack.c.bf16 %v6733_v61, %v6732_v10  ;;  %v6626_v11 = vadd.f32 %v8134_v24, %v6465_v20  ;;  %v12288_v5 = vpop.f32.mrf.mxu0 }
 0x551   :  { %v8136_v6 = vpop.f32.mrf.mxu1 }
 0x552   :  { %12638 = vst [vmem:[#allocation28_spill] sm:$0xff] %v12262_v50  ;;  %v8137_v28 = vadd.f32 %v8136_v6, %v8135_v33  ;;  %v6734_v41 = vmax.f32 %v6626_v11, 0.0  ;;  %v12292_v35 = vpop.f32.mrf.mxu0 }
 0x553   :  { %v8138_v45 = vpop.f32.mrf.mxu1 }
 0x554   :  { %v6629_v42 = vadd.f32 %v8137_v28, %v6468_v16  ;;  %v12298_v47 = vpop.f32.mrf.mxu0 }
 0x555   :  { %v8139_v51 = vpop.f32.mrf.mxu1 }
 0x556   :  { %v6735_v62 = vmax.f32 %v6629_v42, 0.0  ;;  %v8140_v30 = vadd.f32 %v8139_v51, %v8138_v45  ;;  %v12302_v37 = vpop.f32.mrf.mxu0 }
 0x557   :  { %v8141_v4 = vpop.f32.mrf.mxu1 }
 0x558   :  { %v12274_v39 = vpack.c.bf16 %v6735_v62, %v6734_v41  ;;  %v6634_v31 = vadd.f32 %v8140_v30, %v6473_v13  ;;  %v12308_v48 = vpop.f32.mrf.mxu0 }
 0x559   :  { %v8142_v43 = vpop.f32.mrf.mxu1 }
 0x55a   :  { %12639 = vst [vmem:[#allocation29_spill] sm:$0xff] %v12274_v39  ;;  %v8143_v12 = vadd.f32 %v8142_v43, %v8141_v4  ;;  %v6736_v32 = vmax.f32 %v6634_v31, 0.0  ;;  %v12312_v63 = vpop.f32.mrf.mxu0 }
 0x55b   :  { %v8144_v26 = vpop.f32.mrf.mxu1 }
 0x55c   :  { %v6637_v60 = vadd.f32 %v8143_v12, %v6476_v25  ;;  %v12318_v19 = vpop.f32.mrf.mxu0 }
 0x55d   :  { %v8145_v1 = vpop.f32.mrf.mxu1 }
 0x55e   :  { %v6737_v20 = vmax.f32 %v6637_v60, 0.0  ;;  %v8146_v10 = vadd.f32 %v8145_v1, %v8144_v26  ;;  %v8080_v36 = vpop.f32.mrf.mxu0 }
 0x55f   :  { %v8147_v61 = vpop.f32.mrf.mxu1 }
 0x560   :  { %v12284_v24 = vpack.c.bf16 %v6737_v20, %v6736_v32  ;;  %v6642_v33 = vadd.f32 %v8146_v10, %v6481_v34 }
 0x561   :  { %v8148_v11 = vpop.f32.mrf.mxu1 }
 0x562   :  { %12640 = vst [vmem:[#allocation24_spill] sm:$0xff] %v12284_v24  ;;  %v8149_v6 = vadd.f32 %v8148_v11, %v8147_v61  ;;  %v6738_v42 = vmax.f32 %v6642_v33, 0.0 }
 0x563   :  { %v8150_v16 = vpop.f32.mrf.mxu1 }
 0x564   :  { %v6645_v28 = vadd.f32 %v8149_v6, %v6484_v29 }
 0x565   :  { %v8151_v45 = vpop.f32.mrf.mxu1 }
 0x566   :  { %v6739_v51 = vmax.f32 %v6645_v28, 0.0  ;;  %v8152_v13 = vadd.f32 %v8151_v45, %v8150_v16 }
 0x567   :  { %v8153_v41 = vpop.f32.mrf.mxu1 }
 0x568   :  { %v12294_v62 = vpack.c.bf16 %v6739_v51, %v6738_v42  ;;  %v6650_v30 = vadd.f32 %v8152_v13, %v6489_v49 }
 0x569   :  { %v8154_v4 = vpop.f32.mrf.mxu1 }
 0x56a   :  { %12641 = vst [vmem:[#allocation25_spill] sm:$0xff] %v12294_v62  ;;  %v8155_v54 = vadd.f32 %v8154_v4, %v8153_v41  ;;  %v6740_v12 = vmax.f32 %v6650_v30, 0.0 }
 0x56b   :  { %v8156_v31 = vpop.f32.mrf.mxu1 }
 0x56c   :  { %v6653_v43 = vadd.f32 %v8155_v54, %v6492_v14 }
 0x56d   :  { %v8157_v25 = vpop.f32.mrf.mxu1 }
 0x56e   :  { %v6741_v26 = vmax.f32 %v6653_v43, 0.0  ;;  %v8158_v60 = vadd.f32 %v8157_v25, %v8156_v31 }
 0x56f   :  { %v8159_v1 = vpop.f32.mrf.mxu1 }
 0x570   :  { %v12304_v34 = vpack.c.bf16 %v6741_v26, %v6740_v12  ;;  %v6658_v32 = vadd.f32 %v8158_v60, %v6497_v57  ;;  %v8081_v12 = vpop.f32.mrf.mxu0 }
 0x571   :  { %v8160_v20 = vpop.f32.mrf.mxu1  ;;  %v8082_v39 = vadd.f32 %v8081_v12, %v8080_v36  ;;  %v12645_v36 = vld [vmem:[#allocation37_spill] sm:$0xff] }
 0x572   :  { %v8161_v10 = vadd.f32 %v8160_v20, %v8159_v1  ;;  %v6742_v29 = vmax.f32 %v6658_v32, 0.0  ;;  %v8083_v32 = vpop.f32.mrf.mxu0 }
 0x573   :  { %v8162_v61 = vpop.f32.mrf.mxu1 }
 0x574   :  { %v6661_v33 = vadd.f32 %v8161_v10, %v6500_v40  ;;  %v8084_v2 = vpop.f32.mrf.mxu0 }
 0x575   :  { %v8163_v11 = vpop.f32.mrf.mxu1 }
 0x576   :  { %v6743_v6 = vmax.f32 %v6661_v33, 0.0  ;;  %v8164_v16 = vadd.f32 %v8163_v11, %v8162_v61 }
 0x577   :  { %v8165_v28 = vpop.f32.mrf.mxu1 }
 0x578   :  { %v12314_v45 = vpack.c.bf16 %v6743_v6, %v6742_v29  ;;  %v6666_v49 = vadd.f32 %v8164_v16, %v6505_v27  ;;  %v8086_v27 = vpop.f32.mrf.mxu0 }
 0x579   :  { %v8166_v42 = vpop.f32.mrf.mxu1 }
 0x57a   :  { %v8167_v51 = vadd.f32 %v8166_v42, %v8165_v28  ;;  %v6744_v4 = vmax.f32 %v6666_v49, 0.0  ;;  %v8087_v6 = vpop.f32.mrf.mxu0 }
 0x57b   :  { %v8168_v13 = vpop.f32.mrf.mxu1 }
 0x57c   :  { %v6669_v41 = vadd.f32 %v8167_v51, %v6508_v38  ;;  %v8089_v49 = vpop.f32.mrf.mxu0 }
 0x57d   :  { %v8169_v30 = vpop.f32.mrf.mxu1 }
 0x57e   :  { %v6745_v14 = vmax.f32 %v6669_v41, 0.0  ;;  %v8170_v54 = vadd.f32 %v8169_v30, %v8168_v13  ;;  %v8090_v51 = vpop.f32.mrf.mxu0 }
 0x57f   :  { %v8171_v31 = vpop.f32.mrf.mxu1 }
 0x580   :  { %v6674_v43 = vadd.f32 %v8170_v54, %v6513_v44  ;;  %v12322_v25 = vpack.c.bf16 %v6745_v14, %v6744_v4  ;;  %v8092_v30 = vpop.f32.mrf.mxu0 }
 0x581   :  { %v8172_v57 = vpop.f32.mrf.mxu1 }
 0x582   :  { %12642 = vst [vmem:[#allocation19_spill] sm:$0xff] %v12322_v25  ;;  %v8173_v26 = vadd.f32 %v8172_v57, %v8171_v31  ;;  %v6746_v20 = vmax.f32 %v6674_v43, 0.0  ;;  %v8093_v14 = vpop.f32.mrf.mxu0  ;;  %v8085_v25 = vadd.f32 %v8084_v2, %v8083_v32 }
 0x583   :  { %v8174_v60 = vpop.f32.mrf.mxu1 }
 0x584   :  { %v6677_v1 = vadd.f32 %v8173_v26, %v6516_v21  ;;  %v8095_v43 = vpop.f32.mrf.mxu0  ;;  %v6548_v32 = vadd.f32 %v8085_v25, %v12213_v22 }
 0x585   :  { %v8175_v46 = vpop.f32.mrf.mxu1 }
 0x586   :  { %v6747_v40 = vmax.f32 %v6677_v1, 0.0  ;;  %v8176_v10 = vadd.f32 %v8175_v46, %v8174_v60  ;;  %v8096_v52 = vpop.f32.mrf.mxu0  ;;  %v8091_v60 = vadd.f32 %v8090_v51, %v8089_v49  ;;  %v8094_v1 = vadd.f32 %v8093_v14, %v8092_v30 }
 0x587   :  { %v12329_v61 = vpop.f32.mrf.mxu1  ;;  %v8088_v46 = vadd.f32 %v8087_v6, %v8086_v27  ;;  %v8079_v30 = vadd.f32 %v12318_v19, %v12312_v63 }
 0x588   :  { %v12331_v33 = vadd.f32 %v8176_v10, %v6521_v59  ;;  %v12333_v11 = vpack.c.bf16 %v6747_v40, %v6746_v20  ;;  %v8097_v59 = vadd.f32 %v8096_v52, %v8095_v43  ;;  %v6556_v17 = vadd.f32 %v8091_v60, %v12199_v53 }
 0x589   :  { %v12335_v58 = vpop.f32.mrf.mxu1 }
 0x58a   :  { %12643 = vst [vmem:[#allocation20_spill] sm:$0xff] %v12331_v33  ;;  %12644 = vst [vmem:[#allocation18_spill] sm:$0xff] %v12333_v11  ;;  %v6561_v11 = vadd.f32 %v8094_v1, %v12181_v8  ;;  %v6553_v33 = vadd.f32 %v8088_v46, %v12195_v23  ;;  %v6564_v24 = vadd.f32 %v8097_v59, %v12185_v9  ;;  %v12654_v1 = vld [vmem:[#allocation29_spill] sm:$0xff]  ;;  %v12655_v46 = vld [vmem:[#allocation28_spill] sm:$0xff] }
 0x58b   :  { %v12337_v7 = vpop.f32.mrf.mxu1  ;;  %v8076_v8 = vadd.f32 %v12308_v48, %v12302_v37  ;;  %v6545_v23 = vadd.f32 %v8082_v39, %v12645_v36  ;;  %v12647_v37 = vld [vmem:[#allocation38_spill] sm:$0xff] }
 0x58c   :  { %v8834_v36 = vld [vmem:[%s12486_s8 + $0x50] ss:$8 sps:$4 sm:$0xff]  }
 0x58d   :  { %v12339_v18 = vpop.f32.mrf.mxu1  ;;  %v6537_v48 = vadd.f32 %v8076_v8, %v12647_v37  ;;  %v8836_v8 = vld [vmem:[%s12486_s8 + $0x54] ss:$8 sps:$4 sm:$0xff]  }
 0x58f   :  { %v8183_v29 = vpop.f32.mrf.mxu1 }
 0x591   :  { %v8184_v56 = vpop.f32.mrf.mxu1  ;;  %v12656_v59 = vld [vmem:[#allocation18_spill] sm:$0xff] }
 0x592   :  { %v8185_v39 = vadd.f32 %v8184_v56, %v8183_v29  ;;  %v8179_v29 = vadd.f32 %v12335_v58, %v12329_v61  ;;  %v12652_v61 = vld [vmem:[#allocation24_spill] sm:$0xff] }
 0x593   :  { %v8186_v16 = vpop.f32.mrf.mxu1  ;;  %v12653_v58 = vld [vmem:[#allocation20_spill] sm:$0xff] }
 0x594   :  { %v6748_v60 = vmax.f32 %v12653_v58, 0.0 }
 0x595   :  { %v8187_v28 = vpop.f32.mrf.mxu1 }
 0x596   :  { %v8188_v19 = vadd.f32 %v8187_v28, %v8186_v16  ;;  %v8182_v16 = vadd.f32 %v12339_v18, %v12337_v7 }
 0x597   :  { %v8189_v42 = vpop.f32.mrf.mxu1 }
 0x598   :  { %v6698_v28 = vadd.f32 %v8188_v19, %v6537_v48 }
 0x599   :  { %v8190_v38 = vpop.f32.mrf.mxu1 }
 0x59a   :  { %v8191_v12 = vadd.f32 %v8190_v38, %v8189_v42  ;;  %v8067_v38 = vadd.f32 %v12278_v15, %v12269_v3  ;;  %v12650_v3 = vld [vmem:[#allocation9_spill] sm:$0xff] }
 0x59b   :  { %v8192_v13 = vpop.f32.mrf.mxu1 }
 0x59c   :  { %v6524_v15 = vadd.f32 %v8067_v38, %v12650_v3 }
 0x59d   :  { %v8193_v41 = vpop.f32.mrf.mxu1 }
 0x59e   :  { %v8194_v2 = vadd.f32 %v8193_v41, %v8192_v13  ;;  %v6685_v43 = vadd.f32 %v8179_v29, %v6524_v15 }
 0x59f   :  { %v8195_v44 = vpop.f32.mrf.mxu1 }
 0x5a0   :  { %v6706_v22 = vadd.f32 %v8194_v2, %v6545_v23  ;;  %v6749_v52 = vmax.f32 %v6685_v43, 0.0  ;;  %v8828_v2 = vld [vmem:[%s12486_s8 + $0x30] ss:$8 sps:$4 sm:$0xff]   ;;  %v8839_v23 = vld [vmem:[%s12486_s8 + $0x64] ss:$8 sps:$4 sm:$0xff]  }
 0x5a1   :  { %v8196_v4 = vpop.f32.mrf.mxu1 }
 0x5a2   :  { %v8197_v49 = vadd.f32 %v8196_v4, %v8195_v44  ;;  %v6754_v13 = vmax.f32 %v6706_v22, 0.0 }
 0x5a3   :  { %v8198_v54 = vpop.f32.mrf.mxu1 }
 0x5a4   :  { %v6709_v9 = vadd.f32 %v8197_v49, %v6548_v32  ;;  %v12659_v49 = vld [vmem:[#allocation32_spill] sm:$0xff] }
 0x5a5   :  { %v8199_v31 = vpop.f32.mrf.mxu1  ;;  %v8830_v32 = vld [vmem:[%s12486_s8 + $0x34] ss:$8 sps:$4 sm:$0xff]  }
 0x5a6   :  { %v8200_v50 = vadd.f32 %v8199_v31, %v8198_v54  ;;  %v6752_v31 = vmax.f32 %v6698_v28, 0.0 }
 0x5a7   :  { %v8201_v57 = vpop.f32.mrf.mxu1 }
 0x5a8   :  { %v6714_v53 = vadd.f32 %v8200_v50, %v6553_v33 }
 0x5a9   :  { %v8202_v21 = vpop.f32.mrf.mxu1 }
 0x5aa   :  { %v8203_v40 = vadd.f32 %v8202_v21, %v8201_v57  ;;  %v6756_v25 = vmax.f32 %v6714_v53, 0.0  ;;  %v12651_v57 = vld [vmem:[#allocation25_spill] sm:$0xff] }
 0x5ab   :  { %v8204_v26 = vpop.f32.mrf.mxu1  ;;  %v8833_v53 = vld [vmem:[%s12486_s8 + $0x44] ss:$8 sps:$4 sm:$0xff]  }
 0x5ac   :  { %v6717_v51 = vadd.f32 %v8203_v40, %v6556_v17  ;;  %v12658_v40 = vld [vmem:[#allocation19_spill] sm:$0xff] }
 0x5ad   :  { %v8205_v20 = vpop.f32.mrf.mxu1 }
 0x5ae   :  { %v8206_v10 = vadd.f32 %v8205_v20, %v8204_v26  ;;  %v6757_v54 = vmax.f32 %v6717_v51, 0.0  ;;  %v12657_v20 = vld [vmem:[#allocation13_spill] sm:$0xff]  ;;  %v8824_v51 = vld [vmem:[%s12486_s8 + $0x14] ss:$8 sps:$4 sm:$0xff]  }
 0x5af   :  { %v8207_v55 = vpop.f32.mrf.mxu1 }
 0x5b0   :  { %v6722_v27 = vadd.f32 %v8206_v10, %v6561_v11  ;;  %v6755_v11 = vmax.f32 %v6709_v9, 0.0  ;;  %v6774_v42 = vpack.c.bf16 %v6757_v54, %v6756_v25  ;;  %v8819_v10 = vld [vmem:[%s12486_s8] ss:$8 sps:$4 sm:$0xff]   ;;  %v8842_v9 = vld [vmem:[%s12486_s8 + $0x74] ss:$8 sps:$4 sm:$0xff]  }
 0x5b1   :  { %v8208_v62 = vpop.f32.mrf.mxu1  ;;  %v8840_v54 = vld [vmem:[%s12486_s8 + $0x70] ss:$8 sps:$4 sm:$0xff]  }
 0x5b2   :  { %v8209_v6 = vadd.f32 %v8208_v62, %v8207_v55  ;;  %v6758_v44 = vmax.f32 %v6722_v27, 0.0  ;;  %v8073_v55 = vadd.f32 %v12298_v47, %v12292_v35  ;;  %v12646_v62 = vld [vmem:[#allocation33_spill] sm:$0xff]  ;;  %v12648_v35 = vld [vmem:[#allocation11_spill] sm:$0xff]  ;;  %v6773_v4 = vpack.c.bf16 %v6755_v11, %v6754_v13 }
 0x5b3   :  { %v6540_v63 = vadd.f32 %v8079_v30, %v12646_v62  ;;  %v8822_v27 = vld [vmem:[%s12486_s8 + $0x10] ss:$8 sps:$4 sm:$0xff]   ;;  %v8825_v30 = vld [vmem:[%s12486_s8 + $0x20] ss:$8 sps:$4 sm:$0xff]  }
 0x5b4   :  { %v6725_v14 = vadd.f32 %v8209_v6, %v6564_v24  ;;  %v8070_v24 = vadd.f32 %v12288_v5, %v12282_v0  ;;  %v6532_v47 = vadd.f32 %v8073_v55, %v12648_v35  ;;  %v12649_v0 = vld [vmem:[#allocation34_spill] sm:$0xff] }
 0x5b5   :  { %v6701_v33 = vadd.f32 %v8191_v12, %v6540_v63  ;;  %v8827_v6 = vld [vmem:[%s12486_s8 + $0x24] ss:$8 sps:$4 sm:$0xff]   ;;  %v8837_v12 = vld [vmem:[%s12486_s8 + $0x60] ss:$8 sps:$4 sm:$0xff]  }
 0x5b6   :  { %v6759_v17 = vmax.f32 %v6725_v14, 0.0  ;;  %v6529_v5 = vadd.f32 %v8070_v24, %v12649_v0  ;;  %v6693_v56 = vadd.f32 %v8185_v39, %v6532_v47  ;;  %v8831_v14 = vld [vmem:[%s12486_s8 + $0x40] ss:$8 sps:$4 sm:$0xff]  }
 0x5b7   :  { %v6753_v41 = vmax.f32 %v6701_v33, 0.0  ;;  %v8843_v63 = vld [vmem:[%s12488_s10] sm:$0xff]  }
 0x5b8   :  { %v6775_v50 = vpack.c.bf16 %v6759_v17, %v6758_v44  ;;  %v6751_v7 = vmax.f32 %v6693_v56, 0.0  ;;  %v12422_v44 = vpop.permute.xlu0 %6880  ;;  %v12424_v17 = vpop.permute.xlu1 %6885  ;;  %8567 = vmatprep.mubr.bf16.mxu1 %v8843_v63 }
 0x5b9   :  { %v6772_v18 = vpack.c.bf16 %v6753_v41, %v6752_v31 }
 0x5ba   :  { %8210 = vmatprep.subr.bf16.mxu0 %v6775_v50 }
 0x5bb   :  { %8211 = vmatpush3.bf16.msra.mxu0 %v12314_v45  ;;  %v6690_v45 = vadd.f32 %v8182_v16, %v6529_v5 }
 0x5bc   :  { %8212 = vmatprep.subr.bf16.mxu0 %v6774_v42  ;;  %v12426_v55 = vpop.permute.xlu0 %6870  ;;  %v12428_v62 = vpop.permute.xlu1 %6875 }
 0x5bd   :  { %v6750_v21 = vmax.f32 %v6690_v45, 0.0 }
 0x5bf   :  { %8213 = vmatpush3.bf16.msra.mxu0 %v12304_v34  ;;  %v6771_v26 = vpack.c.bf16 %v6751_v7, %v6750_v21  ;;  %v6770_v34 = vpack.c.bf16 %v6749_v52, %v6748_v60 }
 0x5c0   :  { %8214 = vmatprep.subr.bf16.mxu0 %v6773_v4  ;;  %v12433_v19 = vpop.permute.xlu0 %6860  ;;  %v12435_v22 = vpop.permute.xlu1 %6865 }
 0x5c3   :  { %8215 = vmatpush3.bf16.msra.mxu0 %v12651_v57 }
 0x5c4   :  { %8216 = vmatprep.subr.bf16.mxu0 %v6772_v18  ;;  %v12437_v25 = vpop.permute.xlu0 %6850  ;;  %v12439_v50 = vpop.permute.xlu1 %6855 }
 0x5c7   :  { %8217 = vmatpush3.bf16.msra.mxu0 %v12652_v61 }
 0x5c8   :  { %8218 = vmatprep.subr.bf16.mxu0 %v6771_v26  ;;  %v12441_v24 = vpop.permute.xlu0 %6840  ;;  %v12443_v37 = vpop.permute.xlu1 %6845 }
 0x5cb   :  { %8219 = vmatpush3.bf16.msra.mxu0 %v12654_v1 }
 0x5cc   :  { %8220 = vmatprep.subr.bf16.mxu0 %v6770_v34  ;;  %v12445_v48 = vpop.permute.xlu0 %6830  ;;  %v12447_v39 = vpop.permute.xlu1 %6835 }
 0x5cf   :  { %8221 = vmatpush3.bf16.msra.mxu0 %v12655_v46 }
 0x5d0   :  { %8222 = vmatprep.subr.bf16.mxu0 %v12656_v59  ;;  %v6821_v33 = vpop.permute.xlu0 %6820  ;;  %v6826_v42 = vpop.permute.xlu1 %6825 }
 0x5d3   :  { %8223 = vmatpush3.bf16.msra.mxu0 %v12657_v20 }
 0x5d4   :  { %8224 = vmatprep.subr.bf16.mxu0 %v12658_v40  ;;  %v6811_v16 = vpop.permute.xlu0 %6810  ;;  %v6816_v5 = vpop.permute.xlu1 %6815 }
 0x5d7   :  { %8225 = vmatpush3.bf16.msra.mxu0 %v12659_v49 }
 0x5da   :  { %7001 = vmatmul.mubr.bf16.vlgmr.msra.gmra.mxu0 %v8819_v10 }
 0x5db   :  { %7008 = vmatprep.mubr.bf16.mxu0 %v8824_v51 }
 0x5e2   :  { %7009 = vmatmul.mubr.bf16.gmra.mxu0 %v8822_v27 }
 0x5e3   :  { %7016 = vmatprep.mubr.bf16.mxu0 %v8827_v6 }
 0x5ea   :  { %7017 = vmatmul.mubr.bf16.gmra.mxu0 %v8825_v30 }
 0x5eb   :  { %7024 = vmatprep.mubr.bf16.mxu0 %v8830_v32 }
 0x5f2   :  { %7025 = vmatmul.mubr.bf16.gmra.mxu0 %v8828_v2 }
 0x5f3   :  { %7032 = vmatprep.mubr.bf16.mxu0 %v8833_v53 }
 0x5fa   :  { %7033 = vmatmul.mubr.bf16.gmra.mxu0 %v8831_v14 }
 0x5fb   :  { %7040 = vmatprep.mubr.bf16.mxu0 %v8836_v8 }
 0x602   :  { %7041 = vmatmul.mubr.bf16.gmra.mxu0 %v8834_v36 }
 0x603   :  { %7048 = vmatprep.mubr.bf16.mxu0 %v8839_v23 }
 0x60a   :  { %7049 = vmatmul.mubr.bf16.gmra.mxu0 %v8837_v12 }
 0x60b   :  { %7056 = vmatprep.mubr.bf16.mxu0 %v8842_v9 }
 0x612   :  { %7057 = vmatmul.mubr.bf16.gmra.mxu0 %v8840_v54 }
 0x69a   :  { %v8226_v11 = vpop.f32.mrf.mxu0 }
 0x69c   :  { %v8227_v38 = vpop.f32.mrf.mxu0 }
 0x69d   :  { %v8228_v35 = vadd.f32 %v8227_v38, %v8226_v11 }
 0x69e   :  { %v8229_v47 = vpop.f32.mrf.mxu0 }
 0x69f   :  { %v7003_v13 = vadd.f32 %v8228_v35, %v6811_v16 }
 0x6a0   :  { %v8230_v28 = vpop.f32.mrf.mxu0 }
 0x6a1   :  { %v8231_v0 = vadd.f32 %v8230_v28, %v8229_v47  ;;  %v7065_v4 = vmax.f32 %v7003_v13, 0.0 }
 0x6a2   :  { %v8232_v29 = vpop.f32.mrf.mxu0 }
 0x6a3   :  { %v7006_v56 = vadd.f32 %v8231_v0, %v6816_v5 }
 0x6a4   :  { %v8233_v41 = vpop.f32.mrf.mxu0 }
 0x6a5   :  { %v7066_v3 = vmax.f32 %v7006_v56, 0.0  ;;  %v8234_v15 = vadd.f32 %v8233_v41, %v8232_v29 }
 0x6a6   :  { %v8235_v45 = vpop.f32.mrf.mxu0 }
 0x6a7   :  { %v12449_v31 = vpack.c.bf16 %v7066_v3, %v7065_v4  ;;  %v7011_v7 = vadd.f32 %v8234_v15, %v6821_v33 }
 0x6a8   :  { %v8236_v43 = vpop.f32.mrf.mxu0 }
 0x6a9   :  { %v8237_v18 = vadd.f32 %v8236_v43, %v8235_v45  ;;  %v7067_v26 = vmax.f32 %v7011_v7, 0.0 }
 0x6aa   :  { %v8238_v57 = vpop.f32.mrf.mxu0 }
 0x6ab   :  { %v7014_v21 = vadd.f32 %v8237_v18, %v6826_v42 }
 0x6ac   :  { %v8239_v52 = vpop.f32.mrf.mxu0 }
 0x6ad   :  { %v7068_v61 = vmax.f32 %v7014_v21, 0.0 }
 0x6ae   :  { %v8241_v58 = vpop.f32.mrf.mxu0 }
 0x6af   :  { %v12451_v60 = vpack.c.bf16 %v7068_v61, %v7067_v26 }
 0x6b0   :  { %v8242_v34 = vpop.f32.mrf.mxu0 }
 0x6b2   :  { %v8244_v1 = vpop.f32.mrf.mxu0 }
 0x6b4   :  { %v8245_v46 = vpop.f32.mrf.mxu0 }
 0x6b6   :  { %v8247_v59 = vpop.f32.mrf.mxu0 }
 0x6b8   :  { %v8248_v20 = vpop.f32.mrf.mxu0 }
 0x6ba   :  { %v8250_v40 = vpop.f32.mrf.mxu0 }
 0x6bc   :  { %v8251_v10 = vpop.f32.mrf.mxu0 }
 0x6bd   :  { %v8252_v41 = vadd.f32 %v8251_v10, %v8250_v40 }
 0x6be   :  { %v8253_v49 = vpop.f32.mrf.mxu0 }
 0x6c0   :  { %v8254_v51 = vpop.f32.mrf.mxu0 }
 0x6c1   :  { %v8255_v13 = vadd.f32 %v8254_v51, %v8253_v49 }
 0x6c2   :  { %v8256_v27 = vpop.f32.mrf.mxu0 }
 0x6c4   :  { %v8257_v6 = vpop.f32.mrf.mxu0 }
 0x6c5   :  { %v8258_v47 = vadd.f32 %v8257_v6, %v8256_v27 }
 0x6c6   :  { %v8259_v30 = vpop.f32.mrf.mxu0 }
 0x6c7   :  { %v7043_v4 = vadd.f32 %v8258_v47, %v12433_v19  ;;  %v8240_v19 = vadd.f32 %v8239_v52, %v8238_v57  ;;  %v7115_v57 = vpop.permute.xlu1 %7114 }
 0x6c8   :  { %v8260_v32 = vpop.f32.mrf.mxu0 }
 0x6c9   :  { %v8261_v11 = vadd.f32 %v8260_v32, %v8259_v30  ;;  %v7075_v7 = vmax.f32 %v7043_v4, 0.0 }
 0x6ca   :  { %v8262_v2 = vpop.f32.mrf.mxu0 }
 0x6cb   :  { %v7046_v0 = vadd.f32 %v8261_v11, %v12435_v22  ;;  %v8243_v22 = vadd.f32 %v8242_v34, %v8241_v58  ;;  %v7105_v6 = vpop.permute.xlu1 %7104 }
 0x6cc   :  { %v8263_v53 = vpop.f32.mrf.mxu0 }
 0x6cd   :  { %v8264_v63 = vadd.f32 %v8263_v53, %v8262_v2  ;;  %v7076_v45 = vmax.f32 %v7046_v0, 0.0 }
 0x6ce   :  { %v8265_v14 = vpop.f32.mrf.mxu0 }
 0x6cf   :  { %v7051_v16 = vadd.f32 %v8264_v63, %v12426_v55  ;;  %v8246_v55 = vadd.f32 %v8245_v46, %v8244_v1  ;;  %v7086_v26 = vpack.c.bf16 %v7076_v45, %v7075_v7 }
 0x6d0   :  { %v8266_v8 = vpop.f32.mrf.mxu0 }
 0x6d1   :  { %v8267_v12 = vadd.f32 %v8266_v8, %v8265_v14  ;;  %v7077_v3 = vmax.f32 %v7051_v16, 0.0  ;;  %v7027_v61 = vadd.f32 %v8246_v55, %v12441_v24  ;;  %v8844_v24 = vld [vmem:[%s12488_s10 + $0x8] sm:$0xff]  }
 0x6d2   :  { %v8268_v36 = vpop.f32.mrf.mxu0 }
 0x6d3   :  { %v7054_v42 = vadd.f32 %v8267_v12, %v12428_v62  ;;  %v8249_v62 = vadd.f32 %v8248_v20, %v8247_v59  ;;  %v7071_v1 = vmax.f32 %v7027_v61, 0.0  ;;  %v7184_v12 = vld [vmem:[%s12490_s12] sm:$0x1] }
 0x6d4   :  { %v8269_v23 = vpop.f32.mrf.mxu0 }
 0x6d5   :  { %v8270_v9 = vadd.f32 %v8269_v23, %v8268_v36  ;;  %v7078_v5 = vmax.f32 %v7054_v42, 0.0  ;;  %v7030_v18 = vadd.f32 %v8249_v62, %v12443_v37 }
 0x6d6   :  { %v8271_v54 = vpop.f32.mrf.mxu0 }
 0x6d7   :  { %v7059_v38 = vadd.f32 %v8270_v9, %v12422_v44  ;;  %v7038_v44 = vadd.f32 %v8255_v13, %v12439_v50  ;;  %v7087_v43 = vpack.c.bf16 %v7078_v5, %v7077_v3  ;;  %v7022_v50 = vadd.f32 %v8243_v22, %v12447_v39  ;;  %v7110_v39 = vpop.permute.xlu0 %7109 }
 0x6d8   :  { %v8272_v33 = vpop.f32.mrf.mxu0  ;;  %v7072_v20 = vmax.f32 %v7030_v18, 0.0  ;;  %v7191_v9 = vlaneseq }
 0x6d9   :  { %v8273_v35 = vadd.f32 %v8272_v33, %v8271_v54  ;;  %v7079_v29 = vmax.f32 %v7059_v38, 0.0  ;;  %v7074_v21 = vmax.f32 %v7038_v44, 0.0  ;;  %v7070_v58 = vmax.f32 %v7022_v50, 0.0 }
 0x6da   :  { %v7084_v34 = vpack.c.bf16 %v7072_v20, %v7071_v1  ;;  %v7192_v54 = vshrl.u32 %v7191_v9, 7 }
 0x6db   :  { %v7062_v28 = vadd.f32 %v8273_v35, %v12424_v17  ;;  %v7035_v17 = vadd.f32 %v8252_v41, %v12437_v25  ;;  %v7019_v25 = vadd.f32 %v8240_v19, %v12445_v48  ;;  %v8893_v48 = vmov 0.0  }
 0x6dc   :  { %v7193_v63 = vsub.s32 0, %v7192_v54 }
 0x6dd   :  { %v7080_v56 = vmax.f32 %v7062_v28, 0.0  ;;  %v7073_v59 = vmax.f32 %v7035_v17, 0.0  ;;  %v7069_v37 = vmax.f32 %v7019_v25, 0.0 }
 0x6df   :  { %v7088_v15 = vpack.c.bf16 %v7080_v56, %v7079_v29  ;;  %v7085_v40 = vpack.c.bf16 %v7074_v21, %v7073_v59  ;;  %v7083_v46 = vpack.c.bf16 %v7070_v58, %v7069_v37 }
 0x6e1   :  { %8551 = vmatprep.subr.bf16.mxu1 %v7088_v15 }
 0x6e2   :  { %8552 = vmatpush3.bf16.msra.mxu1 %v7088_v15 }
 0x6e3   :  { %8553 = vmatprep.subr.bf16.mxu1 %v7087_v43 }
 0x6e6   :  { %8554 = vmatpush3.bf16.msra.mxu1 %v7087_v43 }
 0x6e7   :  { %8555 = vmatprep.subr.bf16.mxu1 %v7086_v26 }
 0x6ea   :  { %8556 = vmatpush3.bf16.msra.mxu1 %v7086_v26 }
 0x6eb   :  { %8557 = vmatprep.subr.bf16.mxu1 %v7085_v40 }
 0x6ee   :  { %8558 = vmatpush3.bf16.msra.mxu1 %v7085_v40 }
 0x6ef   :  { %8559 = vmatprep.subr.bf16.mxu1 %v7084_v34 }
 0x6f2   :  { %8560 = vmatpush3.bf16.msra.mxu1 %v7084_v34 }
 0x6f3   :  { %8561 = vmatprep.subr.bf16.mxu1 %v7083_v46 }
 0x6f6   :  { %8562 = vmatpush3.bf16.msra.mxu1 %v7083_v46 }
 0x6f7   :  { %8563 = vmatprep.subr.bf16.mxu1 %v12451_v60 }
 0x6fa   :  { %8564 = vmatpush3.bf16.msra.mxu1 %v12451_v60  ;;  %v7100_v60 = vpop.permute.xlu0 %7099 }
 0x6fb   :  { %8565 = vmatprep.subr.bf16.mxu1 %v12449_v31 }
 0x6fe   :  { %8566 = vmatpush3.bf16.msra.mxu1 %v12449_v31  ;;  %v7189_v33 = vpop.permute.xlu0 %7188 }
 0x6ff   :  { %8571 = vmatprep.subr.bf16.mxu1 %v8893_v48  ;;  %v7194_v11 = vrot.slane %v7189_v33, %v7193_v63 }
 0x701   :  { %8568 = vmatmul.mubr.bf16.vlgmr.msra.gmra.mxu1 %v8844_v24 }
 0x702   :  { %8575 = vmatprep.mubr.msk.bf16.mxu1 %vm8894_vm3, %v8893_v48 }
 0x7c1   :  { %v8569_v52 = vpop.f32.mrf.mxu1 }
 0x7c2   :  { %v7172_v49 = vadd.f32 %v8569_v52, %v7110_v39 }
 0x7c3   :  { %v7163_v10 = vpop.f32.mrf.mxu1 }
 0x7c4   :  { %v7180_v32 = vmax.f32 %v7172_v49, 0.0  ;;  %v7164_v2 = vadd.f32 %v7163_v10, %v7100_v60 }
 0x7c5   :  { %v8570_v51 = vpop.f32.mrf.mxu1 }
 0x7c6   :  { %v7175_v27 = vadd.f32 %v8570_v51, %v7115_v57  ;;  %v7178_v36 = vmax.f32 %v7164_v2, 0.0 }
 0x7c7   :  { %v7166_v30 = vpop.f32.mrf.mxu1 }
 0x7c8   :  { %v7181_v53 = vmax.f32 %v7175_v27, 0.0  ;;  %v7167_v14 = vadd.f32 %v7166_v30, %v7105_v6 }
 0x7ca   :  { %v7183_v31 = vpack.c.bf16 %v7181_v53, %v7180_v32  ;;  %v7179_v8 = vmax.f32 %v7167_v14, 0.0 }
 0x7cc   :  { %8572 = vmatpush3.bf16.msra.mxu1 %v7183_v31  ;;  %v7182_v23 = vpack.c.bf16 %v7179_v8, %v7178_v36 }
 0x7cd   :  { %8573 = vmatprep.subr.bf16.mxu1 %v8893_v48 }
 0x7d0   :  { %8574 = vmatpush3.bf16.msra.mxu1 %v7182_v23 }
 0x7d3   :  { %8576 = vmatmul.mubr.msk.bf16.vlgmr.msra.gmra.mxu1 %vm7195_vm4, %v7184_v12 }
 0x893   :  { %v7233_v42 = vpop.f32.mrf.mxu1 }
 0x894   :  { %v7234_v38 = vadd.f32 %v7233_v42, %v7194_v11 }
 0x895   :  { %v8577_v35 = vpop.f32.mrf.mxu1 }
 0x896   :  { %7240 = vst.msk [vmem:[#allocation6] sm:$0x1] %vm7239_vm5, %v7234_v38 }
 0x897   :  { %v7236_v47 = vpop.f32.mrf.mxu1 }
 0x898   :  { %8876 = shalt.err (!%p8873_p9)
}
 0x899   :  { %7250 = dma.vmem_to_hbm [thread:$0]  %s7248_s18, 16, %s12492_s14, [#allocation5]   ;;  %v8578_v16 = vpop.f32.mrf.mxu1 }
 0x89a   :  { %8887 = dma.done.wait [#allocation5], 16  }
 0x89b   :  { %8888 = vsyncadd [#allocation5], 4294967280 }
 0x89c   :  { %7254 = vsyncpa [#allocation4], 1 }
 0x89d   :  { %7255 = vsyncpa [#allocation5], 1 }

</bundles_post_ra>
